<compile_context>
chip_gen: v7x
topology: tpu7x:2x2x1
jax: 0.10.0
libtpu: 0.0.40
codegen_flags: <defaults>
</compile_context>

<pallas_src>
import functools

import jax
import jax.numpy as jnp
from jax import lax
from jax.experimental import pallas as pl
from jax.experimental.pallas import tpu as pltpu

_K1 = 128                         # packed layer-1 contraction depth (9*C_in zero-padded to 128)
_COL0 = 8                         # interior column offset in the padded scratch (8-aligned, f32)
_VMEM_LIMIT = 32 * 1024 * 1024    # safe on v5e/v6e (128 MiB) and v7x (64 MiB physical)


# ---------------------------------------------------------------------------
# Fused backbone kernel: conv1 (K-packed) + conv2 (dj-grouped, K-paired) + avg pool
# ---------------------------------------------------------------------------

def _fused_backbone_kernel(xcol_ref, w1_ref, b1_ref, w2p_ref, w2l_ref, b2_ref,
                           out_ref, f1_ref, *, BB, H, W, C1, C2, RC):
    """Per grid step: BB images -> pooled (1, C2) features each.

    xcol_ref : (BB, H*W, K1)   bf16  layer-1 im2col (9*C_in real cols, zero-padded to K1)
    w1_ref   : (K1, C1)        bf16
    b1_ref   : (1, C1)         f32
    w2p_ref  : (3, 2*C1, C2)   bf16  taps (di=0, di=1) stacked along K, one per dj
    w2l_ref  : (3, C1, C2)     bf16  tap di=2, one per dj
    b2_ref   : (1, C2)         f32
    out_ref  : (BB, 1, C2)     f32   global-avg-pooled layer-2 features (lane-dense)
    f1_ref   : (H+2, W_SCR, C1) f32  VMEM scratch; interior at [1:H+1, COL0:COL0+W]
    """
    HW = H * W
    MC = RC * W                      # rows of the feature matrix per chunk (128 here)
    n_chunks = H // RC
    inv_hw = 1.0 / float(HW)

    # Zero the padded scratch every step (keeps the conv-'same' border at zero; interior is
    # fully rewritten per image).  ~300 KiB of VMEM stores -> a few dozen cycles; megacore-safe.
    f1_ref[...] = jnp.zeros_like(f1_ref)

    for b in range(BB):                                    # images in this grid step (unrolled)
        # -------- layer 1: one lane-dense K-packed MXU dot per row chunk, bias + ReLU --------
        for c in range(n_chunks):
            r0 = c * RC
            lhs = xcol_ref[b, c * MC:(c + 1) * MC, :]      # (MC, K1) bf16
            f1 = jnp.dot(lhs, w1_ref[...], preferred_element_type=jnp.float32)
            f1 = jnp.maximum(f1 + b1_ref[...], 0.0)        # (MC, C1) f32
            # Aligned store (column offset COL0 = 8, width W = 16 -> full f32 tiles).
            f1_ref[1 + r0:1 + r0 + RC, _COL0:_COL0 + W, :] = f1.reshape(RC, W, C1)

        # -------- layer 2 + fused global average pool ----------------------------------------
        pooled = jnp.zeros((1, C2), jnp.float32)
        for c in range(n_chunks):
            r0 = c * RC
            acc = jnp.zeros((MC, C2), jnp.float32)         # 16 vregs, stays resident
            for dj in range(3):                            # one sublane-shift slice per dj
                blk = f1_ref[r0:r0 + RC + 2,
                             _COL0 - 1 + dj:_COL0 - 1 + dj + W, :].astype(jnp.bfloat16)
                # taps di=0 and di=1 paired along K (K = 2*C1 = 256), di=2 alone (K = C1).
                a01 = jnp.concatenate(
                    [blk[0:RC].reshape(MC, C1), blk[1:RC + 1].reshape(MC, C1)], axis=-1)
                acc = acc + jnp.dot(a01, w2p_ref[dj],
                                    preferred_element_type=jnp.float32)
                acc = acc + jnp.dot(blk[2:RC + 2].reshape(MC, C1), w2l_ref[dj],
                                    preferred_element_type=jnp.float32)
            f2 = jnp.maximum(acc + b2_ref[...], 0.0)       # bias + ReLU (f32)
            pooled = pooled + jnp.sum(f2, axis=0, keepdims=True)
        out_ref[b] = pooled * inv_hw                       # AdaptiveAvgPool2d((1,1)) + squeeze


def fused_backbone_pooled(x_col, w1p, b1, w2p, w2l, b2, *, H, W):
    """x_col: (B, H*W, K1) bf16 layer-1 im2col  ->  (B, C2) f32 pooled features."""
    B, HW, K1 = x_col.shape
    C1 = w1p.shape[-1]
    C2 = w2l.shape[-1]
    assert HW == H * W

    BB = 2 if B % 2 == 0 else 1                 # images per grid step (keep grid >= 2)
    RC = max(1, min(H, 128 // W))               # spatial rows per M-chunk (MC = RC*W ~ 128)
    while H % RC:
        RC -= 1
    w_scr = max(32, ((_COL0 + W + 1 + 7) // 8) * 8)   # padded scratch width (>= COL0 + W + 1)

    kern = functools.partial(_fused_backbone_kernel,
                             BB=BB, H=H, W=W, C1=C1, C2=C2, RC=RC)
    out = pl.pallas_call(
        kern,
        out_shape=jax.ShapeDtypeStruct((B, 1, C2), jnp.float32),
        grid=(B // BB,),
        in_specs=[
            pl.BlockSpec((BB, HW, K1), lambda i: (i, 0, 0)),
            pl.BlockSpec((K1, C1), lambda i: (0, 0)),
            pl.BlockSpec((1, C1), lambda i: (0, 0)),
            pl.BlockSpec((3, 2 * C1, C2), lambda i: (0, 0, 0)),
            pl.BlockSpec((3, C1, C2), lambda i: (0, 0, 0)),
            pl.BlockSpec((1, C2), lambda i: (0, 0)),
        ],
        out_specs=pl.BlockSpec((BB, 1, C2), lambda i: (i, 0, 0)),
        scratch_shapes=[pltpu.VMEM((H + 2, w_scr, C1), jnp.float32)],
        compiler_params=pltpu.CompilerParams(
            dimension_semantics=("parallel",),
            vmem_limit_bytes=_VMEM_LIMIT),
    )(x_col, w1p, b1, w2p, w2l, b2)
    return out[:, 0, :]                         # (B, C2)


# ---------------------------------------------------------------------------
# Host-side helpers (tiny XLA ops on the 3-channel input / packed weights)
# ---------------------------------------------------------------------------

def _im2col_3x3(x):
    """(B, H, W, C) f32 -> (B, H*W, K1) bf16, columns ordered tap-major (t=3*di+dj, then c).

    Done in XLA on purpose: the layer-1 input has only 3 channels at 16x16, so the whole
    im2col is ~256 KiB; this buys one lane-dense K=128 MXU dot instead of nine K=3 dots.
    The 128-channel layer-2 path never touches HBM (fused in the kernel).
    """
    B, H, W, C = x.shape
    assert 9 * C <= _K1
    xp = jnp.pad(x, ((0, 0), (1, 1), (1, 1), (0, 0)))
    cols = [xp[:, di:di + H, dj:dj + W, :] for di in range(3) for dj in range(3)]
    xc = jnp.concatenate(cols, axis=-1).reshape(B, H * W, 9 * C)
    xc = jnp.pad(xc, ((0, 0), (0, 0), (0, _K1 - 9 * C)))
    return xc.astype(jnp.bfloat16)


def make_backbone_params(key, c_in=3, c_mid=128, c_out=128):
    """Synthetic 'Places365' weights, pre-packed for the fused kernel (all lane-dense 128)."""
    k1, k2, k3, k4 = jax.random.split(key, 4)
    w1 = jax.random.normal(k1, (9, c_in, c_mid), jnp.float32) * 0.1
    w1p = jnp.zeros((_K1, c_mid), jnp.float32)
    w1p = w1p.at[:9 * c_in].set(w1.reshape(9 * c_in, c_mid)).astype(jnp.bfloat16)
    b1 = jax.random.normal(k2, (1, c_mid), jnp.float32) * 0.01
    w2 = (jax.random.normal(k3, (9, c_mid, c_out), jnp.float32) * 0.05).astype(jnp.bfloat16)
    # Per dj: taps di=0 and di=1 stacked along K (K=256 dots), tap di=2 kept separate (K=128).
    w2p = jnp.stack([jnp.concatenate([w2[3 * 0 + dj], w2[3 * 1 + dj]], axis=0)
                     for dj in range(3)])                    # (3, 2*c_mid, c_out)
    w2l = jnp.stack([w2[3 * 2 + dj] for dj in range(3)])     # (3, c_mid, c_out)
    b2 = jax.random.normal(k4, (1, c_out), jnp.float32) * 0.01
    return (w1p, b1, w2p, w2l, b2)


# ---------------------------------------------------------------------------
# Perceptual loss
# ---------------------------------------------------------------------------

def backbone_pooled_features(im_nchw, params):
    w1p, b1, w2p, w2l, b2 = params
    x = jnp.transpose(im_nchw, (0, 2, 3, 1)).astype(jnp.float32)   # NCHW -> NHWC
    _, H, W, _ = x.shape
    x_col = _im2col_3x3(x)
    return fused_backbone_pooled(x_col, w1p, b1, w2p, w2l, b2, H=H, W=W)


def perceptual_loss(gt_im, gen_im, params):
    n = gt_im.shape[0]
    both = jnp.concatenate([gt_im, gen_im], axis=0)    # one backbone pass over 2N images
    feats = backbone_pooled_features(both, params)     # (2N, C2)
    d = feats[:n] - feats[n:]
    # Final MSE over an (N, 128) array in plain jnp: a dedicated pallas_call is pure overhead.
    return jnp.mean(d * d)


# ---------------------------------------------------------------------------
# Pure-JAX reference (independent path: XLA conv with identical bf16 weights, f32 accumulate)
# ---------------------------------------------------------------------------

def _ref_perceptual_loss(gt_im, gen_im, params):
    w1p, b1, w2p, w2l, b2 = params
    c_in = gt_im.shape[1]
    c_mid = b1.shape[-1]
    c_out = b2.shape[-1]
    # Unpack weights into HWIO conv form (same bf16 values the kernel consumes).
    w1_hwio = w1p[:9 * c_in].reshape(3, 3, c_in, c_mid)
    taps = []
    for di in range(3):
        for dj in range(3):
            if di == 0:
                taps.append(w2p[dj, :c_mid])
            elif di == 1:
                taps.append(w2p[dj, c_mid:])
            else:
                taps.append(w2l[dj])
    w2_hwio = jnp.stack(taps).reshape(3, 3, c_mid, c_out)

    both = jnp.concatenate([gt_im, gen_im], axis=0)
    x = jnp.transpose(both, (0, 2, 3, 1)).astype(jnp.float32)
    dn = ("NHWC", "HWIO", "NHWC")
    f1 = lax.conv_general_dilated(x.astype(jnp.bfloat16), w1_hwio, (1, 1), "SAME",
                                  dimension_numbers=dn,
                                  preferred_element_type=jnp.float32)
    f1 = jnp.maximum(f1 + b1.reshape(1, 1, 1, c_mid), 0.0)
    f2 = lax.conv_general_dilated(f1.astype(jnp.bfloat16), w2_hwio, (1, 1), "SAME",
                                  dimension_numbers=dn,
                                  preferred_element_type=jnp.float32)
    f2 = jnp.maximum(f2 + b2.reshape(1, 1, 1, c_out), 0.0)
    pooled = f2.mean(axis=(1, 2))                      # AdaptiveAvgPool2d((1,1)) + squeeze
    n = gt_im.shape[0]
    d = pooled[:n] - pooled[n:]
    return jnp.mean(d * d)


# ---------------------------------------------------------------------------
# Main
# ---------------------------------------------------------------------------

if __name__ == "__main__":
    key = jax.random.PRNGKey(0)
    k_gt, k_gen, k_params = jax.random.split(key, 3)

    # Small NCHW image inputs, like PyTorch: batch=2, channels=3, spatial=16.
    gt_im = jax.random.normal(k_gt, (2, 3, 16, 16), jnp.float32)
    gen_im = jax.random.normal(k_gen, (2, 3, 16, 16), jnp.float32)

    params = make_backbone_params(k_params)

    loss = jax.jit(perceptual_loss)(gt_im, gen_im, params)
    loss = jax.block_until_ready(loss)

    ref = _ref_perceptual_loss(gt_im, gen_im, params)
    assert jnp.allclose(loss, ref, rtol=2e-3, atol=1e-5), (loss, ref)

    print("KERNEL_OK")
</pallas_src>

<mosaic_0001>
module attributes {stable_mosaic.version = 11 : i64} {
  func.func @_fused_backbone_kernel(%arg0: i32, %arg1: memref<2x256x128xbf16, #tpu.memory_space<vmem>>, %arg2: memref<128x128xbf16, #tpu.memory_space<vmem>>, %arg3: memref<1x128xf32, #tpu.memory_space<vmem>>, %arg4: memref<3x256x128xbf16, #tpu.memory_space<vmem>>, %arg5: memref<3x128x128xbf16, #tpu.memory_space<vmem>>, %arg6: memref<1x128xf32, #tpu.memory_space<vmem>>, %arg7: memref<2x1x128xf32, #tpu.memory_space<vmem>>, %arg8: memref<18x32x128xf32, #tpu.memory_space<vmem>>) attributes {dimension_semantics = [#tpu.dimension_semantics<parallel>], iteration_bounds = array<i64: 2>, scalar_prefetch = 0 : i64, scratch_operands = 1 : i64, tpu.core_type = #tpu.core_type<tc>, window_params = [{transform_indices = @transform_0, window_bounds = array<i64: 2, 256, 128>}, {pipeline_mode = #tpu.pipeline_mode<synchronous>, transform_indices = @transform_1, window_bounds = array<i64: 128, 128>}, {pipeline_mode = #tpu.pipeline_mode<synchronous>, transform_indices = @transform_2, window_bounds = array<i64: 1, 128>}, {pipeline_mode = #tpu.pipeline_mode<synchronous>, transform_indices = @transform_3, window_bounds = array<i64: 3, 256, 128>}, {pipeline_mode = #tpu.pipeline_mode<synchronous>, transform_indices = @transform_4, window_bounds = array<i64: 3, 128, 128>}, {pipeline_mode = #tpu.pipeline_mode<synchronous>, transform_indices = @transform_5, window_bounds = array<i64: 1, 128>}, {transform_indices = @transform_6, window_bounds = array<i64: 2, 1, 128>}]} {
    %cst = arith.constant 0.000000e+00 : f32
    %0 = vector.broadcast %cst : f32 to vector<18x32x128xf32>
    %c0 = arith.constant 0 : index
    %c0_0 = arith.constant 0 : index
    %c0_1 = arith.constant 0 : index
    %1 = vector.load %arg8[%c0, %c0_0, %c0_1] : memref<18x32x128xf32, #tpu.memory_space<vmem>>, vector<18x32x128xf32>
    tpu.vector_store %arg8[%c0, %c0_0, %c0_1], %0 {strides = array<i32>} : memref<18x32x128xf32, #tpu.memory_space<vmem>>, vector<18x32x128xf32>,
    %c0_2 = arith.constant 0 : index
    %c0_3 = arith.constant 0 : index
    %c0_4 = arith.constant 0 : index
    %2 = vector.load %arg1[%c0_2, %c0_3, %c0_4] : memref<2x256x128xbf16, #tpu.memory_space<vmem>>, vector<1x128x128xbf16>
    %3 = vector.shape_cast %2 : vector<1x128x128xbf16> to vector<128x128xbf16>
    %c0_5 = arith.constant 0 : index
    %c0_6 = arith.constant 0 : index
    %4 = vector.load %arg2[%c0_5, %c0_6] : memref<128x128xbf16, #tpu.memory_space<vmem>>, vector<128x128xbf16>
    %cst_7 = arith.constant dense<0.000000e+00> : vector<128x128xf32>
    %5 = tpu.matmul %3, %4, %cst_7 {dimension_numbers = #tpu.dot_dimension_numbers<[1], [0], [0], [1], [0, 0, 1, 1], [], []>} : vector<128x128xbf16>, vector<128x128xbf16>, vector<128x128xf32> -> vector<128x128xf32>
    %c0_8 = arith.constant 0 : index
    %c0_9 = arith.constant 0 : index
    %6 = vector.load %arg3[%c0_8, %c0_9] : memref<1x128xf32, #tpu.memory_space<vmem>>, vector<1x128xf32>
    %7 = vector.broadcast %6 : vector<1x128xf32> to vector<128x128xf32>
    %8 = arith.addf %5, %7 : vector<128x128xf32>
    %cst_10 = arith.constant 0.000000e+00 : f32
    %9 = vector.broadcast %cst_10 : f32 to vector<128x128xf32>
    %10 = arith.maximumf %8, %9 : vector<128x128xf32>
    %11 = vector.shape_cast %10 : vector<128x128xf32> to vector<8x16x128xf32>
    %c1 = arith.constant 1 : index
    %c8 = arith.constant 8 : index
    %c0_11 = arith.constant 0 : index
    %12 = vector.load %arg8[%c1, %c8, %c0_11] : memref<18x32x128xf32, #tpu.memory_space<vmem>>, vector<8x16x128xf32>
    tpu.vector_store %arg8[%c1, %c8, %c0_11], %11 {strides = array<i32>} : memref<18x32x128xf32, #tpu.memory_space<vmem>>, vector<8x16x128xf32>,
    %c0_12 = arith.constant 0 : index
    %c128 = arith.constant 128 : index
    %c0_13 = arith.constant 0 : index
    %13 = vector.load %arg1[%c0_12, %c128, %c0_13] : memref<2x256x128xbf16, #tpu.memory_space<vmem>>, vector<1x128x128xbf16>
    %14 = vector.shape_cast %13 : vector<1x128x128xbf16> to vector<128x128xbf16>
    %c0_14 = arith.constant 0 : index
    %c0_15 = arith.constant 0 : index
    %15 = vector.load %arg2[%c0_14, %c0_15] : memref<128x128xbf16, #tpu.memory_space<vmem>>, vector<128x128xbf16>
    %cst_16 = arith.constant dense<0.000000e+00> : vector<128x128xf32>
    %16 = tpu.matmul %14, %15, %cst_16 {dimension_numbers = #tpu.dot_dimension_numbers<[1], [0], [0], [1], [0, 0, 1, 1], [], []>} : vector<128x128xbf16>, vector<128x128xbf16>, vector<128x128xf32> -> vector<128x128xf32>
    %c0_17 = arith.constant 0 : index
    %c0_18 = arith.constant 0 : index
    %17 = vector.load %arg3[%c0_17, %c0_18] : memref<1x128xf32, #tpu.memory_space<vmem>>, vector<1x128xf32>
    %18 = vector.broadcast %17 : vector<1x128xf32> to vector<128x128xf32>
    %19 = arith.addf %16, %18 : vector<128x128xf32>
    %cst_19 = arith.constant 0.000000e+00 : f32
    %20 = vector.broadcast %cst_19 : f32 to vector<128x128xf32>
    %21 = arith.maximumf %19, %20 : vector<128x128xf32>
    %22 = vector.shape_cast %21 : vector<128x128xf32> to vector<8x16x128xf32>
    %c9 = arith.constant 9 : index
    %c8_20 = arith.constant 8 : index
    %c0_21 = arith.constant 0 : index
    %23 = vector.load %arg8[%c9, %c8_20, %c0_21] : memref<18x32x128xf32, #tpu.memory_space<vmem>>, vector<8x16x128xf32>
    tpu.vector_store %arg8[%c9, %c8_20, %c0_21], %22 {strides = array<i32>} : memref<18x32x128xf32, #tpu.memory_space<vmem>>, vector<8x16x128xf32>,
    %cst_22 = arith.constant 0.000000e+00 : f32
    %24 = vector.broadcast %cst_22 : f32 to vector<1x128xf32>
    %cst_23 = arith.constant 0.000000e+00 : f32
    %25 = vector.broadcast %cst_23 : f32 to vector<128x128xf32>
    %c0_24 = arith.constant 0 : index
    %c7 = arith.constant 7 : index
    %c0_25 = arith.constant 0 : index
    %26 = vector.load %arg8[%c0_24, %c7, %c0_25] : memref<18x32x128xf32, #tpu.memory_space<vmem>>, vector<10x16x128xf32>
    %27 = arith.truncf %26 : vector<10x16x128xf32> to vector<10x16x128xbf16>
    %28 = vector.extract_strided_slice %27 {offsets = [0, 0, 0], sizes = [8, 16, 128], strides = [1, 1, 1]} : vector<10x16x128xbf16> to vector<8x16x128xbf16>
    %29 = vector.shape_cast %28 : vector<8x16x128xbf16> to vector<128x128xbf16>
    %30 = vector.extract_strided_slice %27 {offsets = [1, 0, 0], sizes = [8, 16, 128], strides = [1, 1, 1]} : vector<10x16x128xbf16> to vector<8x16x128xbf16>
    %31 = vector.shape_cast %30 : vector<8x16x128xbf16> to vector<128x128xbf16>
    %32 = tpu.concatenate %29, %31 in 1 : vector<128x128xbf16>, vector<128x128xbf16> -> vector<128x256xbf16>
    %c0_26 = arith.constant 0 : index
    %c0_27 = arith.constant 0 : index
    %c0_28 = arith.constant 0 : index
    %33 = vector.load %arg4[%c0_26, %c0_27, %c0_28] : memref<3x256x128xbf16, #tpu.memory_space<vmem>>, vector<1x256x128xbf16>
    %34 = vector.shape_cast %33 : vector<1x256x128xbf16> to vector<256x128xbf16>
    %cst_29 = arith.constant dense<0.000000e+00> : vector<128x128xf32>
    %35 = tpu.matmul %32, %34, %cst_29 {dimension_numbers = #tpu.dot_dimension_numbers<[1], [0], [0], [1], [0, 0, 1, 1], [], []>} : vector<128x256xbf16>, vector<256x128xbf16>, vector<128x128xf32> -> vector<128x128xf32>
    %36 = arith.addf %25, %35 : vector<128x128xf32>
    %37 = vector.extract_strided_slice %27 {offsets = [2, 0, 0], sizes = [8, 16, 128], strides = [1, 1, 1]} : vector<10x16x128xbf16> to vector<8x16x128xbf16>
    %38 = vector.shape_cast %37 : vector<8x16x128xbf16> to vector<128x128xbf16>
    %c0_30 = arith.constant 0 : index
    %c0_31 = arith.constant 0 : index
    %c0_32 = arith.constant 0 : index
    %39 = vector.load %arg5[%c0_30, %c0_31, %c0_32] : memref<3x128x128xbf16, #tpu.memory_space<vmem>>, vector<1x128x128xbf16>
    %40 = vector.shape_cast %39 : vector<1x128x128xbf16> to vector<128x128xbf16>
    %cst_33 = arith.constant dense<0.000000e+00> : vector<128x128xf32>
    %41 = tpu.matmul %38, %40, %cst_33 {dimension_numbers = #tpu.dot_dimension_numbers<[1], [0], [0], [1], [0, 0, 1, 1], [], []>} : vector<128x128xbf16>, vector<128x128xbf16>, vector<128x128xf32> -> vector<128x128xf32>
    %42 = arith.addf %36, %41 : vector<128x128xf32>
    %c0_34 = arith.constant 0 : index
    %c8_35 = arith.constant 8 : index
    %c0_36 = arith.constant 0 : index
    %43 = vector.load %arg8[%c0_34, %c8_35, %c0_36] : memref<18x32x128xf32, #tpu.memory_space<vmem>>, vector<10x16x128xf32>
    %44 = arith.truncf %43 : vector<10x16x128xf32> to vector<10x16x128xbf16>
    %45 = vector.extract_strided_slice %44 {offsets = [0, 0, 0], sizes = [8, 16, 128], strides = [1, 1, 1]} : vector<10x16x128xbf16> to vector<8x16x128xbf16>
    %46 = vector.shape_cast %45 : vector<8x16x128xbf16> to vector<128x128xbf16>
    %47 = vector.extract_strided_slice %44 {offsets = [1, 0, 0], sizes = [8, 16, 128], strides = [1, 1, 1]} : vector<10x16x128xbf16> to vector<8x16x128xbf16>
    %48 = vector.shape_cast %47 : vector<8x16x128xbf16> to vector<128x128xbf16>
    %49 = tpu.concatenate %46, %48 in 1 : vector<128x128xbf16>, vector<128x128xbf16> -> vector<128x256xbf16>
    %c1_37 = arith.constant 1 : index
    %c0_38 = arith.constant 0 : index
    %c0_39 = arith.constant 0 : index
    %50 = vector.load %arg4[%c1_37, %c0_38, %c0_39] : memref<3x256x128xbf16, #tpu.memory_space<vmem>>, vector<1x256x128xbf16>
    %51 = vector.shape_cast %50 : vector<1x256x128xbf16> to vector<256x128xbf16>
    %cst_40 = arith.constant dense<0.000000e+00> : vector<128x128xf32>
    %52 = tpu.matmul %49, %51, %cst_40 {dimension_numbers = #tpu.dot_dimension_numbers<[1], [0], [0], [1], [0, 0, 1, 1], [], []>} : vector<128x256xbf16>, vector<256x128xbf16>, vector<128x128xf32> -> vector<128x128xf32>
    %53 = arith.addf %42, %52 : vector<128x128xf32>
    %54 = vector.extract_strided_slice %44 {offsets = [2, 0, 0], sizes = [8, 16, 128], strides = [1, 1, 1]} : vector<10x16x128xbf16> to vector<8x16x128xbf16>
    %55 = vector.shape_cast %54 : vector<8x16x128xbf16> to vector<128x128xbf16>
    %c1_41 = arith.constant 1 : index
    %c0_42 = arith.constant 0 : index
    %c0_43 = arith.constant 0 : index
    %56 = vector.load %arg5[%c1_41, %c0_42, %c0_43] : memref<3x128x128xbf16, #tpu.memory_space<vmem>>, vector<1x128x128xbf16>
    %57 = vector.shape_cast %56 : vector<1x128x128xbf16> to vector<128x128xbf16>
    %cst_44 = arith.constant dense<0.000000e+00> : vector<128x128xf32>
    %58 = tpu.matmul %55, %57, %cst_44 {dimension_numbers = #tpu.dot_dimension_numbers<[1], [0], [0], [1], [0, 0, 1, 1], [], []>} : vector<128x128xbf16>, vector<128x128xbf16>, vector<128x128xf32> -> vector<128x128xf32>
    %59 = arith.addf %53, %58 : vector<128x128xf32>
    %c0_45 = arith.constant 0 : index
    %c9_46 = arith.constant 9 : index
    %c0_47 = arith.constant 0 : index
    %60 = vector.load %arg8[%c0_45, %c9_46, %c0_47] : memref<18x32x128xf32, #tpu.memory_space<vmem>>, vector<10x16x128xf32>
    %61 = arith.truncf %60 : vector<10x16x128xf32> to vector<10x16x128xbf16>
    %62 = vector.extract_strided_slice %61 {offsets = [0, 0, 0], sizes = [8, 16, 128], strides = [1, 1, 1]} : vector<10x16x128xbf16> to vector<8x16x128xbf16>
    %63 = vector.shape_cast %62 : vector<8x16x128xbf16> to vector<128x128xbf16>
    %64 = vector.extract_strided_slice %61 {offsets = [1, 0, 0], sizes = [8, 16, 128], strides = [1, 1, 1]} : vector<10x16x128xbf16> to vector<8x16x128xbf16>
    %65 = vector.shape_cast %64 : vector<8x16x128xbf16> to vector<128x128xbf16>
    %66 = tpu.concatenate %63, %65 in 1 : vector<128x128xbf16>, vector<128x128xbf16> -> vector<128x256xbf16>
    %c2 = arith.constant 2 : index
    %c0_48 = arith.constant 0 : index
    %c0_49 = arith.constant 0 : index
    %67 = vector.load %arg4[%c2, %c0_48, %c0_49] : memref<3x256x128xbf16, #tpu.memory_space<vmem>>, vector<1x256x128xbf16>
    %68 = vector.shape_cast %67 : vector<1x256x128xbf16> to vector<256x128xbf16>
    %cst_50 = arith.constant dense<0.000000e+00> : vector<128x128xf32>
    %69 = tpu.matmul %66, %68, %cst_50 {dimension_numbers = #tpu.dot_dimension_numbers<[1], [0], [0], [1], [0, 0, 1, 1], [], []>} : vector<128x256xbf16>, vector<256x128xbf16>, vector<128x128xf32> -> vector<128x128xf32>
    %70 = arith.addf %59, %69 : vector<128x128xf32>
    %71 = vector.extract_strided_slice %61 {offsets = [2, 0, 0], sizes = [8, 16, 128], strides = [1, 1, 1]} : vector<10x16x128xbf16> to vector<8x16x128xbf16>
    %72 = vector.shape_cast %71 : vector<8x16x128xbf16> to vector<128x128xbf16>
    %c2_51 = arith.constant 2 : index
    %c0_52 = arith.constant 0 : index
    %c0_53 = arith.constant 0 : index
    %73 = vector.load %arg5[%c2_51, %c0_52, %c0_53] : memref<3x128x128xbf16, #tpu.memory_space<vmem>>, vector<1x128x128xbf16>
    %74 = vector.shape_cast %73 : vector<1x128x128xbf16> to vector<128x128xbf16>
    %cst_54 = arith.constant dense<0.000000e+00> : vector<128x128xf32>
    %75 = tpu.matmul %72, %74, %cst_54 {dimension_numbers = #tpu.dot_dimension_numbers<[1], [0], [0], [1], [0, 0, 1, 1], [], []>} : vector<128x128xbf16>, vector<128x128xbf16>, vector<128x128xf32> -> vector<128x128xf32>
    %76 = arith.addf %70, %75 : vector<128x128xf32>
    %c0_55 = arith.constant 0 : index
    %c0_56 = arith.constant 0 : index
    %77 = vector.load %arg6[%c0_55, %c0_56] : memref<1x128xf32, #tpu.memory_space<vmem>>, vector<1x128xf32>
    %78 = vector.broadcast %77 : vector<1x128xf32> to vector<128x128xf32>
    %79 = arith.addf %76, %78 : vector<128x128xf32>
    %cst_57 = arith.constant 0.000000e+00 : f32
    %80 = vector.broadcast %cst_57 : f32 to vector<128x128xf32>
    %81 = arith.maximumf %79, %80 : vector<128x128xf32>
    %cst_58 = arith.constant dense<0.000000e+00> : vector<128xf32>
    %82 = vector.multi_reduction <add>, %81, %cst_58 [0] : vector<128x128xf32> to vector<128xf32>
    %83 = vector.shape_cast %82 : vector<128xf32> to vector<1x128xf32>
    %84 = arith.addf %24, %83 : vector<1x128xf32>
    %cst_59 = arith.constant 0.000000e+00 : f32
    %85 = vector.broadcast %cst_59 : f32 to vector<128x128xf32>
    %c8_60 = arith.constant 8 : index
    %c7_61 = arith.constant 7 : index
    %c0_62 = arith.constant 0 : index
    %86 = vector.load %arg8[%c8_60, %c7_61, %c0_62] : memref<18x32x128xf32, #tpu.memory_space<vmem>>, vector<10x16x128xf32>
    %87 = arith.truncf %86 : vector<10x16x128xf32> to vector<10x16x128xbf16>
    %88 = vector.extract_strided_slice %87 {offsets = [0, 0, 0], sizes = [8, 16, 128], strides = [1, 1, 1]} : vector<10x16x128xbf16> to vector<8x16x128xbf16>
    %89 = vector.shape_cast %88 : vector<8x16x128xbf16> to vector<128x128xbf16>
    %90 = vector.extract_strided_slice %87 {offsets = [1, 0, 0], sizes = [8, 16, 128], strides = [1, 1, 1]} : vector<10x16x128xbf16> to vector<8x16x128xbf16>
    %91 = vector.shape_cast %90 : vector<8x16x128xbf16> to vector<128x128xbf16>
    %92 = tpu.concatenate %89, %91 in 1 : vector<128x128xbf16>, vector<128x128xbf16> -> vector<128x256xbf16>
    %c0_63 = arith.constant 0 : index
    %c0_64 = arith.constant 0 : index
    %c0_65 = arith.constant 0 : index
    %93 = vector.load %arg4[%c0_63, %c0_64, %c0_65] : memref<3x256x128xbf16, #tpu.memory_space<vmem>>, vector<1x256x128xbf16>
    %94 = vector.shape_cast %93 : vector<1x256x128xbf16> to vector<256x128xbf16>
    %cst_66 = arith.constant dense<0.000000e+00> : vector<128x128xf32>
    %95 = tpu.matmul %92, %94, %cst_66 {dimension_numbers = #tpu.dot_dimension_numbers<[1], [0], [0], [1], [0, 0, 1, 1], [], []>} : vector<128x256xbf16>, vector<256x128xbf16>, vector<128x128xf32> -> vector<128x128xf32>
    %96 = arith.addf %85, %95 : vector<128x128xf32>
    %97 = vector.extract_strided_slice %87 {offsets = [2, 0, 0], sizes = [8, 16, 128], strides = [1, 1, 1]} : vector<10x16x128xbf16> to vector<8x16x128xbf16>
    %98 = vector.shape_cast %97 : vector<8x16x128xbf16> to vector<128x128xbf16>
    %c0_67 = arith.constant 0 : index
    %c0_68 = arith.constant 0 : index
    %c0_69 = arith.constant 0 : index
    %99 = vector.load %arg5[%c0_67, %c0_68, %c0_69] : memref<3x128x128xbf16, #tpu.memory_space<vmem>>, vector<1x128x128xbf16>
    %100 = vector.shape_cast %99 : vector<1x128x128xbf16> to vector<128x128xbf16>
    %cst_70 = arith.constant dense<0.000000e+00> : vector<128x128xf32>
    %101 = tpu.matmul %98, %100, %cst_70 {dimension_numbers = #tpu.dot_dimension_numbers<[1], [0], [0], [1], [0, 0, 1, 1], [], []>} : vector<128x128xbf16>, vector<128x128xbf16>, vector<128x128xf32> -> vector<128x128xf32>
    %102 = arith.addf %96, %101 : vector<128x128xf32>
    %c8_71 = arith.constant 8 : index
    %c8_72 = arith.constant 8 : index
    %c0_73 = arith.constant 0 : index
    %103 = vector.load %arg8[%c8_71, %c8_72, %c0_73] : memref<18x32x128xf32, #tpu.memory_space<vmem>>, vector<10x16x128xf32>
    %104 = arith.truncf %103 : vector<10x16x128xf32> to vector<10x16x128xbf16>
    %105 = vector.extract_strided_slice %104 {offsets = [0, 0, 0], sizes = [8, 16, 128], strides = [1, 1, 1]} : vector<10x16x128xbf16> to vector<8x16x128xbf16>
    %106 = vector.shape_cast %105 : vector<8x16x128xbf16> to vector<128x128xbf16>
    %107 = vector.extract_strided_slice %104 {offsets = [1, 0, 0], sizes = [8, 16, 128], strides = [1, 1, 1]} : vector<10x16x128xbf16> to vector<8x16x128xbf16>
    %108 = vector.shape_cast %107 : vector<8x16x128xbf16> to vector<128x128xbf16>
    %109 = tpu.concatenate %106, %108 in 1 : vector<128x128xbf16>, vector<128x128xbf16> -> vector<128x256xbf16>
    %c1_74 = arith.constant 1 : index
    %c0_75 = arith.constant 0 : index
    %c0_76 = arith.constant 0 : index
    %110 = vector.load %arg4[%c1_74, %c0_75, %c0_76] : memref<3x256x128xbf16, #tpu.memory_space<vmem>>, vector<1x256x128xbf16>
    %111 = vector.shape_cast %110 : vector<1x256x128xbf16> to vector<256x128xbf16>
    %cst_77 = arith.constant dense<0.000000e+00> : vector<128x128xf32>
    %112 = tpu.matmul %109, %111, %cst_77 {dimension_numbers = #tpu.dot_dimension_numbers<[1], [0], [0], [1], [0, 0, 1, 1], [], []>} : vector<128x256xbf16>, vector<256x128xbf16>, vector<128x128xf32> -> vector<128x128xf32>
    %113 = arith.addf %102, %112 : vector<128x128xf32>
    %114 = vector.extract_strided_slice %104 {offsets = [2, 0, 0], sizes = [8, 16, 128], strides = [1, 1, 1]} : vector<10x16x128xbf16> to vector<8x16x128xbf16>
    %115 = vector.shape_cast %114 : vector<8x16x128xbf16> to vector<128x128xbf16>
    %c1_78 = arith.constant 1 : index
    %c0_79 = arith.constant 0 : index
    %c0_80 = arith.constant 0 : index
    %116 = vector.load %arg5[%c1_78, %c0_79, %c0_80] : memref<3x128x128xbf16, #tpu.memory_space<vmem>>, vector<1x128x128xbf16>
    %117 = vector.shape_cast %116 : vector<1x128x128xbf16> to vector<128x128xbf16>
    %cst_81 = arith.constant dense<0.000000e+00> : vector<128x128xf32>
    %118 = tpu.matmul %115, %117, %cst_81 {dimension_numbers = #tpu.dot_dimension_numbers<[1], [0], [0], [1], [0, 0, 1, 1], [], []>} : vector<128x128xbf16>, vector<128x128xbf16>, vector<128x128xf32> -> vector<128x128xf32>
    %119 = arith.addf %113, %118 : vector<128x128xf32>
    %c8_82 = arith.constant 8 : index
    %c9_83 = arith.constant 9 : index
    %c0_84 = arith.constant 0 : index
    %120 = vector.load %arg8[%c8_82, %c9_83, %c0_84] : memref<18x32x128xf32, #tpu.memory_space<vmem>>, vector<10x16x128xf32>
    %121 = arith.truncf %120 : vector<10x16x128xf32> to vector<10x16x128xbf16>
    %122 = vector.extract_strided_slice %121 {offsets = [0, 0, 0], sizes = [8, 16, 128], strides = [1, 1, 1]} : vector<10x16x128xbf16> to vector<8x16x128xbf16>
    %123 = vector.shape_cast %122 : vector<8x16x128xbf16> to vector<128x128xbf16>
    %124 = vector.extract_strided_slice %121 {offsets = [1, 0, 0], sizes = [8, 16, 128], strides = [1, 1, 1]} : vector<10x16x128xbf16> to vector<8x16x128xbf16>
    %125 = vector.shape_cast %124 : vector<8x16x128xbf16> to vector<128x128xbf16>
    %126 = tpu.concatenate %123, %125 in 1 : vector<128x128xbf16>, vector<128x128xbf16> -> vector<128x256xbf16>
    %c2_85 = arith.constant 2 : index
    %c0_86 = arith.constant 0 : index
    %c0_87 = arith.constant 0 : index
    %127 = vector.load %arg4[%c2_85, %c0_86, %c0_87] : memref<3x256x128xbf16, #tpu.memory_space<vmem>>, vector<1x256x128xbf16>
    %128 = vector.shape_cast %127 : vector<1x256x128xbf16> to vector<256x128xbf16>
    %cst_88 = arith.constant dense<0.000000e+00> : vector<128x128xf32>
    %129 = tpu.matmul %126, %128, %cst_88 {dimension_numbers = #tpu.dot_dimension_numbers<[1], [0], [0], [1], [0, 0, 1, 1], [], []>} : vector<128x256xbf16>, vector<256x128xbf16>, vector<128x128xf32> -> vector<128x128xf32>
    %130 = arith.addf %119, %129 : vector<128x128xf32>
    %131 = vector.extract_strided_slice %121 {offsets = [2, 0, 0], sizes = [8, 16, 128], strides = [1, 1, 1]} : vector<10x16x128xbf16> to vector<8x16x128xbf16>
    %132 = vector.shape_cast %131 : vector<8x16x128xbf16> to vector<128x128xbf16>
    %c2_89 = arith.constant 2 : index
    %c0_90 = arith.constant 0 : index
    %c0_91 = arith.constant 0 : index
    %133 = vector.load %arg5[%c2_89, %c0_90, %c0_91] : memref<3x128x128xbf16, #tpu.memory_space<vmem>>, vector<1x128x128xbf16>
    %134 = vector.shape_cast %133 : vector<1x128x128xbf16> to vector<128x128xbf16>
    %cst_92 = arith.constant dense<0.000000e+00> : vector<128x128xf32>
    %135 = tpu.matmul %132, %134, %cst_92 {dimension_numbers = #tpu.dot_dimension_numbers<[1], [0], [0], [1], [0, 0, 1, 1], [], []>} : vector<128x128xbf16>, vector<128x128xbf16>, vector<128x128xf32> -> vector<128x128xf32>
    %136 = arith.addf %130, %135 : vector<128x128xf32>
    %c0_93 = arith.constant 0 : index
    %c0_94 = arith.constant 0 : index
    %137 = vector.load %arg6[%c0_93, %c0_94] : memref<1x128xf32, #tpu.memory_space<vmem>>, vector<1x128xf32>
    %138 = vector.broadcast %137 : vector<1x128xf32> to vector<128x128xf32>
    %139 = arith.addf %136, %138 : vector<128x128xf32>
    %cst_95 = arith.constant 0.000000e+00 : f32
    %140 = vector.broadcast %cst_95 : f32 to vector<128x128xf32>
    %141 = arith.maximumf %139, %140 : vector<128x128xf32>
    %cst_96 = arith.constant dense<0.000000e+00> : vector<128xf32>
    %142 = vector.multi_reduction <add>, %141, %cst_96 [0] : vector<128x128xf32> to vector<128xf32>
    %143 = vector.shape_cast %142 : vector<128xf32> to vector<1x128xf32>
    %144 = arith.addf %84, %143 : vector<1x128xf32>
    %cst_97 = arith.constant 3.906250e-03 : f32
    %145 = vector.broadcast %cst_97 : f32 to vector<1x128xf32>
    %146 = arith.mulf %144, %145 : vector<1x128xf32>
    %c0_98 = arith.constant 0 : index
    %c0_99 = arith.constant 0 : index
    %c0_100 = arith.constant 0 : index
    %147 = vector.load %arg7[%c0_98, %c0_99, %c0_100] : memref<2x1x128xf32, #tpu.memory_space<vmem>>, vector<1x1x128xf32>
    %148 = vector.shape_cast %147 : vector<1x1x128xf32> to vector<1x128xf32>
    %149 = vector.shape_cast %146 : vector<1x128xf32> to vector<1x1x128xf32>
    tpu.vector_store %arg7[%c0_98, %c0_99, %c0_100], %149 {strides = array<i32>} : memref<2x1x128xf32, #tpu.memory_space<vmem>>, vector<1x1x128xf32>,
    %c1_101 = arith.constant 1 : index
    %c0_102 = arith.constant 0 : index
    %c0_103 = arith.constant 0 : index
    %150 = vector.load %arg1[%c1_101, %c0_102, %c0_103] : memref<2x256x128xbf16, #tpu.memory_space<vmem>>, vector<1x128x128xbf16>
    %151 = vector.shape_cast %150 : vector<1x128x128xbf16> to vector<128x128xbf16>
    %c0_104 = arith.constant 0 : index
    %c0_105 = arith.constant 0 : index
    %152 = vector.load %arg2[%c0_104, %c0_105] : memref<128x128xbf16, #tpu.memory_space<vmem>>, vector<128x128xbf16>
    %cst_106 = arith.constant dense<0.000000e+00> : vector<128x128xf32>
    %153 = tpu.matmul %151, %152, %cst_106 {dimension_numbers = #tpu.dot_dimension_numbers<[1], [0], [0], [1], [0, 0, 1, 1], [], []>} : vector<128x128xbf16>, vector<128x128xbf16>, vector<128x128xf32> -> vector<128x128xf32>
    %c0_107 = arith.constant 0 : index
    %c0_108 = arith.constant 0 : index
    %154 = vector.load %arg3[%c0_107, %c0_108] : memref<1x128xf32, #tpu.memory_space<vmem>>, vector<1x128xf32>
    %155 = vector.broadcast %154 : vector<1x128xf32> to vector<128x128xf32>
    %156 = arith.addf %153, %155 : vector<128x128xf32>
    %cst_109 = arith.constant 0.000000e+00 : f32
    %157 = vector.broadcast %cst_109 : f32 to vector<128x128xf32>
    %158 = arith.maximumf %156, %157 : vector<128x128xf32>
    %159 = vector.shape_cast %158 : vector<128x128xf32> to vector<8x16x128xf32>
    %c1_110 = arith.constant 1 : index
    %c8_111 = arith.constant 8 : index
    %c0_112 = arith.constant 0 : index
    %160 = vector.load %arg8[%c1_110, %c8_111, %c0_112] : memref<18x32x128xf32, #tpu.memory_space<vmem>>, vector<8x16x128xf32>
    tpu.vector_store %arg8[%c1_110, %c8_111, %c0_112], %159 {strides = array<i32>} : memref<18x32x128xf32, #tpu.memory_space<vmem>>, vector<8x16x128xf32>,
    %c1_113 = arith.constant 1 : index
    %c128_114 = arith.constant 128 : index
    %c0_115 = arith.constant 0 : index
    %161 = vector.load %arg1[%c1_113, %c128_114, %c0_115] : memref<2x256x128xbf16, #tpu.memory_space<vmem>>, vector<1x128x128xbf16>
    %162 = vector.shape_cast %161 : vector<1x128x128xbf16> to vector<128x128xbf16>
    %c0_116 = arith.constant 0 : index
    %c0_117 = arith.constant 0 : index
    %163 = vector.load %arg2[%c0_116, %c0_117] : memref<128x128xbf16, #tpu.memory_space<vmem>>, vector<128x128xbf16>
    %cst_118 = arith.constant dense<0.000000e+00> : vector<128x128xf32>
    %164 = tpu.matmul %162, %163, %cst_118 {dimension_numbers = #tpu.dot_dimension_numbers<[1], [0], [0], [1], [0, 0, 1, 1], [], []>} : vector<128x128xbf16>, vector<128x128xbf16>, vector<128x128xf32> -> vector<128x128xf32>
    %c0_119 = arith.constant 0 : index
    %c0_120 = arith.constant 0 : index
    %165 = vector.load %arg3[%c0_119, %c0_120] : memref<1x128xf32, #tpu.memory_space<vmem>>, vector<1x128xf32>
    %166 = vector.broadcast %165 : vector<1x128xf32> to vector<128x128xf32>
    %167 = arith.addf %164, %166 : vector<128x128xf32>
    %cst_121 = arith.constant 0.000000e+00 : f32
    %168 = vector.broadcast %cst_121 : f32 to vector<128x128xf32>
    %169 = arith.maximumf %167, %168 : vector<128x128xf32>
    %170 = vector.shape_cast %169 : vector<128x128xf32> to vector<8x16x128xf32>
    %c9_122 = arith.constant 9 : index
    %c8_123 = arith.constant 8 : index
    %c0_124 = arith.constant 0 : index
    %171 = vector.load %arg8[%c9_122, %c8_123, %c0_124] : memref<18x32x128xf32, #tpu.memory_space<vmem>>, vector<8x16x128xf32>
    tpu.vector_store %arg8[%c9_122, %c8_123, %c0_124], %170 {strides = array<i32>} : memref<18x32x128xf32, #tpu.memory_space<vmem>>, vector<8x16x128xf32>,
    %cst_125 = arith.constant 0.000000e+00 : f32
    %172 = vector.broadcast %cst_125 : f32 to vector<1x128xf32>
    %cst_126 = arith.constant 0.000000e+00 : f32
    %173 = vector.broadcast %cst_126 : f32 to vector<128x128xf32>
    %c0_127 = arith.constant 0 : index
    %c7_128 = arith.constant 7 : index
    %c0_129 = arith.constant 0 : index
    %174 = vector.load %arg8[%c0_127, %c7_128, %c0_129] : memref<18x32x128xf32, #tpu.memory_space<vmem>>, vector<10x16x128xf32>
    %175 = arith.truncf %174 : vector<10x16x128xf32> to vector<10x16x128xbf16>
    %176 = vector.extract_strided_slice %175 {offsets = [0, 0, 0], sizes = [8, 16, 128], strides = [1, 1, 1]} : vector<10x16x128xbf16> to vector<8x16x128xbf16>
    %177 = vector.shape_cast %176 : vector<8x16x128xbf16> to vector<128x128xbf16>
    %178 = vector.extract_strided_slice %175 {offsets = [1, 0, 0], sizes = [8, 16, 128], strides = [1, 1, 1]} : vector<10x16x128xbf16> to vector<8x16x128xbf16>
    %179 = vector.shape_cast %178 : vector<8x16x128xbf16> to vector<128x128xbf16>
    %180 = tpu.concatenate %177, %179 in 1 : vector<128x128xbf16>, vector<128x128xbf16> -> vector<128x256xbf16>
    %c0_130 = arith.constant 0 : index
    %c0_131 = arith.constant 0 : index
    %c0_132 = arith.constant 0 : index
    %181 = vector.load %arg4[%c0_130, %c0_131, %c0_132] : memref<3x256x128xbf16, #tpu.memory_space<vmem>>, vector<1x256x128xbf16>
    %182 = vector.shape_cast %181 : vector<1x256x128xbf16> to vector<256x128xbf16>
    %cst_133 = arith.constant dense<0.000000e+00> : vector<128x128xf32>
    %183 = tpu.matmul %180, %182, %cst_133 {dimension_numbers = #tpu.dot_dimension_numbers<[1], [0], [0], [1], [0, 0, 1, 1], [], []>} : vector<128x256xbf16>, vector<256x128xbf16>, vector<128x128xf32> -> vector<128x128xf32>
    %184 = arith.addf %173, %183 : vector<128x128xf32>
    %185 = vector.extract_strided_slice %175 {offsets = [2, 0, 0], sizes = [8, 16, 128], strides = [1, 1, 1]} : vector<10x16x128xbf16> to vector<8x16x128xbf16>
    %186 = vector.shape_cast %185 : vector<8x16x128xbf16> to vector<128x128xbf16>
    %c0_134 = arith.constant 0 : index
    %c0_135 = arith.constant 0 : index
    %c0_136 = arith.constant 0 : index
    %187 = vector.load %arg5[%c0_134, %c0_135, %c0_136] : memref<3x128x128xbf16, #tpu.memory_space<vmem>>, vector<1x128x128xbf16>
    %188 = vector.shape_cast %187 : vector<1x128x128xbf16> to vector<128x128xbf16>
    %cst_137 = arith.constant dense<0.000000e+00> : vector<128x128xf32>
    %189 = tpu.matmul %186, %188, %cst_137 {dimension_numbers = #tpu.dot_dimension_numbers<[1], [0], [0], [1], [0, 0, 1, 1], [], []>} : vector<128x128xbf16>, vector<128x128xbf16>, vector<128x128xf32> -> vector<128x128xf32>
    %190 = arith.addf %184, %189 : vector<128x128xf32>
    %c0_138 = arith.constant 0 : index
    %c8_139 = arith.constant 8 : index
    %c0_140 = arith.constant 0 : index
    %191 = vector.load %arg8[%c0_138, %c8_139, %c0_140] : memref<18x32x128xf32, #tpu.memory_space<vmem>>, vector<10x16x128xf32>
    %192 = arith.truncf %191 : vector<10x16x128xf32> to vector<10x16x128xbf16>
    %193 = vector.extract_strided_slice %192 {offsets = [0, 0, 0], sizes = [8, 16, 128], strides = [1, 1, 1]} : vector<10x16x128xbf16> to vector<8x16x128xbf16>
    %194 = vector.shape_cast %193 : vector<8x16x128xbf16> to vector<128x128xbf16>
    %195 = vector.extract_strided_slice %192 {offsets = [1, 0, 0], sizes = [8, 16, 128], strides = [1, 1, 1]} : vector<10x16x128xbf16> to vector<8x16x128xbf16>
    %196 = vector.shape_cast %195 : vector<8x16x128xbf16> to vector<128x128xbf16>
    %197 = tpu.concatenate %194, %196 in 1 : vector<128x128xbf16>, vector<128x128xbf16> -> vector<128x256xbf16>
    %c1_141 = arith.constant 1 : index
    %c0_142 = arith.constant 0 : index
    %c0_143 = arith.constant 0 : index
    %198 = vector.load %arg4[%c1_141, %c0_142, %c0_143] : memref<3x256x128xbf16, #tpu.memory_space<vmem>>, vector<1x256x128xbf16>
    %199 = vector.shape_cast %198 : vector<1x256x128xbf16> to vector<256x128xbf16>
    %cst_144 = arith.constant dense<0.000000e+00> : vector<128x128xf32>
    %200 = tpu.matmul %197, %199, %cst_144 {dimension_numbers = #tpu.dot_dimension_numbers<[1], [0], [0], [1], [0, 0, 1, 1], [], []>} : vector<128x256xbf16>, vector<256x128xbf16>, vector<128x128xf32> -> vector<128x128xf32>
    %201 = arith.addf %190, %200 : vector<128x128xf32>
    %202 = vector.extract_strided_slice %192 {offsets = [2, 0, 0], sizes = [8, 16, 128], strides = [1, 1, 1]} : vector<10x16x128xbf16> to vector<8x16x128xbf16>
    %203 = vector.shape_cast %202 : vector<8x16x128xbf16> to vector<128x128xbf16>
    %c1_145 = arith.constant 1 : index
    %c0_146 = arith.constant 0 : index
    %c0_147 = arith.constant 0 : index
    %204 = vector.load %arg5[%c1_145, %c0_146, %c0_147] : memref<3x128x128xbf16, #tpu.memory_space<vmem>>, vector<1x128x128xbf16>
    %205 = vector.shape_cast %204 : vector<1x128x128xbf16> to vector<128x128xbf16>
    %cst_148 = arith.constant dense<0.000000e+00> : vector<128x128xf32>
    %206 = tpu.matmul %203, %205, %cst_148 {dimension_numbers = #tpu.dot_dimension_numbers<[1], [0], [0], [1], [0, 0, 1, 1], [], []>} : vector<128x128xbf16>, vector<128x128xbf16>, vector<128x128xf32> -> vector<128x128xf32>
    %207 = arith.addf %201, %206 : vector<128x128xf32>
    %c0_149 = arith.constant 0 : index
    %c9_150 = arith.constant 9 : index
    %c0_151 = arith.constant 0 : index
    %208 = vector.load %arg8[%c0_149, %c9_150, %c0_151] : memref<18x32x128xf32, #tpu.memory_space<vmem>>, vector<10x16x128xf32>
    %209 = arith.truncf %208 : vector<10x16x128xf32> to vector<10x16x128xbf16>
    %210 = vector.extract_strided_slice %209 {offsets = [0, 0, 0], sizes = [8, 16, 128], strides = [1, 1, 1]} : vector<10x16x128xbf16> to vector<8x16x128xbf16>
    %211 = vector.shape_cast %210 : vector<8x16x128xbf16> to vector<128x128xbf16>
    %212 = vector.extract_strided_slice %209 {offsets = [1, 0, 0], sizes = [8, 16, 128], strides = [1, 1, 1]} : vector<10x16x128xbf16> to vector<8x16x128xbf16>
    %213 = vector.shape_cast %212 : vector<8x16x128xbf16> to vector<128x128xbf16>
    %214 = tpu.concatenate %211, %213 in 1 : vector<128x128xbf16>, vector<128x128xbf16> -> vector<128x256xbf16>
    %c2_152 = arith.constant 2 : index
    %c0_153 = arith.constant 0 : index
    %c0_154 = arith.constant 0 : index
    %215 = vector.load %arg4[%c2_152, %c0_153, %c0_154] : memref<3x256x128xbf16, #tpu.memory_space<vmem>>, vector<1x256x128xbf16>
    %216 = vector.shape_cast %215 : vector<1x256x128xbf16> to vector<256x128xbf16>
    %cst_155 = arith.constant dense<0.000000e+00> : vector<128x128xf32>
    %217 = tpu.matmul %214, %216, %cst_155 {dimension_numbers = #tpu.dot_dimension_numbers<[1], [0], [0], [1], [0, 0, 1, 1], [], []>} : vector<128x256xbf16>, vector<256x128xbf16>, vector<128x128xf32> -> vector<128x128xf32>
    %218 = arith.addf %207, %217 : vector<128x128xf32>
    %219 = vector.extract_strided_slice %209 {offsets = [2, 0, 0], sizes = [8, 16, 128], strides = [1, 1, 1]} : vector<10x16x128xbf16> to vector<8x16x128xbf16>
    %220 = vector.shape_cast %219 : vector<8x16x128xbf16> to vector<128x128xbf16>
    %c2_156 = arith.constant 2 : index
    %c0_157 = arith.constant 0 : index
    %c0_158 = arith.constant 0 : index
    %221 = vector.load %arg5[%c2_156, %c0_157, %c0_158] : memref<3x128x128xbf16, #tpu.memory_space<vmem>>, vector<1x128x128xbf16>
    %222 = vector.shape_cast %221 : vector<1x128x128xbf16> to vector<128x128xbf16>
    %cst_159 = arith.constant dense<0.000000e+00> : vector<128x128xf32>
    %223 = tpu.matmul %220, %222, %cst_159 {dimension_numbers = #tpu.dot_dimension_numbers<[1], [0], [0], [1], [0, 0, 1, 1], [], []>} : vector<128x128xbf16>, vector<128x128xbf16>, vector<128x128xf32> -> vector<128x128xf32>
    %224 = arith.addf %218, %223 : vector<128x128xf32>
    %c0_160 = arith.constant 0 : index
    %c0_161 = arith.constant 0 : index
    %225 = vector.load %arg6[%c0_160, %c0_161] : memref<1x128xf32, #tpu.memory_space<vmem>>, vector<1x128xf32>
    %226 = vector.broadcast %225 : vector<1x128xf32> to vector<128x128xf32>
    %227 = arith.addf %224, %226 : vector<128x128xf32>
    %cst_162 = arith.constant 0.000000e+00 : f32
    %228 = vector.broadcast %cst_162 : f32 to vector<128x128xf32>
    %229 = arith.maximumf %227, %228 : vector<128x128xf32>
    %cst_163 = arith.constant dense<0.000000e+00> : vector<128xf32>
    %230 = vector.multi_reduction <add>, %229, %cst_163 [0] : vector<128x128xf32> to vector<128xf32>
    %231 = vector.shape_cast %230 : vector<128xf32> to vector<1x128xf32>
    %232 = arith.addf %172, %231 : vector<1x128xf32>
    %cst_164 = arith.constant 0.000000e+00 : f32
    %233 = vector.broadcast %cst_164 : f32 to vector<128x128xf32>
    %c8_165 = arith.constant 8 : index
    %c7_166 = arith.constant 7 : index
    %c0_167 = arith.constant 0 : index
    %234 = vector.load %arg8[%c8_165, %c7_166, %c0_167] : memref<18x32x128xf32, #tpu.memory_space<vmem>>, vector<10x16x128xf32>
    %235 = arith.truncf %234 : vector<10x16x128xf32> to vector<10x16x128xbf16>
    %236 = vector.extract_strided_slice %235 {offsets = [0, 0, 0], sizes = [8, 16, 128], strides = [1, 1, 1]} : vector<10x16x128xbf16> to vector<8x16x128xbf16>
    %237 = vector.shape_cast %236 : vector<8x16x128xbf16> to vector<128x128xbf16>
    %238 = vector.extract_strided_slice %235 {offsets = [1, 0, 0], sizes = [8, 16, 128], strides = [1, 1, 1]} : vector<10x16x128xbf16> to vector<8x16x128xbf16>
    %239 = vector.shape_cast %238 : vector<8x16x128xbf16> to vector<128x128xbf16>
    %240 = tpu.concatenate %237, %239 in 1 : vector<128x128xbf16>, vector<128x128xbf16> -> vector<128x256xbf16>
    %c0_168 = arith.constant 0 : index
    %c0_169 = arith.constant 0 : index
    %c0_170 = arith.constant 0 : index
    %241 = vector.load %arg4[%c0_168, %c0_169, %c0_170] : memref<3x256x128xbf16, #tpu.memory_space<vmem>>, vector<1x256x128xbf16>
    %242 = vector.shape_cast %241 : vector<1x256x128xbf16> to vector<256x128xbf16>
    %cst_171 = arith.constant dense<0.000000e+00> : vector<128x128xf32>
    %243 = tpu.matmul %240, %242, %cst_171 {dimension_numbers = #tpu.dot_dimension_numbers<[1], [0], [0], [1], [0, 0, 1, 1], [], []>} : vector<128x256xbf16>, vector<256x128xbf16>, vector<128x128xf32> -> vector<128x128xf32>
    %244 = arith.addf %233, %243 : vector<128x128xf32>
    %245 = vector.extract_strided_slice %235 {offsets = [2, 0, 0], sizes = [8, 16, 128], strides = [1, 1, 1]} : vector<10x16x128xbf16> to vector<8x16x128xbf16>
    %246 = vector.shape_cast %245 : vector<8x16x128xbf16> to vector<128x128xbf16>
    %c0_172 = arith.constant 0 : index
    %c0_173 = arith.constant 0 : index
    %c0_174 = arith.constant 0 : index
    %247 = vector.load %arg5[%c0_172, %c0_173, %c0_174] : memref<3x128x128xbf16, #tpu.memory_space<vmem>>, vector<1x128x128xbf16>
    %248 = vector.shape_cast %247 : vector<1x128x128xbf16> to vector<128x128xbf16>
    %cst_175 = arith.constant dense<0.000000e+00> : vector<128x128xf32>
    %249 = tpu.matmul %246, %248, %cst_175 {dimension_numbers = #tpu.dot_dimension_numbers<[1], [0], [0], [1], [0, 0, 1, 1], [], []>} : vector<128x128xbf16>, vector<128x128xbf16>, vector<128x128xf32> -> vector<128x128xf32>
    %250 = arith.addf %244, %249 : vector<128x128xf32>
    %c8_176 = arith.constant 8 : index
    %c8_177 = arith.constant 8 : index
    %c0_178 = arith.constant 0 : index
    %251 = vector.load %arg8[%c8_176, %c8_177, %c0_178] : memref<18x32x128xf32, #tpu.memory_space<vmem>>, vector<10x16x128xf32>
    %252 = arith.truncf %251 : vector<10x16x128xf32> to vector<10x16x128xbf16>
    %253 = vector.extract_strided_slice %252 {offsets = [0, 0, 0], sizes = [8, 16, 128], strides = [1, 1, 1]} : vector<10x16x128xbf16> to vector<8x16x128xbf16>
    %254 = vector.shape_cast %253 : vector<8x16x128xbf16> to vector<128x128xbf16>
    %255 = vector.extract_strided_slice %252 {offsets = [1, 0, 0], sizes = [8, 16, 128], strides = [1, 1, 1]} : vector<10x16x128xbf16> to vector<8x16x128xbf16>
    %256 = vector.shape_cast %255 : vector<8x16x128xbf16> to vector<128x128xbf16>
    %257 = tpu.concatenate %254, %256 in 1 : vector<128x128xbf16>, vector<128x128xbf16> -> vector<128x256xbf16>
    %c1_179 = arith.constant 1 : index
    %c0_180 = arith.constant 0 : index
    %c0_181 = arith.constant 0 : index
    %258 = vector.load %arg4[%c1_179, %c0_180, %c0_181] : memref<3x256x128xbf16, #tpu.memory_space<vmem>>, vector<1x256x128xbf16>
    %259 = vector.shape_cast %258 : vector<1x256x128xbf16> to vector<256x128xbf16>
    %cst_182 = arith.constant dense<0.000000e+00> : vector<128x128xf32>
    %260 = tpu.matmul %257, %259, %cst_182 {dimension_numbers = #tpu.dot_dimension_numbers<[1], [0], [0], [1], [0, 0, 1, 1], [], []>} : vector<128x256xbf16>, vector<256x128xbf16>, vector<128x128xf32> -> vector<128x128xf32>
    %261 = arith.addf %250, %260 : vector<128x128xf32>
    %262 = vector.extract_strided_slice %252 {offsets = [2, 0, 0], sizes = [8, 16, 128], strides = [1, 1, 1]} : vector<10x16x128xbf16> to vector<8x16x128xbf16>
    %263 = vector.shape_cast %262 : vector<8x16x128xbf16> to vector<128x128xbf16>
    %c1_183 = arith.constant 1 : index
    %c0_184 = arith.constant 0 : index
    %c0_185 = arith.constant 0 : index
    %264 = vector.load %arg5[%c1_183, %c0_184, %c0_185] : memref<3x128x128xbf16, #tpu.memory_space<vmem>>, vector<1x128x128xbf16>
    %265 = vector.shape_cast %264 : vector<1x128x128xbf16> to vector<128x128xbf16>
    %cst_186 = arith.constant dense<0.000000e+00> : vector<128x128xf32>
    %266 = tpu.matmul %263, %265, %cst_186 {dimension_numbers = #tpu.dot_dimension_numbers<[1], [0], [0], [1], [0, 0, 1, 1], [], []>} : vector<128x128xbf16>, vector<128x128xbf16>, vector<128x128xf32> -> vector<128x128xf32>
    %267 = arith.addf %261, %266 : vector<128x128xf32>
    %c8_187 = arith.constant 8 : index
    %c9_188 = arith.constant 9 : index
    %c0_189 = arith.constant 0 : index
    %268 = vector.load %arg8[%c8_187, %c9_188, %c0_189] : memref<18x32x128xf32, #tpu.memory_space<vmem>>, vector<10x16x128xf32>
    %269 = arith.truncf %268 : vector<10x16x128xf32> to vector<10x16x128xbf16>
    %270 = vector.extract_strided_slice %269 {offsets = [0, 0, 0], sizes = [8, 16, 128], strides = [1, 1, 1]} : vector<10x16x128xbf16> to vector<8x16x128xbf16>
    %271 = vector.shape_cast %270 : vector<8x16x128xbf16> to vector<128x128xbf16>
    %272 = vector.extract_strided_slice %269 {offsets = [1, 0, 0], sizes = [8, 16, 128], strides = [1, 1, 1]} : vector<10x16x128xbf16> to vector<8x16x128xbf16>
    %273 = vector.shape_cast %272 : vector<8x16x128xbf16> to vector<128x128xbf16>
    %274 = tpu.concatenate %271, %273 in 1 : vector<128x128xbf16>, vector<128x128xbf16> -> vector<128x256xbf16>
    %c2_190 = arith.constant 2 : index
    %c0_191 = arith.constant 0 : index
    %c0_192 = arith.constant 0 : index
    %275 = vector.load %arg4[%c2_190, %c0_191, %c0_192] : memref<3x256x128xbf16, #tpu.memory_space<vmem>>, vector<1x256x128xbf16>
    %276 = vector.shape_cast %275 : vector<1x256x128xbf16> to vector<256x128xbf16>
    %cst_193 = arith.constant dense<0.000000e+00> : vector<128x128xf32>
    %277 = tpu.matmul %274, %276, %cst_193 {dimension_numbers = #tpu.dot_dimension_numbers<[1], [0], [0], [1], [0, 0, 1, 1], [], []>} : vector<128x256xbf16>, vector<256x128xbf16>, vector<128x128xf32> -> vector<128x128xf32>
    %278 = arith.addf %267, %277 : vector<128x128xf32>
    %279 = vector.extract_strided_slice %269 {offsets = [2, 0, 0], sizes = [8, 16, 128], strides = [1, 1, 1]} : vector<10x16x128xbf16> to vector<8x16x128xbf16>
    %280 = vector.shape_cast %279 : vector<8x16x128xbf16> to vector<128x128xbf16>
    %c2_194 = arith.constant 2 : index
    %c0_195 = arith.constant 0 : index
    %c0_196 = arith.constant 0 : index
    %281 = vector.load %arg5[%c2_194, %c0_195, %c0_196] : memref<3x128x128xbf16, #tpu.memory_space<vmem>>, vector<1x128x128xbf16>
    %282 = vector.shape_cast %281 : vector<1x128x128xbf16> to vector<128x128xbf16>
    %cst_197 = arith.constant dense<0.000000e+00> : vector<128x128xf32>
    %283 = tpu.matmul %280, %282, %cst_197 {dimension_numbers = #tpu.dot_dimension_numbers<[1], [0], [0], [1], [0, 0, 1, 1], [], []>} : vector<128x128xbf16>, vector<128x128xbf16>, vector<128x128xf32> -> vector<128x128xf32>
    %284 = arith.addf %278, %283 : vector<128x128xf32>
    %c0_198 = arith.constant 0 : index
    %c0_199 = arith.constant 0 : index
    %285 = vector.load %arg6[%c0_198, %c0_199] : memref<1x128xf32, #tpu.memory_space<vmem>>, vector<1x128xf32>
    %286 = vector.broadcast %285 : vector<1x128xf32> to vector<128x128xf32>
    %287 = arith.addf %284, %286 : vector<128x128xf32>
    %cst_200 = arith.constant 0.000000e+00 : f32
    %288 = vector.broadcast %cst_200 : f32 to vector<128x128xf32>
    %289 = arith.maximumf %287, %288 : vector<128x128xf32>
    %cst_201 = arith.constant dense<0.000000e+00> : vector<128xf32>
    %290 = vector.multi_reduction <add>, %289, %cst_201 [0] : vector<128x128xf32> to vector<128xf32>
    %291 = vector.shape_cast %290 : vector<128xf32> to vector<1x128xf32>
    %292 = arith.addf %232, %291 : vector<1x128xf32>
    %cst_202 = arith.constant 3.906250e-03 : f32
    %293 = vector.broadcast %cst_202 : f32 to vector<1x128xf32>
    %294 = arith.mulf %292, %293 : vector<1x128xf32>
    %c1_203 = arith.constant 1 : index
    %c0_204 = arith.constant 0 : index
    %c0_205 = arith.constant 0 : index
    %295 = vector.load %arg7[%c1_203, %c0_204, %c0_205] : memref<2x1x128xf32, #tpu.memory_space<vmem>>, vector<1x1x128xf32>
    %296 = vector.shape_cast %295 : vector<1x1x128xf32> to vector<1x128xf32>
    %297 = vector.shape_cast %294 : vector<1x128xf32> to vector<1x1x128xf32>
    tpu.vector_store %arg7[%c1_203, %c0_204, %c0_205], %297 {strides = array<i32>} : memref<2x1x128xf32, #tpu.memory_space<vmem>>, vector<1x1x128xf32>,
    return
  }
  func.func @transform_0(%arg0: i32) -> (i32, i32, i32) {
    %c0_i32 = arith.constant 0 : i32
    %c0_i32_0 = arith.constant 0 : i32
    %c0_i32_1 = arith.constant 0 : i32
    return %arg0, %c0_i32, %c0_i32_0 : i32, i32, i32
  }
  func.func @transform_1(%arg0: i32) -> (i32, i32) {
    %c0_i32 = arith.constant 0 : i32
    %c0_i32_0 = arith.constant 0 : i32
    %c0_i32_1 = arith.constant 0 : i32
    return %c0_i32, %c0_i32_0 : i32, i32
  }
  func.func @transform_2(%arg0: i32) -> (i32, i32) {
    %c0_i32 = arith.constant 0 : i32
    %c0_i32_0 = arith.constant 0 : i32
    %c0_i32_1 = arith.constant 0 : i32
    return %c0_i32, %c0_i32_0 : i32, i32
  }
  func.func @transform_3(%arg0: i32) -> (i32, i32, i32) {
    %c0_i32 = arith.constant 0 : i32
    %c0_i32_0 = arith.constant 0 : i32
    %c0_i32_1 = arith.constant 0 : i32
    %c0_i32_2 = arith.constant 0 : i32
    return %c0_i32, %c0_i32_0, %c0_i32_1 : i32, i32, i32
  }
  func.func @transform_4(%arg0: i32) -> (i32, i32, i32) {
    %c0_i32 = arith.constant 0 : i32
    %c0_i32_0 = arith.constant 0 : i32
    %c0_i32_1 = arith.constant 0 : i32
    %c0_i32_2 = arith.constant 0 : i32
    return %c0_i32, %c0_i32_0, %c0_i32_1 : i32, i32, i32
  }
  func.func @transform_5(%arg0: i32) -> (i32, i32) {
    %c0_i32 = arith.constant 0 : i32
    %c0_i32_0 = arith.constant 0 : i32
    %c0_i32_1 = arith.constant 0 : i32
    return %c0_i32, %c0_i32_0 : i32, i32
  }
  func.func @transform_6(%arg0: i32) -> (i32, i32, i32) {
    %c0_i32 = arith.constant 0 : i32
    %c0_i32_0 = arith.constant 0 : i32
    %c0_i32_1 = arith.constant 0 : i32
    return %arg0, %c0_i32, %c0_i32_0 : i32, i32, i32
  }
}

</mosaic_0001>

<bundles_post_ra>
// kernel: perceptual_loss.1
= control target key start
LH: loop header
LB: loop body
LE: loop exit
PB: predicated region body
PF: predicated region fallthrough
CT: control target
= control target key end

     0   :  { %s8388_s21 = smov 0   ;;  %s10610_s0 = inlined_call_operand.vmem [shape: bf16[4,256,128], index: 0, kind: input, shape index: {}]   ;;  %s10611_s1 = inlined_call_operand.vmem [shape: bf16[128,128], index: 1, kind: input, shape index: {}]   ;;  %s10612_s2 = inlined_call_operand.vmem [shape: f32[1,128], index: 2, kind: input, shape index: {}]   ;;  %s10613_s3 = inlined_call_operand.vmem [shape: bf16[3,256,128], index: 3, kind: input, shape index: {}]   ;;  %s10614_s4 = inlined_call_operand.vmem [shape: bf16[3,128,128], index: 4, kind: input, shape index: {}]   ;;  %s10615_s5 = inlined_call_operand.vmem [shape: f32[1,128], index: 5, kind: input, shape index: {}]   ;;  %s10616_s6 = inlined_call_operand.vmem [shape: f32[4,1,128], index: 6, kind: output, shape index: {}]  }
   0x1 LB: > { %s5774_s22 = sadd.s32 4294967295, %s8350_s21   ;;  %p5778_p0 = scmp.ge.s32.totalorder %s8350_s21, 1  ;;  %s8350_s21 = sphi %s8388_s21, %s16_s21  }
   0x2   : > { %p214_p1 = scmp.lt.s32.totalorder %s8350_s21, 3 }
   0x4   : > { %p215_p2 = pnand %p5778_p0, %p214_p1 }
   0x6   : > { %218 = sbr.rel (%p215_p2) target bundleno = 1332 (0x534), region = 44 }
   0xd   : > { %v8090_v0 = vld [vmem:[%s10611_s1] sm:$0xff]   ;;  %s5779_s25 = sshll.u32 %s5774_s22, 1  ;;  %v8091_v1 = vld [vmem:[%s10611_s1 + $0x8] sm:$0xff]   ;;  %v8352_v2 = vmov 0.0   ;;  %v8092_v3 = vld [vmem:[%s10611_s1 + $0x10] sm:$0xff]  }
   0xe   : > { %p245_p3 = scmp.lt.s32.totalorder %s5779_s25, 3  ;;  %7249 = vmatprep.subr.bf16.mxu0 %v8090_v0  ;;  %257 = vst [vmem:[#allocation2] sm:$0xff] %v8352_v2  ;;  %258 = vst [vmem:[#allocation2 + $0x8] sm:$0xff] %v8352_v2  ;;  %v8093_v4 = vld [vmem:[%s10611_s1 + $0x18] sm:$0xff]   ;;  %v8098_v5 = vld [vmem:[%s10611_s1] sm:$0xff]  }
   0xf   : > { %7250 = vmatpush3.bf16.msra.mxu0 %v8090_v0  ;;  %259 = vst [vmem:[#allocation2 + $0x10] sm:$0xff] %v8352_v2  ;;  %260 = vst [vmem:[#allocation2 + $0x18] sm:$0xff] %v8352_v2  ;;  %v8094_v7 = vld [vmem:[%s10611_s1 + $0x20] sm:$0xff]   ;;  %7281 = vmatprep.subr.bf16.mxu1 %v8098_v5  ;;  %v8101_v8 = vld [vmem:[%s10611_s1 + $0x8] sm:$0xff]  }
  0x10   : > { %s10701_s25 = smov (!%p245_p3, %s5779_s25), 3  ;;  %261 = vst [vmem:[#allocation2 + $0x20] sm:$0xff] %v8352_v2  ;;  %264 = vst [vmem:[#allocation2 + $0x38] sm:$0xff] %v8352_v2  ;;  %7251 = vmatprep.subr.bf16.mxu0 %v8091_v1  ;;  %7282 = vmatpush3.bf16.msra.mxu1 %v8098_v5  ;;  %v8102_v9 = vld [vmem:[%s10611_s1 + $0x10] sm:$0xff]   ;;  %v8095_v10 = vld [vmem:[%s10611_s1 + $0x28] sm:$0xff]  }
  0x11   : > { %265 = vst [vmem:[#allocation2 + $0x40] sm:$0xff] %v8352_v2  ;;  %268 = vst [vmem:[#allocation2 + $0x58] sm:$0xff] %v8352_v2  ;;  %s6224_s30 = sshll.u32 %s10701_s25, 7  ;;  %7283 = vmatprep.subr.bf16.mxu1 %v8101_v8  ;;  %v8105_v11 = vld [vmem:[%s10611_s1 + $0x18] sm:$0xff]   ;;  %v8096_v12 = vld [vmem:[%s10611_s1 + $0x30] sm:$0xff]   ;;  %s9800_s17 = scalar_lea.vmem %s10616_s6, %s10701_s25 }
  0x12   : > { %269 = vst [vmem:[#allocation2 + $0x60] sm:$0xff] %v8352_v2  ;;  %272 = vst [vmem:[#allocation2 + $0x78] sm:$0xff] %v8352_v2  ;;  %s8411_s9 = scalar_lea.vmem %s10610_s0, %s6224_s30  ;;  %v8106_v13 = vld [vmem:[%s10611_s1 + $0x20] sm:$0xff]   ;;  %v8097_v14 = vld [vmem:[%s10611_s1 + $0x38] sm:$0xff]  }
  0x13   : > { %273 = vst [vmem:[#allocation2 + $0x80] sm:$0xff] %v8352_v2  ;;  %276 = vst [vmem:[#allocation2 + $0x98] sm:$0xff] %v8352_v2  ;;  %7252 = vmatpush3.bf16.msra.mxu0 %v8091_v1  ;;  %v8099_v6 = vld [vmem:[%s8411_s9] sm:$0xff]   ;;  %v8109_v15 = vld [vmem:[%s10611_s1 + $0x28] sm:$0xff]  }
  0x14   : > { %277 = vst [vmem:[#allocation2 + $0xa0] sm:$0xff] %v8352_v2  ;;  %280 = vst [vmem:[#allocation2 + $0xb8] sm:$0xff] %v8352_v2  ;;  %7253 = vmatprep.subr.bf16.mxu0 %v8092_v3  ;;  %7265 = vmatprep.mubr.bf16.mxu0 %v8099_v6  ;;  %v8114_v16 = vld [vmem:[%s8411_s9 + $0x40] sm:$0xff]   ;;  %v8110_v17 = vld [vmem:[%s10611_s1 + $0x30] sm:$0xff]  }
  0x15   : > { %281 = vst [vmem:[#allocation2 + $0xc0] sm:$0xff] %v8352_v2  ;;  %284 = vst [vmem:[#allocation2 + $0xd8] sm:$0xff] %v8352_v2  ;;  %7284 = vmatpush3.bf16.msra.mxu1 %v8101_v8  ;;  %7297 = vmatprep.mubr.bf16.mxu1 %v8114_v16  ;;  %v8100_v18 = vld [vmem:[%s8411_s9 + $0x8] sm:$0xff]   ;;  %v8103_v19 = vld [vmem:[%s8411_s9 + $0x10] sm:$0xff]  }
  0x16   : > { %285 = vst [vmem:[#allocation2 + $0xe0] sm:$0xff] %v8352_v2  ;;  %288 = vst [vmem:[#allocation2 + $0xf8] sm:$0xff] %v8352_v2  ;;  %7285 = vmatprep.subr.bf16.mxu1 %v8102_v9  ;;  %v8113_v20 = vld [vmem:[%s10611_s1 + $0x38] sm:$0xff]   ;;  %v8122_v21 = vld [vmem:[%s10613_s3 + $0x40] sm:$0xff]  }
  0x17   : > { %289 = vst [vmem:[#allocation2 + $0x100] sm:$0xff] %v8352_v2  ;;  %292 = vst [vmem:[#allocation2 + $0x118] sm:$0xff] %v8352_v2  ;;  %7254 = vmatpush3.bf16.msra.mxu0 %v8092_v3  ;;  %v8104_v22 = vld [vmem:[%s8411_s9 + $0x18] sm:$0xff]   ;;  %v8115_v23 = vld [vmem:[%s8411_s9 + $0x48] sm:$0xff]  }
  0x18   : > { %293 = vst [vmem:[#allocation2 + $0x120] sm:$0xff] %v8352_v2  ;;  %296 = vst [vmem:[#allocation2 + $0x138] sm:$0xff] %v8352_v2  ;;  %7255 = vmatprep.subr.bf16.mxu0 %v8093_v4  ;;  %v8126_v24 = vld [vmem:[%s10614_s4] sm:$0xff]   ;;  %v8116_v26 = vld [vmem:[%s8411_s9 + $0x50] sm:$0xff]  }
  0x19   : > { %297 = vst [vmem:[#allocation2 + $0x140] sm:$0xff] %v8352_v2  ;;  %300 = vst [vmem:[#allocation2 + $0x158] sm:$0xff] %v8352_v2  ;;  %7286 = vmatpush3.bf16.msra.mxu1 %v8102_v9  ;;  %v8107_v25 = vld [vmem:[%s8411_s9 + $0x20] sm:$0xff]   ;;  %v8129_v28 = vld [vmem:[%s10614_s4 + $0x8] sm:$0xff]  }
  0x1a   : > { %301 = vst [vmem:[#allocation2 + $0x160] sm:$0xff] %v8352_v2  ;;  %304 = vst [vmem:[#allocation2 + $0x178] sm:$0xff] %v8352_v2  ;;  %7287 = vmatprep.subr.bf16.mxu1 %v8105_v11  ;;  %v8123_v27 = vld [vmem:[%s10613_s3] sm:$0xff]   ;;  %v8124_v29 = vld [vmem:[%s10613_s3 + $0x48] sm:$0xff]  }
  0x1b   : > { %305 = vst [vmem:[#allocation2 + $0x180] sm:$0xff] %v8352_v2  ;;  %308 = vst [vmem:[#allocation2 + $0x198] sm:$0xff] %v8352_v2  ;;  %7256 = vmatpush3.bf16.msra.mxu0 %v8093_v4  ;;  %v8125_v30 = vld [vmem:[%s10613_s3 + $0x8] sm:$0xff]   ;;  %v8127_v31 = vld [vmem:[%s10613_s3 + $0x50] sm:$0xff]  }
  0x1c   : > { %309 = vst [vmem:[#allocation2 + $0x1a0] sm:$0xff] %v8352_v2  ;;  %312 = vst [vmem:[#allocation2 + $0x1b8] sm:$0xff] %v8352_v2  ;;  %7257 = vmatprep.subr.bf16.mxu0 %v8094_v7  ;;  %v8108_v32 = vld [vmem:[%s8411_s9 + $0x28] sm:$0xff]   ;;  %v8117_v33 = vld [vmem:[%s8411_s9 + $0x58] sm:$0xff]  }
  0x1d   : > { %313 = vst [vmem:[#allocation2 + $0x1c0] sm:$0xff] %v8352_v2  ;;  %316 = vst [vmem:[#allocation2 + $0x1d8] sm:$0xff] %v8352_v2  ;;  %7288 = vmatpush3.bf16.msra.mxu1 %v8105_v11  ;;  %v8111_v34 = vld [vmem:[%s8411_s9 + $0x30] sm:$0xff]   ;;  %v8118_v35 = vld [vmem:[%s8411_s9 + $0x60] sm:$0xff]  }
  0x1e   : > { %317 = vst [vmem:[#allocation2 + $0x1e0] sm:$0xff] %v8352_v2  ;;  %320 = vst [vmem:[#allocation2 + $0x1f8] sm:$0xff] %v8352_v2  ;;  %7289 = vmatprep.subr.bf16.mxu1 %v8106_v13  ;;  %v8128_v36 = vld [vmem:[%s10613_s3 + $0x10] sm:$0xff]   ;;  %v8130_v37 = vld [vmem:[%s10613_s3 + $0x58] sm:$0xff]  }
  0x1f   : > { %321 = vst [vmem:[#allocation2 + $0x200] sm:$0xff] %v8352_v2  ;;  %324 = vst [vmem:[#allocation2 + $0x218] sm:$0xff] %v8352_v2  ;;  %7258 = vmatpush3.bf16.msra.mxu0 %v8094_v7  ;;  %v8112_v38 = vld [vmem:[%s8411_s9 + $0x38] sm:$0xff]   ;;  %v8119_v39 = vld [vmem:[%s8411_s9 + $0x68] sm:$0xff]  }
  0x20   : > { %325 = vst [vmem:[#allocation2 + $0x220] sm:$0xff] %v8352_v2  ;;  %326 = vst [vmem:[#allocation2 + $0x228] sm:$0xff] %v8352_v2  ;;  %7259 = vmatprep.subr.bf16.mxu0 %v8095_v10  ;;  %v8120_v40 = vld [vmem:[%s8411_s9 + $0x70] sm:$0xff]   ;;  %v8121_v41 = vld [vmem:[%s8411_s9 + $0x78] sm:$0xff]  }
  0x21   : > { %327 = vst [vmem:[#allocation2 + $0x230] sm:$0xff] %v8352_v2  ;;  %328 = vst [vmem:[#allocation2 + $0x238] sm:$0xff] %v8352_v2  ;;  %7290 = vmatpush3.bf16.msra.mxu1 %v8106_v13  ;;  %v8131_v42 = vld [vmem:[%s10613_s3 + $0x18] sm:$0xff]   ;;  %v8501_v43 = vld [vmem:[%s10614_s4 + $0x10] sm:$0xff]  }
  0x22   : > { %7291 = vmatprep.subr.bf16.mxu1 %v8109_v15  ;;  %v8133_v44 = vld [vmem:[%s10613_s3 + $0x60] sm:$0xff]   ;;  %v8514_v46 = vld [vmem:[%s10614_s4 + $0x18] sm:$0xff]   ;;  %v8136_v47 = vld [vmem:[%s10613_s3 + $0x68] sm:$0xff]  }
  0x23   : > { %7260 = vmatpush3.bf16.msra.mxu0 %v8095_v10  ;;  %v8134_v45 = vld [vmem:[%s10613_s3 + $0x20] sm:$0xff]   ;;  %v8137_v48 = vld [vmem:[%s10613_s3 + $0x28] sm:$0xff]   ;;  %v8139_v50 = vld [vmem:[%s10613_s3 + $0x70] sm:$0xff]  }
  0x24   : > { %7261 = vmatprep.subr.bf16.mxu0 %v8096_v12  ;;  %v8527_v49 = vld [vmem:[%s10614_s4 + $0x20] sm:$0xff]   ;;  %v8140_v51 = vld [vmem:[%s10613_s3 + $0x30] sm:$0xff]   ;;  %v8540_v52 = vld [vmem:[%s10614_s4 + $0x28] sm:$0xff]  }
  0x25   : > { %7292 = vmatpush3.bf16.msra.mxu1 %v8109_v15  ;;  %v8142_v53 = vld [vmem:[%s10613_s3 + $0x78] sm:$0xff]   ;;  %v8553_v55 = vld [vmem:[%s10614_s4 + $0x30] sm:$0xff]   ;;  %v8567_v57 = vld [vmem:[%s10613_s3 + $0xc0] sm:$0xff]  }
  0x26   : > { %7293 = vmatprep.subr.bf16.mxu1 %v8110_v17  ;;  %v8143_v54 = vld [vmem:[%s10613_s3 + $0x38] sm:$0xff]   ;;  %v8573_v58 = vld [vmem:[%s10613_s3 + $0x140] sm:$0xff]  }
  0x27   : > { %7262 = vmatpush3.bf16.msra.mxu0 %v8096_v12  ;;  %v8560_v56 = vld [vmem:[%s10614_s4 + $0x38] sm:$0xff]   ;;  %v8579_v59 = vld [vmem:[%s10612_s2] ss:$0 sm:$0xff] }
  0x28   : > { %7263 = vmatprep.subr.bf16.mxu0 %v8097_v14 }
  0x29   : > { %7294 = vmatpush3.bf16.msra.mxu1 %v8110_v17 }
  0x2a   : > { %7295 = vmatprep.subr.bf16.mxu1 %v8113_v20 }
  0x2b   : > { %7264 = vmatpush3.bf16.msra.mxu0 %v8097_v14 }
  0x2c   : > { %7313 = vmatprep.subr.bf16.mxu0 %v8126_v24 }
  0x2d   : > { %7296 = vmatpush3.bf16.msra.mxu1 %v8113_v20 }
  0x2e   : > { %7266 = vmatmul.mubr.bf16.vlgmr.msra.gmra.mrb[0].mxu0 %v8100_v18  ;;  %6273 = vmatprep.subr.bf16.mxu1 %v8122_v21 }
  0x2f   : > { %7269 = vmatprep.mubr.bf16.mxu0 %v8103_v19  ;;  %7314 = vmatpush3.bf16.msra.mxu0 %v8126_v24 }
  0x30   : > { %7315 = vmatprep.subr.bf16.mxu0 %v8129_v28  ;;  %7298 = vmatmul.mubr.bf16.vlgmr.msra.gmra.mrb[0].mxu1 %v8115_v23 }
  0x31   : > { %7301 = vmatprep.mubr.bf16.mxu1 %v8116_v26  ;;  %6274 = vmatpush3.bf16.msra.mxu1 %v8123_v27 }
  0x32   : > { %6275 = vmatprep.subr.bf16.mxu1 %v8124_v29  ;;  %v860_v29 = vld [vmem:[#allocation2 + $0xf] sm:$0xff] }
  0x33   : > { %7316 = vmatpush3.bf16.msra.mxu0 %v8129_v28  ;;  %v859_v28 = vld [vmem:[#allocation2 + $0x7] sm:$0xff] }
  0x34   : > { %7317 = vmatprep.subr.bf16.mxu0 %v8501_v43 }
  0x35   : > { %6276 = vmatpush3.bf16.msra.mxu1 %v8125_v30 }
  0x36   : > { %7270 = vmatmul.mubr.bf16.gmra.mrb[4].mxu0 %v8104_v22  ;;  %6277 = vmatprep.subr.bf16.mxu1 %v8127_v31 }
  0x37   : > { %7273 = vmatprep.mubr.bf16.mxu0 %v8107_v25  ;;  %7318 = vmatpush3.bf16.msra.mxu0 %v8501_v43 }
  0x38   : > { %7302 = vmatmul.mubr.bf16.gmra.mrb[4].mxu1 %v8117_v33  ;;  %7319 = vmatprep.subr.bf16.mxu0 %v8514_v46 }
  0x39   : > { %7305 = vmatprep.mubr.bf16.mxu1 %v8118_v35  ;;  %6278 = vmatpush3.bf16.msra.mxu1 %v8128_v36 }
  0x3a   : > { %6279 = vmatprep.subr.bf16.mxu1 %v8130_v37 }
  0x3b   : > { %7320 = vmatpush3.bf16.msra.mxu0 %v8514_v46 }
  0x3c   : > { %7321 = vmatprep.subr.bf16.mxu0 %v8527_v49 }
  0x3d   : > { %6280 = vmatpush3.bf16.msra.mxu1 %v8131_v42 }
  0x3e   : > { %7274 = vmatmul.mubr.bf16.gmra.mrb[8].mxu0 %v8108_v32  ;;  %6281 = vmatprep.subr.bf16.mxu1 %v8133_v44 }
  0x3f   : > { %7277 = vmatprep.mubr.bf16.mxu0 %v8111_v34  ;;  %7322 = vmatpush3.bf16.msra.mxu0 %v8527_v49 }
  0x40   : > { %7306 = vmatmul.mubr.bf16.gmra.mrb[8].mxu1 %v8119_v39  ;;  %7323 = vmatprep.subr.bf16.mxu0 %v8540_v52 }
  0x41   : > { %7309 = vmatprep.mubr.bf16.mxu1 %v8120_v40  ;;  %6282 = vmatpush3.bf16.msra.mxu1 %v8134_v45 }
  0x42   : > { %6283 = vmatprep.subr.bf16.mxu1 %v8136_v47 }
  0x43   : > { %7324 = vmatpush3.bf16.msra.mxu0 %v8540_v52 }
  0x44   : > { %7325 = vmatprep.subr.bf16.mxu0 %v8553_v55 }
  0x45   : > { %6284 = vmatpush3.bf16.msra.mxu1 %v8137_v48  ;;  %v8608_v48 = vld [vmem:[%s10613_s3 + $0x100] sm:$0xff]  }
  0x46   : > { %7278 = vmatmul.mubr.bf16.gmra.mrb[12].mxu0 %v8112_v38  ;;  %6285 = vmatprep.subr.bf16.mxu1 %v8139_v50 }
  0x47   : > { %7326 = vmatpush3.bf16.msra.mxu0 %v8553_v55 }
  0x48   : > { %7310 = vmatmul.mubr.bf16.gmra.mrb[12].mxu1 %v8121_v41  ;;  %7327 = vmatprep.subr.bf16.mxu0 %v8560_v56  ;;  %v879_v41 = vpack.c.bf16 %v860_v29, %v859_v28 }
  0x49   : > { %6286 = vmatpush3.bf16.msra.mxu1 %v8140_v51 }
  0x4a   : > { %6287 = vmatprep.subr.bf16.mxu1 %v8142_v53 }
  0x4b   : > { %7328 = vmatpush3.bf16.msra.mxu0 %v8560_v56 }
  0x4c   : > { %6337 = vmatprep.subr.bf16.mxu0 %v8567_v57 }
  0x4d   : > { %6288 = vmatpush3.bf16.msra.mxu1 %v8143_v54 }
  0x4e   : > { %6417 = vmatprep.subr.bf16.mxu1 %v8573_v58 }
 0x101   : > { %v7267_v60 = vpop.f32.mrb[0].mxu0 }
 0x102   : > { %v507_v61 = vadd.f32 %v7267_v60, %v8579_v59  ;;  %v498_v62 = vpop.f32.mrb[1].mxu0 }
 0x103   : > { %v499_v63 = vadd.f32 %v8579_v59, %v498_v62  ;;  %v7268_v0 = vpop.f32.mrb[2].mxu0  ;;  %v7299_v10 = vpop.f32.mrb[0].mxu1 }
 0x104   : > { %v563_v1 = vmax.f32 %v507_v61, 0.0  ;;  %v510_v2 = vadd.f32 %v7268_v0, %v8579_v59  ;;  %v501_v3 = vpop.f32.mrb[3].mxu0  ;;  %v772_v14 = vadd.f32 %v7299_v10, %v8579_v59  ;;  %v763_v15 = vpop.f32.mrb[1].mxu1  ;;  %v8619_v61 = vld [vmem:[%s10613_s3 + $0x148] sm:$0xff]  }
 0x105   : > { %v561_v4 = vmax.f32 %v499_v63, 0.0  ;;  %v502_v5 = vadd.f32 %v8579_v59, %v501_v3  ;;  %v764_v18 = vadd.f32 %v8579_v59, %v763_v15  ;;  %v7300_v19 = vpop.f32.mrb[2].mxu1 }
 0x106   : > { %580 = vst [vmem:[#allocation2 + $0x48] sm:$0xff] %v563_v1  ;;  %v564_v6 = vmax.f32 %v510_v2, 0.0  ;;  %v828_v23 = vmax.f32 %v772_v14, 0.0  ;;  %v775_v24 = vadd.f32 %v7300_v19, %v8579_v59  ;;  %v766_v25 = vpop.f32.mrb[3].mxu1  ;;  %v8640_v14 = vld [vmem:[%s10613_s3 + $0x108] sm:$0xff]  }
 0x107   : > { %578 = vst [vmem:[#allocation2 + $0x28] sm:$0xff] %v561_v4  ;;  %v562_v7 = vmax.f32 %v502_v5, 0.0  ;;  %v826_v30 = vmax.f32 %v764_v18, 0.0  ;;  %v767_v31 = vadd.f32 %v8579_v59, %v766_v25  ;;  %v8650_v18 = vld [vmem:[%s10613_s3 + $0x150] sm:$0xff]   ;;  %v8661_v25 = vld [vmem:[%s10613_s3 + $0x80] sm:$0xff]  }
 0x108   : > { %581 = vst [vmem:[#allocation2 + $0x50] sm:$0xff] %v564_v6  ;;  %v8585_v8 = vpack.c.bf16 %v564_v6, %v563_v1  ;;  %845 = vst [vmem:[#allocation2 + $0x148] sm:$0xff] %v828_v23  ;;  %v829_v33 = vmax.f32 %v775_v24, 0.0 }
 0x109   : > { %579 = vst [vmem:[#allocation2 + $0x30] sm:$0xff] %v562_v7  ;;  %v7271_v9 = vpop.f32.mrb[4].mxu0  ;;  %v8587_v11 = vpack.c.bf16 %v562_v7, %v561_v4  ;;  %843 = vst [vmem:[#allocation2 + $0x128] sm:$0xff] %v826_v30  ;;  %v827_v37 = vmax.f32 %v767_v31, 0.0 }
 0x10a   : > { %v523_v12 = vadd.f32 %v7271_v9, %v8579_v59  ;;  %v514_v13 = vpop.f32.mrb[5].mxu0  ;;  %846 = vst [vmem:[#allocation2 + $0x150] sm:$0xff] %v829_v33  ;;  %v8601_v44 = vpack.c.bf16 %v829_v33, %v828_v23 }
 0x10b   : > { %v515_v16 = vadd.f32 %v8579_v59, %v514_v13  ;;  %v7272_v17 = vpop.f32.mrb[6].mxu0  ;;  %844 = vst [vmem:[#allocation2 + $0x130] sm:$0xff] %v827_v37  ;;  %v7303_v51 = vpop.f32.mrb[4].mxu1  ;;  %v8612_v53 = vpack.c.bf16 %v827_v37, %v826_v30  ;;  %v8672_v30 = vld [vmem:[%s10613_s3 + $0xc8] sm:$0xff]  }
 0x10c   : > { %v567_v20 = vmax.f32 %v523_v12, 0.0  ;;  %v526_v21 = vadd.f32 %v7272_v17, %v8579_v59  ;;  %v517_v22 = vpop.f32.mrb[7].mxu0  ;;  %v8622_v62 = vadd.f32 %v7303_v51, %v8579_v59  ;;  %v779_v63 = vpop.f32.mrb[5].mxu1 }
 0x10d   : > { %v565_v26 = vmax.f32 %v515_v16, 0.0  ;;  %v518_v27 = vadd.f32 %v8579_v59, %v517_v22  ;;  %v863_v35 = vld [vmem:[#allocation2 + $0x47] sm:$0xff]  ;;  %v8627_v2 = vadd.f32 %v8579_v59, %v779_v63  ;;  %v7304_v3 = vpop.f32.mrb[6].mxu1 }
 0x10e   : > { %584 = vst [vmem:[#allocation2 + $0x88] sm:$0xff] %v567_v20  ;;  %v568_v32 = vmax.f32 %v526_v21, 0.0  ;;  %v861_v39 = vld [vmem:[#allocation2 + $0x27] sm:$0xff]  ;;  %v10622_v7 = vmax.f32 %v8622_v62, 0.0  ;;  %v8632_v9 = vadd.f32 %v7304_v3, %v8579_v59  ;;  %v782_v10 = vpop.f32.mrb[7].mxu1 }
 0x10f   : > { %582 = vst [vmem:[#allocation2 + $0x68] sm:$0xff] %v565_v26  ;;  %v566_v34 = vmax.f32 %v518_v27, 0.0  ;;  %v864_v36 = vld [vmem:[#allocation2 + $0x4f] sm:$0xff]  ;;  %v10625_v15 = vmax.f32 %v8627_v2, 0.0  ;;  %v8644_v16 = vadd.f32 %v8579_v59, %v782_v10 }
 0x110   : > { %585 = vst [vmem:[#allocation2 + $0x90] sm:$0xff] %v568_v32  ;;  %v8597_v38 = vpack.c.bf16 %v864_v36, %v863_v35  ;;  %v862_v40 = vld [vmem:[#allocation2 + $0x2f] sm:$0xff]  ;;  %v8599_v42 = vpack.c.bf16 %v568_v32, %v567_v20  ;;  %849 = vst [vmem:[#allocation2 + $0x188] sm:$0xff] %v10622_v7  ;;  %v10621_v19 = vmax.f32 %v8632_v9, 0.0 }
 0x111   : > { %583 = vst [vmem:[#allocation2 + $0x70] sm:$0xff] %v566_v34  ;;  %v7275_v45 = vpop.f32.mrb[8].mxu0  ;;  %v8603_v47 = vpack.c.bf16 %v862_v40, %v861_v39  ;;  %v8610_v50 = vpack.c.bf16 %v566_v34, %v565_v26  ;;  %847 = vst [vmem:[#allocation2 + $0x168] sm:$0xff] %v10625_v15  ;;  %v10624_v22 = vmax.f32 %v8644_v16, 0.0  ;;  %v8686_v36 = vld [vmem:[%s10613_s3 + $0x110] sm:$0xff]  }
 0x112   : > { %v539_v54 = vadd.f32 %v7275_v45, %v8579_v59  ;;  %v530_v60 = vpop.f32.mrb[9].mxu0  ;;  %7329 = vmatprep.mubr.bf16.mxu0 %v8597_v38  ;;  %850 = vst [vmem:[#allocation2 + $0x190] sm:$0xff] %v10621_v19  ;;  %v8696_v45 = vld [vmem:[%s10613_s3 + $0x158] sm:$0xff]  }
 0x113   : > { %v531_v0 = vadd.f32 %v8579_v59, %v530_v60  ;;  %v7276_v1 = vpop.f32.mrb[10].mxu0  ;;  %1210 = vmatprep.mubr.bf16.mxu1 %v8603_v47  ;;  %848 = vst [vmem:[#allocation2 + $0x170] sm:$0xff] %v10624_v22  ;;  %v7307_v32 = vpop.f32.mrb[8].mxu1  ;;  %10651 = vst [vmem:[#allocation3_spill] sm:$0xff] %v8696_v45 }
 0x114   : > { %v571_v4 = vmax.f32 %v539_v54, 0.0  ;;  %v542_v5 = vadd.f32 %v7276_v1, %v8579_v59  ;;  %v533_v6 = vpop.f32.mrb[11].mxu0  ;;  %1211 = vmatmul.mubr.bf16.vlgmr.msra.gmra.mrb[16].mxu1 %v879_v41  ;;  %v8689_v37 = vadd.f32 %v7307_v32, %v8579_v59  ;;  %v795_v39 = vpop.f32.mrb[9].mxu1  ;;  %v8707_v1 = vld [vmem:[%s10613_s3 + $0x88] sm:$0xff]  }
 0x115   : > { %v569_v12 = vmax.f32 %v531_v0, 0.0  ;;  %v534_v13 = vadd.f32 %v8579_v59, %v533_v6  ;;  %1218 = vmatprep.mubr.bf16.mxu1 %v8597_v38  ;;  %6418 = vmatpush3.bf16.msra.mxu1 %v8608_v48  ;;  %v867_v29 = vld [vmem:[#allocation2 + $0x87] sm:$0xff]  ;;  %v8699_v51 = vadd.f32 %v8579_v59, %v795_v39  ;;  %v7308_v54 = vpop.f32.mrb[10].mxu1 }
 0x116   : > { %588 = vst [vmem:[#allocation2 + $0xc8] sm:$0xff] %v571_v4  ;;  %v572_v17 = vmax.f32 %v542_v5, 0.0  ;;  %6419 = vmatprep.subr.bf16.mxu1 %v8619_v61  ;;  %v865_v23 = vld [vmem:[#allocation2 + $0x67] sm:$0xff]  ;;  %v10618_v3 = vmax.f32 %v8689_v37, 0.0  ;;  %v798_v5 = vpop.f32.mrb[11].mxu1 }
 0x117   : > { %586 = vst [vmem:[#allocation2 + $0xa8] sm:$0xff] %v569_v12  ;;  %v570_v20 = vmax.f32 %v534_v13, 0.0  ;;  %v868_v21 = vld [vmem:[#allocation2 + $0x8f] sm:$0xff]  ;;  %v10620_v13 = vmax.f32 %v8699_v51, 0.0 }
 0x118   : > { %589 = vst [vmem:[#allocation2 + $0xd0] sm:$0xff] %v572_v17  ;;  %v866_v24 = vld [vmem:[#allocation2 + $0x6f] sm:$0xff]  ;;  %v8663_v26 = vpack.c.bf16 %v572_v17, %v571_v4  ;;  %v8680_v35 = vpack.c.bf16 %v868_v21, %v867_v29  ;;  %v8711_v4 = vadd.f32 %v7308_v54, %v8579_v59  ;;  %v8723_v17 = vadd.f32 %v8579_v59, %v798_v5  ;;  %v8764_v54 = vld [vmem:[%s10613_s3 + $0xd8] sm:$0xff]   ;;  %v8776_v5 = vld [vmem:[%s10613_s3 + $0x120] sm:$0xff]  }
 0x119   : > { %587 = vst [vmem:[#allocation2 + $0xb0] sm:$0xff] %v570_v20  ;;  %v7279_v27 = vpop.f32.mrb[12].mxu0  ;;  %v8667_v28 = vpack.c.bf16 %v866_v24, %v865_v23  ;;  %6420 = vmatpush3.bf16.msra.mxu1 %v8640_v14  ;;  %v8675_v31 = vpack.c.bf16 %v570_v20, %v569_v12  ;;  %v8719_v12 = vld [vmem:[%s10613_s3 + $0xd0] sm:$0xff]   ;;  %853 = vst [vmem:[#allocation2 + $0x1c8] sm:$0xff] %v10618_v3 }
 0x11a   : > { %v555_v33 = vadd.f32 %v7279_v27, %v8579_v59  ;;  %v546_v34 = vpop.f32.mrb[13].mxu0  ;;  %6421 = vmatprep.subr.bf16.mxu1 %v8650_v18  ;;  %v10617_v21 = vmax.f32 %v8711_v4, 0.0  ;;  %v8741_v27 = vld [vmem:[%s10613_s3 + $0x160] sm:$0xff]   ;;  %851 = vst [vmem:[#allocation2 + $0x1a8] sm:$0xff] %v10620_v13  ;;  %v10619_v29 = vmax.f32 %v8723_v17, 0.0  ;;  %10654 = vst [vmem:[#allocation6_spill] sm:$0xff] %v8776_v5 }
 0x11b   : > { %v547_v40 = vadd.f32 %v8579_v59, %v546_v34  ;;  %v7280_v41 = vpop.f32.mrb[14].mxu0  ;;  %7330 = vmatmul.mubr.bf16.vlgmr.msra.gmra.mrb[16].mxu0 %v8667_v28  ;;  %10653 = vst [vmem:[#allocation5_spill] sm:$0xff] %v8741_v27  ;;  %v8751_v34 = vld [vmem:[%s10613_s3 + $0x90] sm:$0xff]  }
 0x11c   : > { %v575_v60 = vmax.f32 %v555_v33, 0.0  ;;  %v558_v63 = vadd.f32 %v7280_v41, %v8579_v59  ;;  %6338 = vmatpush3.bf16.msra.mxu0 %v8661_v25  ;;  %v549_v0 = vpop.f32.mrb[15].mxu0  ;;  %7333 = vmatprep.mubr.bf16.mxu0 %v8680_v35  ;;  %854 = vst [vmem:[#allocation2 + $0x1d0] sm:$0xff] %v10617_v21  ;;  %852 = vst [vmem:[#allocation2 + $0x1b0] sm:$0xff] %v10619_v29 }
 0x11d   : > { %v573_v6 = vmax.f32 %v547_v40, 0.0  ;;  %v550_v10 = vadd.f32 %v8579_v59, %v549_v0  ;;  %1219 = vmatmul.mubr.bf16.gmra.mrb[20].mxu1 %v8603_v47  ;;  %6339 = vmatprep.subr.bf16.mxu0 %v8672_v30  ;;  %v8732_v47 = vld [vmem:[%s10613_s3 + $0x118] sm:$0xff]   ;;  %v871_v41 = vld [vmem:[#allocation2 + $0xc7] sm:$0xff] }
 0x11e   : > { %592 = vst [vmem:[#allocation2 + $0x108] sm:$0xff] %v575_v60  ;;  %v8725_v20 = vmax.f32 %v558_v63, 0.0  ;;  %1226 = vmatprep.mubr.bf16.mxu1 %v8667_v28  ;;  %6422 = vmatpush3.bf16.msra.mxu1 %v8686_v36  ;;  %10652 = vst [vmem:[#allocation4_spill] sm:$0xff] %v8732_v47  ;;  %v869_v32 = vld [vmem:[#allocation2 + $0xa7] sm:$0xff] }
 0x11f   : > { %590 = vst [vmem:[#allocation2 + $0xe8] sm:$0xff] %v573_v6  ;;  %v574_v23 = vmax.f32 %v550_v10, 0.0  ;;  %v872_v24 = vld [vmem:[#allocation2 + $0xcf] sm:$0xff]  ;;  %6423 = vmatprep.subr.bf16.mxu1 %v8696_v45 }
 0x120   : > { %593 = vst [vmem:[#allocation2 + $0x110] sm:$0xff] %v8725_v20  ;;  %6340 = vmatpush3.bf16.msra.mxu0 %v8707_v1  ;;  %v870_v33 = vld [vmem:[#allocation2 + $0xaf] sm:$0xff]  ;;  %v8754_v39 = vpack.c.bf16 %v8725_v20, %v575_v60  ;;  %v7311_v60 = vpop.f32.mrb[12].mxu1  ;;  %v8770_v0 = vpack.c.bf16 %v872_v24, %v871_v41 }
 0x121   : > { %591 = vst [vmem:[#allocation2 + $0xf0] sm:$0xff] %v574_v23  ;;  %6341 = vmatprep.subr.bf16.mxu0 %v8719_v12  ;;  %v8759_v40 = vpack.c.bf16 %v870_v33, %v869_v32  ;;  %v8766_v63 = vpack.c.bf16 %v574_v23, %v573_v6  ;;  %v8779_v10 = vadd.f32 %v7311_v60, %v8579_v59  ;;  %v811_v32 = vpop.f32.mrb[13].mxu1  ;;  %v8786_v6 = vld [vmem:[%s10613_s3 + $0x168] sm:$0xff]   ;;  %v8796_v33 = vld [vmem:[%s10613_s3 + $0x98] sm:$0xff]  }
 0x122   : > { %6424 = vmatpush3.bf16.msra.mxu1 %v8732_v47  ;;  %10655 = vst [vmem:[#allocation7_spill] sm:$0xff] %v8786_v6  ;;  %v8789_v23 = vadd.f32 %v8579_v59, %v811_v32  ;;  %v7312_v24 = vpop.f32.mrb[14].mxu1  ;;  %v8807_v32 = vld [vmem:[%s10613_s3 + $0xe0] sm:$0xff]   ;;  %v10664_v47 = vmax.f32 %v8632_v9, 0.0  ;;  %v8924_v9 = vld [vmem:[%s10613_s3 + $0xb8] sm:$0xff]  }
 0x123   : > { %7334 = vmatmul.mubr.bf16.gmra.mrb[20].mxu0 %v8759_v40  ;;  %6425 = vmatprep.subr.bf16.mxu1 %v8741_v27  ;;  %v10623_v41 = vmax.f32 %v8779_v10, 0.0  ;;  %v8800_v60 = vadd.f32 %v7312_v24, %v8579_v59  ;;  %v814_v21 = vpop.f32.mrb[15].mxu1  ;;  %v10663_v27 = vmax.f32 %v8622_v62, 0.0  ;;  %v8916_v62 = vld [vmem:[%s10614_s4] sm:$0xff]  }
 0x124   : > { %6342 = vmatpush3.bf16.msra.mxu0 %v8751_v34  ;;  %7337 = vmatprep.mubr.bf16.mxu0 %v8770_v0  ;;  %v10626_v3 = vmax.f32 %v8789_v23, 0.0  ;;  %v8811_v29 = vadd.f32 %v8579_v59, %v814_v21  ;;  %v8827_v59 = vld [vmem:[%s10613_s3 + $0x170] sm:$0xff]  }
 0x125   : > { %1227 = vmatmul.mubr.bf16.gmra.mrb[24].mxu1 %v8597_v38  ;;  %6343 = vmatprep.subr.bf16.mxu0 %v8764_v54  ;;  %v8818_v38 = vld [vmem:[%s10613_s3 + $0x128] sm:$0xff]   ;;  %857 = vst [vmem:[#allocation2 + $0x208] sm:$0xff] %v10623_v41  ;;  %v10628_v24 = vmax.f32 %v8800_v60, 0.0  ;;  %10657 = vst [vmem:[#allocation9_spill] sm:$0xff] %v8827_v59  ;;  %v8836_v41 = vld [vmem:[%s10613_s3 + $0xa0] sm:$0xff]   ;;  %v8895_v45 = vpack.c.bf16 %v10664_v47, %v10663_v27 }
 0x126   : > { %1234 = vmatprep.mubr.bf16.mxu1 %v8680_v35  ;;  %6426 = vmatpush3.bf16.msra.mxu1 %v8776_v5  ;;  %10656 = vst [vmem:[#allocation8_spill] sm:$0xff] %v8818_v38  ;;  %855 = vst [vmem:[#allocation2 + $0x1e8] sm:$0xff] %v10626_v3  ;;  %v839_v21 = vmax.f32 %v8811_v29, 0.0  ;;  %v873_v19 = vld [vmem:[#allocation2 + $0xe7] sm:$0xff] }
 0x127   : > { %v876_v13 = vld [vmem:[#allocation2 + $0x10f] sm:$0xff]  ;;  %6427 = vmatprep.subr.bf16.mxu1 %v8786_v6  ;;  %858 = vst [vmem:[#allocation2 + $0x210] sm:$0xff] %v10628_v24  ;;  %v875_v15 = vld [vmem:[#allocation2 + $0x107] sm:$0xff] }
 0x128   : > { %6344 = vmatpush3.bf16.msra.mxu0 %v8796_v33  ;;  %v874_v7 = vld [vmem:[#allocation2 + $0xef] sm:$0xff]  ;;  %856 = vst [vmem:[#allocation2 + $0x1f0] sm:$0xff] %v839_v21  ;;  %v8848_v3 = vpack.c.bf16 %v876_v13, %v875_v15  ;;  %v877_v13 = vld [vmem:[#allocation2 + $0x127] sm:$0xff] }
 0x129   : > { %6345 = vmatprep.subr.bf16.mxu0 %v8807_v32  ;;  %v8841_v22 = vpack.c.bf16 %v874_v7, %v873_v19  ;;  %v8846_v29 = vld [vmem:[%s10613_s3 + $0xe8] sm:$0xff]   ;;  %v8854_v6 = vld [vmem:[%s10613_s3 + $0x130] sm:$0xff]   ;;  %v8861_v7 = vld [vmem:[%s10613_s3 + $0x178] sm:$0xff]  }
 0x12a   : > { %6428 = vmatpush3.bf16.msra.mxu1 %v8818_v38  ;;  %10658 = vst [vmem:[#allocation10_spill] sm:$0xff] %v8854_v6  ;;  %10659 = vst [vmem:[#allocation11_spill] sm:$0xff] %v8861_v7  ;;  %v8868_v15 = vld [vmem:[%s10613_s3 + $0xa8] sm:$0xff]   ;;  %v8875_v19 = vld [vmem:[%s10613_s3 + $0xf0] sm:$0xff]   ;;  %v10662_v38 = vmax.f32 %v8644_v16, 0.0 }
 0x12b   : > { %7338 = vmatmul.mubr.bf16.gmra.mrb[24].mxu0 %v8841_v22  ;;  %6429 = vmatprep.subr.bf16.mxu1 %v8827_v59  ;;  %v878_v24 = vld [vmem:[#allocation2 + $0x12f] sm:$0xff]  ;;  %v8882_v59 = vld [vmem:[%s10613_s3 + $0x138] sm:$0xff]   ;;  %v8931_v47 = vld [vmem:[%s10614_s4 + $0x40] sm:$0xff]  }
 0x12c   : > { %6346 = vmatpush3.bf16.msra.mxu0 %v8836_v41  ;;  %7341 = vmatprep.mubr.bf16.mxu0 %v8848_v3  ;;  %10660 = vst [vmem:[#allocation12_spill] sm:$0xff] %v8882_v59  ;;  %v8909_v16 = vld [vmem:[%s10613_s3 + $0xf8] sm:$0xff]   ;;  %v8299_v27 = vld [vmem:[#allocation2] sm:$0xff] }
 0x12d   : > { %1235 = vmatmul.mubr.bf16.gmra.mrb[28].mxu1 %v8667_v28  ;;  %6347 = vmatprep.subr.bf16.mxu0 %v8846_v29  ;;  %v10661_v28 = vmax.f32 %v8627_v2, 0.0  ;;  %v8904_v2 = vpack.c.bf16 %v878_v24, %v877_v13  ;;  %v10665_v24 = vmax.f32 %v8699_v51, 0.0  ;;  %v10666_v13 = vmax.f32 %v8723_v17, 0.0 }
 0x12e   : > { %1242 = vmatprep.mubr.bf16.mxu1 %v8759_v40  ;;  %6430 = vmatpush3.bf16.msra.mxu1 %v8854_v6  ;;  %v8901_v6 = vld [vmem:[%s10613_s3 + $0xb0] sm:$0xff]   ;;  %v10669_v51 = vmax.f32 %v8789_v23, 0.0  ;;  %v10670_v17 = vmax.f32 %v8779_v10, 0.0  ;;  %v8991_v10 = vld [vmem:[%s10614_s4 + $0x60] sm:$0xff]  }
 0x12f   : > { %6431 = vmatprep.subr.bf16.mxu1 %v8861_v7  ;;  %v8889_v5 = vpack.c.bf16 %v10662_v38, %v10661_v28  ;;  %v8934_v38 = vpack.c.bf16 %v8299_v27, %v8299_v27  ;;  %v8940_v28 = vpack.c.bf16 %v10666_v13, %v10665_v24  ;;  %v8953_v27 = vld [vmem:[%s10614_s4 + $0x48] sm:$0xff]  }
 0x130   : > { %6348 = vmatpush3.bf16.msra.mxu0 %v8868_v15  ;;  %v1727_v23 = vld [vmem:[#allocation2 + $0x29] sm:$0xff] }
 0x131   : > { %6349 = vmatprep.subr.bf16.mxu0 %v8875_v19  ;;  %v1725_v13 = vld [vmem:[#allocation2 + $0x9] sm:$0xff] }
 0x132   : > { %6432 = vmatpush3.bf16.msra.mxu1 %v8882_v59  ;;  %v10668_v59 = vmax.f32 %v8711_v4, 0.0  ;;  %v8968_v4 = vpack.c.bf16 %v839_v21, %v10669_v51  ;;  %v9009_v21 = vld [vmem:[%s10614_s4 + $0x70] sm:$0xff]  }
 0x133   : > { %7342 = vmatmul.mubr.bf16.gmra.mrb[28].mxu0 %v8904_v2  ;;  %7409 = vmatprep.subr.bf16.mxu1 %v8916_v62 }
 0x134   : > { %6350 = vmatpush3.bf16.msra.mxu0 %v8901_v6  ;;  %1466 = vmatprep.mubr.bf16.mxu0 %v8587_v11 }
 0x135   : > { %1243 = vmatmul.mubr.bf16.gmra.mrb[32].mxu1 %v8680_v35  ;;  %6351 = vmatprep.subr.bf16.mxu0 %v8909_v16  ;;  %v10667_v35 = vmax.f32 %v8689_v37, 0.0  ;;  %v8963_v37 = vld [vmem:[%s10614_s4 + $0x50] sm:$0xff]  }
 0x136   : > { %1250 = vmatprep.mubr.bf16.mxu1 %v8770_v0 }
 0x137   : > { %v8946_v7 = vpack.c.bf16 %v10668_v59, %v10667_v35  ;;  %v10671_v59 = vmax.f32 %v8800_v60, 0.0  ;;  %v1728_v60 = vld [vmem:[#allocation2 + $0x31] sm:$0xff] }
 0x138   : > { %6352 = vmatpush3.bf16.msra.mxu0 %v8924_v9  ;;  %v1726_v35 = vld [vmem:[#allocation2 + $0x11] sm:$0xff] }
 0x139   : > { %7345 = vmatprep.subr.bf16.mxu0 %v8931_v47  ;;  %v8974_v24 = vpack.c.bf16 %v10671_v59, %v10670_v17  ;;  %v1745_v51 = vpack.c.bf16 %v1726_v35, %v1725_v13  ;;  %v1729_v17 = vld [vmem:[#allocation2 + $0x49] sm:$0xff]  ;;  %v1730_v59 = vld [vmem:[#allocation2 + $0x51] sm:$0xff] }
 0x13a   : > { %v8300_v13 = vld [vmem:[%s10614_s4 + $0x8] sm:$0xff]  }
 0x13b   : > { %1467 = vmatmul.mubr.bf16.vlgmr.msra.gmra.mrb[32].mxu0 %v8934_v38  ;;  %v1731_v35 = vld [vmem:[#allocation2 + $0x69] sm:$0xff] }
 0x13c   : > { %7346 = vmatpush3.bf16.msra.mxu0 %v8931_v47  ;;  %1474 = vmatprep.mubr.bf16.mxu0 %v8585_v8 }
 0x13d   : > { %1251 = vmatmul.mubr.bf16.gmra.mrb[36].mxu1 %v8759_v40  ;;  %7347 = vmatprep.subr.bf16.mxu0 %v8953_v27  ;;  %v8981_v40 = vld [vmem:[%s10614_s4 + $0x58] sm:$0xff]  }
 0x13e   : > { %1258 = vmatprep.mubr.bf16.mxu1 %v8841_v22 }
 0x140   : > { %7348 = vmatpush3.bf16.msra.mxu0 %v8953_v27 }
 0x141   : > { %7349 = vmatprep.subr.bf16.mxu0 %v8963_v37 }
 0x143   : > { %1475 = vmatmul.mubr.bf16.gmra.mrb[36].mxu0 %v8587_v11  ;;  %v8999_v11 = vld [vmem:[%s10614_s4 + $0x68] sm:$0xff]  }
 0x144   : > { %1482 = vmatprep.mubr.bf16.mxu0 %v8610_v50  ;;  %7350 = vmatpush3.bf16.msra.mxu0 %v8963_v37 }
 0x145   : > { %1259 = vmatmul.mubr.bf16.gmra.mrb[40].mxu1 %v8770_v0  ;;  %7351 = vmatprep.subr.bf16.mxu0 %v8981_v40  ;;  %v1746_v0 = vpack.c.bf16 %v1728_v60, %v1727_v23  ;;  %v9020_v23 = vpack.c.bf16 %v1730_v59, %v1729_v17  ;;  %v9027_v60 = vld [vmem:[%s10614_s4 + $0x80] sm:$0xff]   ;;  %v1734_v59 = vld [vmem:[#allocation2 + $0x91] sm:$0xff] }
 0x146   : > { %1266 = vmatprep.mubr.bf16.mxu1 %v8848_v3 }
 0x148   : > { %7352 = vmatpush3.bf16.msra.mxu0 %v8981_v40 }
 0x149   : > { %7353 = vmatprep.subr.bf16.mxu0 %v8991_v10 }
 0x14b   : > { %1483 = vmatmul.mubr.bf16.gmra.mrb[40].mxu0 %v8585_v8 }
 0x14c   : > { %1490 = vmatprep.mubr.bf16.mxu0 %v8599_v42  ;;  %7354 = vmatpush3.bf16.msra.mxu0 %v8991_v10 }
 0x14d   : > { %1267 = vmatmul.mubr.bf16.gmra.mrb[44].mxu1 %v8841_v22  ;;  %7355 = vmatprep.subr.bf16.mxu0 %v8999_v11  ;;  %v9016_v22 = vld [vmem:[%s10614_s4 + $0x78] sm:$0xff]  }
 0x14e   : > { %1916 = vmatprep.mubr.bf16.mxu1 %v1746_v0 }
 0x150   : > { %7356 = vmatpush3.bf16.msra.mxu0 %v8999_v11 }
 0x151   : > { %7357 = vmatprep.subr.bf16.mxu0 %v9009_v21 }
 0x153   : > { %1491 = vmatmul.mubr.bf16.gmra.mrb[44].mxu0 %v8610_v50 }
 0x154   : > { %1498 = vmatprep.mubr.bf16.mxu0 %v8675_v31  ;;  %7358 = vmatpush3.bf16.msra.mxu0 %v9009_v21 }
 0x155   : > { %1917 = vmatmul.mubr.bf16.vlgmr.msra.gmra.mrb[48].mxu1 %v1745_v51  ;;  %7359 = vmatprep.subr.bf16.mxu0 %v9016_v22  ;;  %v1732_v51 = vld [vmem:[#allocation2 + $0x71] sm:$0xff] }
 0x156   : > { %1924 = vmatprep.mubr.bf16.mxu1 %v9020_v23  ;;  %7410 = vmatpush3.bf16.msra.mxu1 %v8916_v62  ;;  %v9039_v17 = vpack.c.bf16 %v1732_v51, %v1731_v35  ;;  %v1733_v62 = vld [vmem:[#allocation2 + $0x89] sm:$0xff]  ;;  %v1738_v35 = vld [vmem:[#allocation2 + $0xd1] sm:$0xff] }
 0x157   : > { %7411 = vmatprep.subr.bf16.mxu1 %v8300_v13  ;;  %v1739_v51 = vld [vmem:[#allocation2 + $0xe9] sm:$0xff] }
 0x158   : > { %7360 = vmatpush3.bf16.msra.mxu0 %v9016_v22 }
 0x159   : > { %7377 = vmatprep.subr.bf16.mxu0 %v9027_v60 }
 0x15a   : > { %7412 = vmatpush3.bf16.msra.mxu1 %v8300_v13  ;;  %v9048_v13 = vpack.c.bf16 %v1734_v59, %v1733_v62  ;;  %v9075_v62 = vld [vmem:[%s10614_s4 + $0x88] sm:$0xff]  }
 0x15b   : > { %1499 = vmatmul.mubr.bf16.gmra.mrb[48].mxu0 %v8599_v42  ;;  %7413 = vmatprep.subr.bf16.mxu1 %v8501_v43 }
 0x15c   : > { %1506 = vmatprep.mubr.bf16.mxu0 %v8663_v26 }
 0x15d   : > { %1925 = vmatmul.mubr.bf16.gmra.mrb[52].mxu1 %v1746_v0  ;;  %v1736_v0 = vld [vmem:[#allocation2 + $0xb1] sm:$0xff] }
 0x15e   : > { %1932 = vmatprep.mubr.bf16.mxu1 %v9039_v17  ;;  %7414 = vmatpush3.bf16.msra.mxu1 %v8501_v43  ;;  %v1735_v43 = vld [vmem:[#allocation2 + $0xa9] sm:$0xff] }
 0x15f   : > { %7415 = vmatprep.subr.bf16.mxu1 %v8514_v46 }
 0x162   : > { %7416 = vmatpush3.bf16.msra.mxu1 %v8514_v46  ;;  %v9058_v46 = vpack.c.bf16 %v1736_v0, %v1735_v43  ;;  %v9107_v43 = vld [vmem:[%s10614_s4 + $0xa0] sm:$0xff]   ;;  %v2242_v0 = vld [vmem:[#allocation2 + $0x14f] sm:$0xff] }
 0x163   : > { %1507 = vmatmul.mubr.bf16.gmra.mrb[52].mxu0 %v8675_v31  ;;  %7417 = vmatprep.subr.bf16.mxu1 %v8527_v49 }
 0x164   : > { %1514 = vmatprep.mubr.bf16.mxu0 %v8766_v63 }
 0x165   : > { %1933 = vmatmul.mubr.bf16.gmra.mrb[56].mxu1 %v9020_v23 }
 0x166   : > { %1940 = vmatprep.mubr.bf16.mxu1 %v9048_v13  ;;  %7418 = vmatpush3.bf16.msra.mxu1 %v8527_v49  ;;  %v1737_v49 = vld [vmem:[#allocation2 + $0xc9] sm:$0xff] }
 0x167   : > { %7419 = vmatprep.subr.bf16.mxu1 %v8540_v52 }
 0x16a   : > { %7420 = vmatpush3.bf16.msra.mxu1 %v8540_v52  ;;  %v9068_v52 = vpack.c.bf16 %v1738_v35, %v1737_v49  ;;  %v9127_v35 = vld [vmem:[%s10614_s4 + $0xb0] sm:$0xff]  }
 0x16b   : > { %1515 = vmatmul.mubr.bf16.gmra.mrb[56].mxu0 %v8663_v26  ;;  %7421 = vmatprep.subr.bf16.mxu1 %v8553_v55 }
 0x16c   : > { %1522 = vmatprep.mubr.bf16.mxu0 %v8754_v39 }
 0x16d   : > { %1941 = vmatmul.mubr.bf16.gmra.mrb[60].mxu1 %v9039_v17 }
 0x16e   : > { %1948 = vmatprep.mubr.bf16.mxu1 %v9058_v46  ;;  %7422 = vmatpush3.bf16.msra.mxu1 %v8553_v55  ;;  %v1740_v55 = vld [vmem:[#allocation2 + $0xf1] sm:$0xff] }
 0x16f   : > { %7423 = vmatprep.subr.bf16.mxu1 %v8560_v56 }
 0x172   : > { %7424 = vmatpush3.bf16.msra.mxu1 %v8560_v56  ;;  %v9080_v56 = vpack.c.bf16 %v1740_v55, %v1739_v51  ;;  %v2243_v51 = vld [vmem:[#allocation2 + $0x167] sm:$0xff]  ;;  %v2244_v55 = vld [vmem:[#allocation2 + $0x16f] sm:$0xff] }
 0x173   : > { %1523 = vmatmul.mubr.bf16.gmra.mrb[60].mxu0 %v8766_v63  ;;  %6577 = vmatprep.subr.bf16.mxu1 %v8567_v57  ;;  %v9087_v57 = vld [vmem:[%s10614_s4 + $0x90] sm:$0xff]  }
 0x174   : > { %7361 = vmatprep.mubr.bf16.mxu0 %v8585_v8  ;;  %v1741_v8 = vld [vmem:[#allocation2 + $0x109] sm:$0xff] }
 0x175   : > { %1949 = vmatmul.mubr.bf16.gmra.mrb[64].mxu1 %v9048_v13 }
 0x176   : > { %1956 = vmatprep.mubr.bf16.mxu1 %v9068_v52 }
 0x17b   : > { %7362 = vmatmul.mubr.bf16.vlgmr.msra.gmra.mrb[16].mxu0 %v8610_v50  ;;  %v1742_v50 = vld [vmem:[#allocation2 + $0x111] sm:$0xff] }
 0x17c   : > { %7378 = vmatpush3.bf16.msra.mxu0 %v9027_v60  ;;  %7365 = vmatprep.mubr.bf16.mxu0 %v8599_v42  ;;  %v9095_v42 = vld [vmem:[%s10614_s4 + $0x98] sm:$0xff]   ;;  %v9100_v59 = vpack.c.bf16 %v1742_v50, %v1741_v8  ;;  %v2246_v8 = vld [vmem:[#allocation2 + $0x18f] sm:$0xff] }
 0x17d   : > { %1957 = vmatmul.mubr.bf16.gmra.mrb[68].mxu1 %v9058_v46  ;;  %7379 = vmatprep.subr.bf16.mxu0 %v9075_v62  ;;  %v9137_v50 = vld [vmem:[%s10614_s4 + $0xb8] sm:$0xff]  }
 0x17e   : > { %1964 = vmatprep.mubr.bf16.mxu1 %v9080_v56 }
 0x180   : > { %7380 = vmatpush3.bf16.msra.mxu0 %v9075_v62 }
 0x181   : > { %7381 = vmatprep.subr.bf16.mxu0 %v9087_v57 }
 0x183   : > { %7366 = vmatmul.mubr.bf16.gmra.mrb[20].mxu0 %v8675_v31  ;;  %v2241_v31 = vld [vmem:[#allocation2 + $0x147] sm:$0xff] }
 0x184   : > { %7382 = vmatpush3.bf16.msra.mxu0 %v9087_v57  ;;  %7369 = vmatprep.mubr.bf16.mxu0 %v8663_v26  ;;  %v9115_v26 = vld [vmem:[%s10614_s4 + $0xa8] sm:$0xff]   ;;  %v9120_v49 = vpack.c.bf16 %v2242_v0, %v2241_v31 }
 0x185   : > { %1965 = vmatmul.mubr.bf16.gmra.mrb[72].mxu1 %v9068_v52  ;;  %7383 = vmatprep.subr.bf16.mxu0 %v9095_v42  ;;  %v2247_v0 = vld [vmem:[#allocation2 + $0x1a7] sm:$0xff] }
 0x186   : > { %1972 = vmatprep.mubr.bf16.mxu1 %v9100_v59 }
 0x188   : > { %7384 = vmatpush3.bf16.msra.mxu0 %v9095_v42 }
 0x189   : > { %7385 = vmatprep.subr.bf16.mxu0 %v9107_v43 }
 0x18b   : > { %7370 = vmatmul.mubr.bf16.gmra.mrb[24].mxu0 %v8766_v63  ;;  %v2245_v63 = vld [vmem:[#allocation2 + $0x187] sm:$0xff] }
 0x18c   : > { %7386 = vmatpush3.bf16.msra.mxu0 %v9107_v43  ;;  %7373 = vmatprep.mubr.bf16.mxu0 %v8754_v39  ;;  %v9132_v39 = vpack.c.bf16 %v2244_v55, %v2243_v51  ;;  %v9139_v31 = vpack.c.bf16 %v2246_v8, %v2245_v63  ;;  %v2248_v51 = vld [vmem:[#allocation2 + $0x1af] sm:$0xff]  ;;  %v2249_v55 = vld [vmem:[#allocation2 + $0x1c7] sm:$0xff] }
 0x18d   : > { %1973 = vmatmul.mubr.bf16.gmra.mrb[76].mxu1 %v9080_v56  ;;  %7387 = vmatprep.subr.bf16.mxu0 %v9115_v26  ;;  %v2250_v63 = vld [vmem:[#allocation2 + $0x1cf] sm:$0xff]  ;;  %v9153_v8 = vpack.c.bf16 %v2248_v51, %v2247_v0 }
 0x18e   : > { %7425 = vmatprep.mubr.bf16.mxu1 %v9120_v49  ;;  %v8303_v0 = vld [vmem:[%s10613_s3 + $0x48] sm:$0xff]  }
 0x18f   : > { %v2254_v51 = vld [vmem:[#allocation2 + $0x20f] sm:$0xff] }
 0x190   : > { %7388 = vmatpush3.bf16.msra.mxu0 %v9115_v26 }
 0x191   : > { %7389 = vmatprep.subr.bf16.mxu0 %v9127_v35 }
 0x193   : > { %7374 = vmatmul.mubr.bf16.gmra.mrb[28].mxu0 %v8612_v53 }
 0x194   : > { %7390 = vmatpush3.bf16.msra.mxu0 %v9127_v35  ;;  %7393 = vmatprep.mubr.bf16.mxu0 %v9020_v23  ;;  %v8301_v23 = vld [vmem:[%s10613_s3 + $0x40] sm:$0xff]  }
 0x195   : > { %7426 = vmatmul.mubr.bf16.vlgmr.msra.gmra.mrb[80].mxu1 %v9132_v39  ;;  %7391 = vmatprep.subr.bf16.mxu0 %v9137_v50 }
 0x196   : > { %6578 = vmatpush3.bf16.msra.mxu1 %v8661_v25  ;;  %7429 = vmatprep.mubr.bf16.mxu1 %v9139_v31  ;;  %v9156_v25 = vpack.c.bf16 %v2250_v63, %v2249_v55  ;;  %v8305_v55 = vld [vmem:[%s10613_s3 + $0x50] sm:$0xff]  }
 0x197   : > { %6579 = vmatprep.subr.bf16.mxu1 %v8672_v30  ;;  %v8302_v30 = vld [vmem:[%s10613_s3] sm:$0xff]  }
 0x198   : > { %7392 = vmatpush3.bf16.msra.mxu0 %v9137_v50 }
 0x199   : > { %6513 = vmatprep.subr.bf16.mxu0 %v8301_v23  ;;  %v8307_v23 = vld [vmem:[%s10613_s3 + $0x58] sm:$0xff]  }
 0x19a   : > { %6580 = vmatpush3.bf16.msra.mxu1 %v8707_v1  ;;  %v2251_v1 = vld [vmem:[#allocation2 + $0x1e7] sm:$0xff] }
 0x19b   : > { %7394 = vmatmul.mubr.bf16.vlgmr.msra.gmra.mrb[16].mxu0 %v9039_v17  ;;  %6581 = vmatprep.subr.bf16.mxu1 %v8719_v12  ;;  %v2252_v12 = vld [vmem:[#allocation2 + $0x1ef] sm:$0xff]  ;;  %v2253_v17 = vld [vmem:[#allocation2 + $0x207] sm:$0xff] }
 0x19c   : > { %6514 = vmatpush3.bf16.msra.mxu0 %v8302_v30  ;;  %7397 = vmatprep.mubr.bf16.mxu0 %v9048_v13  ;;  %v8304_v13 = vld [vmem:[%s10613_s3 + $0x8] sm:$0xff]   ;;  %v9177_v63 = vpack.c.bf16 %v2252_v12, %v2251_v1  ;;  %v8313_v1 = vld [vmem:[%s10613_s3 + $0x70] sm:$0xff]  }
 0x19d   : > { %7430 = vmatmul.mubr.bf16.gmra.mrb[84].mxu1 %v9153_v8  ;;  %6515 = vmatprep.subr.bf16.mxu0 %v8303_v0  ;;  %v2461_v0 = vld [vmem:[#allocation2 + $0x108] sm:$0xff] }
 0x19e   : > { %6582 = vmatpush3.bf16.msra.mxu1 %v8751_v34  ;;  %7433 = vmatprep.mubr.bf16.mxu1 %v9156_v25  ;;  %v9180_v34 = vpack.c.bf16 %v2254_v51, %v2253_v17  ;;  %v8315_v17 = vld [vmem:[%s10613_s3 + $0x78] sm:$0xff]  }
 0x19f   : > { %6583 = vmatprep.subr.bf16.mxu1 %v8764_v54  ;;  %v8306_v54 = vld [vmem:[%s10613_s3 + $0x10] sm:$0xff]  }
 0x1a0   : > { %6516 = vmatpush3.bf16.msra.mxu0 %v8304_v13 }
 0x1a1   : > { %6517 = vmatprep.subr.bf16.mxu0 %v8305_v55 }
 0x1a2   : > { %6584 = vmatpush3.bf16.msra.mxu1 %v8796_v33  ;;  %v2255_v33 = vld [vmem:[#allocation2 + $0x227] sm:$0xff] }
 0x1a3   : > { %7398 = vmatmul.mubr.bf16.gmra.mrb[20].mxu0 %v9058_v46  ;;  %6585 = vmatprep.subr.bf16.mxu1 %v8807_v32  ;;  %v2256_v32 = vld [vmem:[#allocation2 + $0x22f] sm:$0xff]  ;;  %v8308_v46 = vld [vmem:[%s10613_s3 + $0x18] sm:$0xff]  }
 0x1a4   : > { %6518 = vmatpush3.bf16.msra.mxu0 %v8306_v54  ;;  %7401 = vmatprep.mubr.bf16.mxu0 %v9068_v52  ;;  %v8309_v52 = vld [vmem:[%s10613_s3 + $0x60] sm:$0xff]   ;;  %v2266_v30 = vpack.c.bf16 %v2256_v32, %v2255_v33 }
 0x1a5   : > { %7434 = vmatmul.mubr.bf16.gmra.mrb[88].mxu1 %v9177_v63  ;;  %6519 = vmatprep.subr.bf16.mxu0 %v8307_v23 }
 0x1a6   : > { %6586 = vmatpush3.bf16.msra.mxu1 %v8836_v41  ;;  %7437 = vmatprep.mubr.bf16.mxu1 %v9180_v34  ;;  %v8310_v41 = vld [vmem:[%s10613_s3 + $0x20] sm:$0xff]  }
 0x1a7   : > { %6587 = vmatprep.subr.bf16.mxu1 %v8846_v29  ;;  %v8311_v29 = vld [vmem:[%s10613_s3 + $0x68] sm:$0xff]  }
 0x1a8   : > { %6520 = vmatpush3.bf16.msra.mxu0 %v8308_v46 }
 0x1a9   : > { %6521 = vmatprep.subr.bf16.mxu0 %v8309_v52 }
 0x1aa   : > { %6588 = vmatpush3.bf16.msra.mxu1 %v8868_v15  ;;  %v1743_v15 = vld [vmem:[#allocation2 + $0x129] sm:$0xff] }
 0x1ab   : > { %7402 = vmatmul.mubr.bf16.gmra.mrb[24].mxu0 %v9080_v56  ;;  %6589 = vmatprep.subr.bf16.mxu1 %v8875_v19  ;;  %v1744_v56 = vld [vmem:[#allocation2 + $0x131] sm:$0xff]  ;;  %v8312_v19 = vld [vmem:[%s10613_s3 + $0x28] sm:$0xff]  }
 0x1ac   : > { %6522 = vmatpush3.bf16.msra.mxu0 %v8310_v41  ;;  %7405 = vmatprep.mubr.bf16.mxu0 %v9100_v59  ;;  %v9220_v12 = vpack.c.bf16 %v1744_v56, %v1743_v15  ;;  %v8198_v41 = vld [vmem:[%s10611_s1 + $0x20] sm:$0xff]  }
 0x1ad   : > { %7438 = vmatmul.mubr.bf16.gmra.mrb[92].mxu1 %v2266_v30  ;;  %6523 = vmatprep.subr.bf16.mxu0 %v8311_v29  ;;  %v2726_v29 = vld [vmem:[#allocation2 + $0x191] sm:$0xff] }
 0x1ae   : > { %6590 = vmatpush3.bf16.msra.mxu1 %v8901_v6  ;;  %2523 = vmatprep.mubr.bf16.mxu1 %v8612_v53  ;;  %v2481_v6 = vpack.c.bf16 %v8725_v20, %v2461_v0  ;;  %v8316_v20 = vld [vmem:[%s10613_s3 + $0x38] sm:$0xff]  }
 0x1af   : > { %6591 = vmatprep.subr.bf16.mxu1 %v8909_v16  ;;  %v8314_v16 = vld [vmem:[%s10613_s3 + $0x30] sm:$0xff]  }
 0x1b0   : > { %6524 = vmatpush3.bf16.msra.mxu0 %v8312_v19 }
 0x1b1   : > { %6525 = vmatprep.subr.bf16.mxu0 %v8313_v1 }
 0x1b2   : > { %6592 = vmatpush3.bf16.msra.mxu1 %v8924_v9  ;;  %v8194_v9 = vld [vmem:[%s10611_s1] sm:$0xff]  }
 0x1b3   : > { %7406 = vmatmul.mubr.bf16.gmra.mrb[28].mxu0 %v9220_v12  ;;  %7441 = vmatprep.subr.bf16.mxu1 %v8931_v47 }
 0x1b4   : > { %6526 = vmatpush3.bf16.msra.mxu0 %v8314_v16  ;;  %2396 = vmatprep.mubr.bf16.mxu0 %v8904_v2  ;;  %v2727_v16 = vld [vmem:[#allocation2 + $0x1a9] sm:$0xff] }
 0x1b5   : > { %2524 = vmatmul.mubr.bf16.vlgmr.msra.gmra.mrb[96].mxu1 %v2481_v6  ;;  %6527 = vmatprep.subr.bf16.mxu0 %v8315_v17  ;;  %v2728_v17 = vld [vmem:[#allocation2 + $0x1b1] sm:$0xff] }
 0x1b6   : > { %2531 = vmatprep.mubr.bf16.mxu1 %v8601_v44  ;;  %7442 = vmatpush3.bf16.msra.mxu1 %v8931_v47  ;;  %v10681_v47 = vld [vmem:[#allocation12_spill] sm:$0xff] }
 0x1b7   : > { %7443 = vmatprep.subr.bf16.mxu1 %v8953_v27 }
 0x1b8   : > { %6528 = vmatpush3.bf16.msra.mxu0 %v8316_v20  ;;  %v8202_v20 = vld [vmem:[%s10611_s1] sm:$0xff]  }
 0x1b9   : > { %6657 = vmatprep.subr.bf16.mxu0 %v8573_v58  ;;  %v10672_v58 = vld [vmem:[#allocation3_spill] sm:$0xff] }
 0x1ba   : > { %7444 = vmatpush3.bf16.msra.mxu1 %v8953_v27 }
 0x1bb   : > { %2397 = vmatmul.mubr.bf16.vlgmr.msra.gmra.mrb[64].mxu0 %v8848_v3  ;;  %7445 = vmatprep.subr.bf16.mxu1 %v8963_v37  ;;  %v10679_v3 = vld [vmem:[#allocation10_spill] sm:$0xff] }
 0x1bc   : > { %6658 = vmatpush3.bf16.msra.mxu0 %v8608_v48  ;;  %2404 = vmatprep.mubr.bf16.mxu0 %v9120_v49  ;;  %v10673_v48 = vld [vmem:[#allocation4_spill] sm:$0xff] }
 0x1bd   : > { %2532 = vmatmul.mubr.bf16.gmra.mrb[100].mxu1 %v8612_v53  ;;  %6659 = vmatprep.subr.bf16.mxu0 %v8619_v61  ;;  %v10674_v53 = vld [vmem:[#allocation5_spill] sm:$0xff]  ;;  %v10675_v61 = vld [vmem:[#allocation6_spill] sm:$0xff] }
 0x1be   : > { %2539 = vmatprep.mubr.bf16.mxu1 %v8889_v5  ;;  %7446 = vmatpush3.bf16.msra.mxu1 %v8963_v37 }
 0x1bf   : > { %7447 = vmatprep.subr.bf16.mxu1 %v8981_v40 }
 0x1c0   : > { %6660 = vmatpush3.bf16.msra.mxu0 %v8640_v14  ;;  %v10676_v14 = vld [vmem:[#allocation7_spill] sm:$0xff] }
 0x1c1   : > { %6661 = vmatprep.subr.bf16.mxu0 %v8650_v18  ;;  %v10677_v18 = vld [vmem:[#allocation8_spill] sm:$0xff] }
 0x1c2   : > { %7448 = vmatpush3.bf16.msra.mxu1 %v8981_v40 }
 0x1c3   : > { %2405 = vmatmul.mubr.bf16.gmra.mrb[68].mxu0 %v8904_v2  ;;  %7449 = vmatprep.subr.bf16.mxu1 %v8991_v10  ;;  %v10680_v2 = vld [vmem:[#allocation11_spill] sm:$0xff] }
 0x1c4   : > { %2412 = vmatprep.mubr.bf16.mxu0 %v9132_v39  ;;  %6662 = vmatpush3.bf16.msra.mxu0 %v8686_v36  ;;  %v10678_v36 = vld [vmem:[#allocation9_spill] sm:$0xff] }
 0x1c5   : > { %2540 = vmatmul.mubr.bf16.gmra.mrb[104].mxu1 %v8601_v44  ;;  %6663 = vmatprep.subr.bf16.mxu0 %v10672_v58 }
 0x1c6   : > { %2547 = vmatprep.mubr.bf16.mxu1 %v8895_v45  ;;  %7450 = vmatpush3.bf16.msra.mxu1 %v8991_v10 }
 0x1c7   : > { %7451 = vmatprep.subr.bf16.mxu1 %v8999_v11 }
 0x1c8   : > { %6664 = vmatpush3.bf16.msra.mxu0 %v10673_v48 }
 0x1c9   : > { %6665 = vmatprep.subr.bf16.mxu0 %v10674_v53 }
 0x1ca   : > { %7452 = vmatpush3.bf16.msra.mxu1 %v8999_v11 }
 0x1cb   : > { %2413 = vmatmul.mubr.bf16.gmra.mrb[72].mxu0 %v9120_v49  ;;  %7453 = vmatprep.subr.bf16.mxu1 %v9009_v21 }
 0x1cc   : > { %2420 = vmatprep.mubr.bf16.mxu0 %v9139_v31  ;;  %6666 = vmatpush3.bf16.msra.mxu0 %v10675_v61 }
 0x1cd   : > { %2548 = vmatmul.mubr.bf16.gmra.mrb[108].mxu1 %v8889_v5  ;;  %6667 = vmatprep.subr.bf16.mxu0 %v10676_v14 }
 0x1ce   : > { %2555 = vmatprep.mubr.bf16.mxu1 %v8940_v28  ;;  %7454 = vmatpush3.bf16.msra.mxu1 %v9009_v21 }
 0x1cf   : > { %7455 = vmatprep.subr.bf16.mxu1 %v9016_v22 }
 0x1d0   : > { %6668 = vmatpush3.bf16.msra.mxu0 %v10677_v18 }
 0x1d1   : > { %6669 = vmatprep.subr.bf16.mxu0 %v10678_v36 }
 0x1d2   : > { %7456 = vmatpush3.bf16.msra.mxu1 %v9016_v22 }
 0x1d3   : > { %2421 = vmatmul.mubr.bf16.gmra.mrb[76].mxu0 %v9132_v39  ;;  %7473 = vmatprep.subr.bf16.mxu1 %v9027_v60 }
 0x1d4   : > { %2428 = vmatprep.mubr.bf16.mxu0 %v9153_v8  ;;  %6670 = vmatpush3.bf16.msra.mxu0 %v10679_v3 }
 0x1d5   : > { %2556 = vmatmul.mubr.bf16.gmra.mrb[112].mxu1 %v8895_v45  ;;  %6671 = vmatprep.subr.bf16.mxu0 %v10680_v2  ;;  %v2742_v2 = vpack.c.bf16 %v2728_v17, %v2727_v16  ;;  %v2735_v17 = vld [vmem:[#allocation2 + $0x229] sm:$0xff] }
 0x1d6   : > { %2563 = vmatprep.mubr.bf16.mxu1 %v8946_v7 }
 0x1d8   : > { %6672 = vmatpush3.bf16.msra.mxu0 %v10681_v47  ;;  %v8205_v47 = vld [vmem:[%s10611_s1 + $0x8] sm:$0xff]  }
 0x1d9   : > { %7505 = vmatprep.subr.bf16.mxu0 %v8194_v9 }
 0x1db   : > { %2429 = vmatmul.mubr.bf16.gmra.mrb[80].mxu0 %v9139_v31 }
 0x1dc   : > { %2436 = vmatprep.mubr.bf16.mxu0 %v9156_v25 }
 0x1dd   : > { %2564 = vmatmul.mubr.bf16.gmra.mrb[116].mxu1 %v8940_v28 }
 0x1de   : > { %2571 = vmatprep.mubr.bf16.mxu1 %v8968_v4 }
 0x1e3   : > { %2437 = vmatmul.mubr.bf16.gmra.mrb[84].mxu0 %v9153_v8 }
 0x1e4   : > { %2444 = vmatprep.mubr.bf16.mxu0 %v9177_v63 }
 0x1e5   : > { %2572 = vmatmul.mubr.bf16.gmra.mrb[120].mxu1 %v8946_v7 }
 0x1e6   : > { %2579 = vmatprep.mubr.bf16.mxu1 %v8974_v24 }
 0x1e7   : > { %v6289_v27 = vpop.f32.mrb[16].mxu1 }
 0x1e8   : > { %v6290_v37 = vpop.f32.mrb[17].mxu1 }
 0x1e9   : > { %v9296_v40 = vadd.f32 %v6290_v37, %v6289_v27  ;;  %v6292_v10 = vpop.f32.mrb[18].mxu1 }
 0x1ea   : > { %v6293_v11 = vpop.f32.mrb[19].mxu1 }
 0x1eb   : > { %2445 = vmatmul.mubr.bf16.gmra.mrb[88].mxu0 %v9156_v25  ;;  %v9299_v21 = vadd.f32 %v6293_v11, %v6292_v10  ;;  %v2722_v25 = vld [vmem:[#allocation2 + $0x151] sm:$0xff]  ;;  %v2729_v10 = vld [vmem:[#allocation2 + $0x1c9] sm:$0xff] }
 0x1ec   : > { %2452 = vmatprep.mubr.bf16.mxu0 %v9180_v34  ;;  %v2730_v11 = vld [vmem:[#allocation2 + $0x1d1] sm:$0xff] }
 0x1ed   : > { %2580 = vmatmul.mubr.bf16.gmra.mrb[124].mxu1 %v8968_v4 }
 0x1ee   : > { %7457 = vmatprep.mubr.bf16.mxu1 %v8601_v44  ;;  %v2721_v44 = vld [vmem:[#allocation2 + $0x149] sm:$0xff] }
 0x1f0   : > { %v6295_v22 = vpop.f32.mrb[20].mxu1 }
 0x1f1   : > { %v6296_v49 = vpop.f32.mrb[21].mxu1 }
 0x1f2   : > { %v9304_v39 = vadd.f32 %v6296_v49, %v6295_v22  ;;  %v6298_v31 = vpop.f32.mrb[22].mxu1  ;;  %v8206_v22 = vld [vmem:[%s10611_s1 + $0x10] sm:$0xff]  }
 0x1f3   : > { %v6299_v8 = vpop.f32.mrb[23].mxu1  ;;  %2453 = vmatmul.mubr.bf16.gmra.mrb[92].mxu0 %v9177_v63  ;;  %v8195_v63 = vld [vmem:[%s10611_s1 + $0x8] sm:$0xff]  }
 0x1f4   : > { %v9307_v51 = vadd.f32 %v6299_v8, %v6298_v31  ;;  %2779 = vmatprep.mubr.bf16.mxu0 %v9220_v12 }
 0x1f5   : > { %7458 = vmatmul.mubr.bf16.vlgmr.msra.gmra.mrb[80].mxu1 %v8889_v5  ;;  %v2739_v5 = vpack.c.bf16 %v2722_v25, %v2721_v44 }
 0x1f6   : > { %7461 = vmatprep.mubr.bf16.mxu1 %v8895_v45  ;;  %7474 = vmatpush3.bf16.msra.mxu1 %v9027_v60  ;;  %v8196_v60 = vld [vmem:[%s10611_s1 + $0x10] sm:$0xff]  }
 0x1f7   : > { %7475 = vmatprep.subr.bf16.mxu1 %v9075_v62 }
 0x1f8   : > { %v6301_v13 = vpop.f32.mrb[24].mxu1 }
 0x1f9   : > { %v6302_v55 = vpop.f32.mrb[25].mxu1 }
 0x1fa   : > { %v9317_v34 = vadd.f32 %v6302_v55, %v6301_v13  ;;  %v6304_v54 = vpop.f32.mrb[26].mxu1  ;;  %7476 = vmatpush3.bf16.msra.mxu1 %v9075_v62  ;;  %v2723_v62 = vld [vmem:[#allocation2 + $0x169] sm:$0xff] }
 0x1fb   : > { %v6305_v23 = vpop.f32.mrb[27].mxu1  ;;  %2780 = vmatmul.mubr.bf16.vlgmr.msra.gmra.mrb[96].mxu0 %v9100_v59  ;;  %7477 = vmatprep.subr.bf16.mxu1 %v9087_v57  ;;  %v2724_v59 = vld [vmem:[#allocation2 + $0x171] sm:$0xff] }
 0x1fc   : > { %v9322_v45 = vadd.f32 %v6305_v23, %v6304_v54  ;;  %7506 = vmatpush3.bf16.msra.mxu0 %v8194_v9  ;;  %2787 = vmatprep.mubr.bf16.mxu0 %v2739_v5  ;;  %v2743_v54 = vpack.c.bf16 %v2730_v11, %v2729_v10  ;;  %v8209_v23 = vld [vmem:[%s10611_s1 + $0x18] sm:$0xff]  }
 0x1fd   : > { %7462 = vmatmul.mubr.bf16.gmra.mrb[84].mxu1 %v8940_v28  ;;  %7507 = vmatprep.subr.bf16.mxu0 %v8195_v63  ;;  %v8197_v28 = vld [vmem:[%s10611_s1 + $0x18] sm:$0xff]  }
 0x1fe   : > { %7465 = vmatprep.mubr.bf16.mxu1 %v8946_v7  ;;  %7478 = vmatpush3.bf16.msra.mxu1 %v9087_v57  ;;  %v2740_v7 = vpack.c.bf16 %v2724_v59, %v2723_v62  ;;  %v8217_v10 = vld [vmem:[%s10611_s1 + $0x38] sm:$0xff]  }
 0x1ff   : > { %7479 = vmatprep.subr.bf16.mxu1 %v9095_v42 }
 0x200   : > { %v6307_v33 = vpop.f32.mrb[28].mxu1  ;;  %7508 = vmatpush3.bf16.msra.mxu0 %v8195_v63 }
 0x201   : > { %v6308_v32 = vpop.f32.mrb[29].mxu1  ;;  %7509 = vmatprep.subr.bf16.mxu0 %v8196_v60 }
 0x202   : > { %v9334_v46 = vadd.f32 %v6308_v32, %v6307_v33  ;;  %v6310_v52 = vpop.f32.mrb[30].mxu1  ;;  %7480 = vmatpush3.bf16.msra.mxu1 %v9095_v42  ;;  %v2725_v42 = vld [vmem:[#allocation2 + $0x189] sm:$0xff]  ;;  %v2732_v32 = vld [vmem:[#allocation2 + $0x1f1] sm:$0xff] }
 0x203   : > { %v6311_v30 = vpop.f32.mrb[31].mxu1  ;;  %2788 = vmatmul.mubr.bf16.gmra.mrb[100].mxu0 %v9220_v12  ;;  %7481 = vmatprep.subr.bf16.mxu1 %v9107_v43  ;;  %v8200_v12 = vld [vmem:[%s10611_s1 + $0x30] sm:$0xff]  }
 0x204   : > { %v9339_v57 = vadd.f32 %v6311_v30, %v6310_v52  ;;  %2795 = vmatprep.mubr.bf16.mxu0 %v2740_v7  ;;  %7510 = vmatpush3.bf16.msra.mxu0 %v8196_v60  ;;  %v2731_v33 = vld [vmem:[#allocation2 + $0x1e9] sm:$0xff] }
 0x205   : > { %7466 = vmatmul.mubr.bf16.gmra.mrb[88].mxu1 %v8968_v4  ;;  %7511 = vmatprep.subr.bf16.mxu0 %v8197_v28  ;;  %v8199_v4 = vld [vmem:[%s10611_s1 + $0x28] sm:$0xff]  }
 0x206   : > { %7469 = vmatprep.mubr.bf16.mxu1 %v8974_v24  ;;  %7482 = vmatpush3.bf16.msra.mxu1 %v9107_v43  ;;  %v2741_v24 = vpack.c.bf16 %v2726_v29, %v2725_v42  ;;  %v2733_v42 = vld [vmem:[#allocation2 + $0x209] sm:$0xff]  ;;  %v2734_v29 = vld [vmem:[#allocation2 + $0x211] sm:$0xff] }
 0x207   : > { %7483 = vmatprep.subr.bf16.mxu1 %v9115_v26 }
 0x208   : > { %v6313_v15 = vpop.f32.mrb[32].mxu1  ;;  %7512 = vmatpush3.bf16.msra.mxu0 %v8197_v28  ;;  %v8210_v28 = vld [vmem:[%s10611_s1 + $0x20] sm:$0xff]  }
 0x209   : > { %v6314_v56 = vpop.f32.mrb[33].mxu1  ;;  %7513 = vmatprep.subr.bf16.mxu0 %v8198_v41 }
 0x20a   : > { %v9351_v19 = vadd.f32 %v6314_v56, %v6313_v15  ;;  %v6316_v0 = vpop.f32.mrb[34].mxu1  ;;  %7484 = vmatpush3.bf16.msra.mxu1 %v9115_v26 }
 0x20b   : > { %v6317_v1 = vpop.f32.mrb[35].mxu1  ;;  %2796 = vmatmul.mubr.bf16.gmra.mrb[104].mxu0 %v2739_v5  ;;  %7485 = vmatprep.subr.bf16.mxu1 %v9127_v35 }
 0x20c   : > { %v9355_v43 = vadd.f32 %v6317_v1, %v6316_v0  ;;  %2803 = vmatprep.mubr.bf16.mxu0 %v2741_v24  ;;  %7514 = vmatpush3.bf16.msra.mxu0 %v8198_v41 }
 0x20d   : > { %7470 = vmatmul.mubr.bf16.gmra.mrb[92].mxu1 %v8934_v38  ;;  %7515 = vmatprep.subr.bf16.mxu0 %v8199_v4 }
 0x20e   : > { %7486 = vmatpush3.bf16.msra.mxu1 %v9127_v35  ;;  %7489 = vmatprep.mubr.bf16.mxu1 %v2739_v5  ;;  %v6353_v26 = vpop.f32.mrb[32].mxu0  ;;  %v8201_v35 = vld [vmem:[%s10611_s1 + $0x38] sm:$0xff]  }
 0x20f   : > { %v6354_v6 = vpop.f32.mrb[33].mxu0  ;;  %7487 = vmatprep.subr.bf16.mxu1 %v9137_v50 }
 0x210   : > { %v6319_v58 = vpop.f32.mrb[36].mxu1  ;;  %v6355_v38 = vadd.f32 %v6354_v6, %v6353_v26  ;;  %v6356_v48 = vpop.f32.mrb[34].mxu0  ;;  %7516 = vmatpush3.bf16.msra.mxu0 %v8199_v4 }
 0x211   : > { %v6320_v53 = vpop.f32.mrb[37].mxu1  ;;  %v6357_v61 = vpop.f32.mrb[35].mxu0  ;;  %7517 = vmatprep.subr.bf16.mxu0 %v8200_v12 }
 0x212   : > { %v9370_v14 = vadd.f32 %v6355_v38, %v9296_v40  ;;  %v9372_v18 = vadd.f32 %v6320_v53, %v6319_v58  ;;  %v6322_v36 = vpop.f32.mrb[38].mxu1  ;;  %v6358_v3 = vadd.f32 %v6357_v61, %v6356_v48  ;;  %7488 = vmatpush3.bf16.msra.mxu1 %v9137_v50  ;;  %v8214_v38 = vld [vmem:[%s10611_s1 + $0x30] sm:$0xff]  }
 0x213   : > { %v6323_v9 = vpop.f32.mrb[39].mxu1  ;;  %2804 = vmatmul.mubr.bf16.gmra.mrb[108].mxu0 %v2740_v7  ;;  %7537 = vmatprep.subr.bf16.mxu1 %v8202_v20 }
 0x214   : > { %v9379_v27 = vadd.f32 %v6358_v3, %v9299_v21  ;;  %v9381_v37 = vadd.f32 %v6323_v9, %v6322_v36  ;;  %2811 = vmatprep.mubr.bf16.mxu0 %v2742_v2  ;;  %7518 = vmatpush3.bf16.msra.mxu0 %v8200_v12  ;;  %v8213_v12 = vld [vmem:[%s10611_s1 + $0x28] sm:$0xff]  }
 0x215   : > { %7490 = vmatmul.mubr.bf16.vlgmr.msra.gmra.mrb[80].mxu1 %v2740_v7  ;;  %7519 = vmatprep.subr.bf16.mxu0 %v8201_v35 }
 0x216   : > { %7493 = vmatprep.mubr.bf16.mxu1 %v2741_v24  ;;  %v6359_v40 = vpop.f32.mrb[36].mxu0  ;;  %7538 = vmatpush3.bf16.msra.mxu1 %v8202_v20  ;;  %v2736_v20 = vld [vmem:[#allocation2 + $0x231] sm:$0xff] }
 0x217   : > { %v6360_v50 = vpop.f32.mrb[37].mxu0  ;;  %7539 = vmatprep.subr.bf16.mxu1 %v8205_v47  ;;  %v2746_v36 = vpack.c.bf16 %v2736_v20, %v2735_v17 }
 0x218   : > { %v6325_v49 = vpop.f32.mrb[40].mxu1  ;;  %v6361_v21 = vadd.f32 %v6360_v50, %v6359_v40  ;;  %v6362_v31 = vpop.f32.mrb[38].mxu0  ;;  %7520 = vmatpush3.bf16.msra.mxu0 %v8201_v35  ;;  %v8218_v40 = vld [vmem:[%s8411_s9 + $0xc0] sm:$0xff]  }
 0x219   : > { %v6326_v8 = vpop.f32.mrb[41].mxu1  ;;  %v6363_v44 = vpop.f32.mrb[39].mxu0 }
 0x21a   : > { %v9387_v25 = vadd.f32 %v6361_v21, %v9304_v39  ;;  %v9389_v13 = vadd.f32 %v6326_v8, %v6325_v49  ;;  %v6328_v55 = vpop.f32.mrb[42].mxu1  ;;  %v6364_v63 = vadd.f32 %v6363_v44, %v6362_v31  ;;  %7540 = vmatpush3.bf16.msra.mxu1 %v8205_v47 }
 0x21b   : > { %v6329_v5 = vpop.f32.mrb[43].mxu1  ;;  %2812 = vmatmul.mubr.bf16.gmra.mrb[112].mxu0 %v2741_v24  ;;  %7541 = vmatprep.subr.bf16.mxu1 %v8206_v22  ;;  %v2744_v24 = vpack.c.bf16 %v2732_v32, %v2731_v33 }
 0x21c   : > { %v9395_v60 = vadd.f32 %v6364_v63, %v9307_v51  ;;  %v9397_v62 = vadd.f32 %v6329_v5, %v6328_v55  ;;  %2819 = vmatprep.mubr.bf16.mxu0 %v2743_v54  ;;  %v8219_v5 = vld [vmem:[%s8411_s9 + $0xc8] sm:$0xff]  }
 0x21d   : > { %7494 = vmatmul.mubr.bf16.gmra.mrb[84].mxu1 %v2742_v2 }
 0x21e   : > { %7497 = vmatprep.mubr.bf16.mxu1 %v2743_v54  ;;  %v6365_v39 = vpop.f32.mrb[40].mxu0  ;;  %7542 = vmatpush3.bf16.msra.mxu1 %v8206_v22 }
 0x21f   : > { %v6366_v59 = vpop.f32.mrb[41].mxu0  ;;  %7543 = vmatprep.subr.bf16.mxu1 %v8209_v23 }
 0x220   : > { %v6331_v52 = vpop.f32.mrb[44].mxu1  ;;  %v6367_v7 = vadd.f32 %v6366_v59, %v6365_v39  ;;  %v6368_v30 = vpop.f32.mrb[42].mxu0 }
 0x221   : > { %v6332_v51 = vpop.f32.mrb[45].mxu1  ;;  %v6369_v41 = vpop.f32.mrb[43].mxu0 }
 0x222   : > { %v9403_v15 = vadd.f32 %v6367_v7, %v9317_v34  ;;  %v9405_v56 = vadd.f32 %v6332_v51, %v6331_v52  ;;  %v6334_v4 = vpop.f32.mrb[46].mxu1  ;;  %v6370_v0 = vadd.f32 %v6369_v41, %v6368_v30  ;;  %7544 = vmatpush3.bf16.msra.mxu1 %v8209_v23  ;;  %v2745_v34 = vpack.c.bf16 %v2734_v29, %v2733_v42  ;;  %v8204_v30 = vld [vmem:[%s8411_s9 + $0x88] sm:$0xff]   ;;  %v8207_v29 = vld [vmem:[%s8411_s9 + $0x90] sm:$0xff]  }
 0x223   : > { %v6335_v1 = vpop.f32.mrb[47].mxu1  ;;  %2820 = vmatmul.mubr.bf16.gmra.mrb[116].mxu0 %v2742_v2  ;;  %7545 = vmatprep.subr.bf16.mxu1 %v8210_v28 }
 0x224   : > { %v9411_v26 = vadd.f32 %v6370_v0, %v9322_v45  ;;  %v9413_v6 = vadd.f32 %v6335_v1, %v6334_v4  ;;  %2827 = vmatprep.mubr.bf16.mxu0 %v2744_v24 }
 0x225   : > { %7498 = vmatmul.mubr.bf16.gmra.mrb[88].mxu1 %v2744_v24 }
 0x226   : > { %7501 = vmatprep.mubr.bf16.mxu1 %v2745_v34  ;;  %v6371_v16 = vpop.f32.mrb[44].mxu0  ;;  %7546 = vmatpush3.bf16.msra.mxu1 %v8210_v28 }
 0x227   : > { %v6372_v58 = vpop.f32.mrb[45].mxu0  ;;  %7547 = vmatprep.subr.bf16.mxu1 %v8213_v12 }
 0x228   : > { %v6373_v48 = vadd.f32 %v6372_v58, %v6371_v16  ;;  %v6433_v45 = vpop.f32.mrb[48].mxu1  ;;  %v6374_v53 = vpop.f32.mrb[46].mxu0 }
 0x229   : > { %v6434_v61 = vpop.f32.mrb[49].mxu1  ;;  %v6375_v35 = vpop.f32.mrb[47].mxu0 }
 0x22a   : > { %v9419_v3 = vadd.f32 %v6373_v48, %v9334_v46  ;;  %v6435_v2 = vadd.f32 %v6434_v61, %v6433_v45  ;;  %v6376_v9 = vadd.f32 %v6375_v35, %v6374_v53  ;;  %v6436_v47 = vpop.f32.mrb[50].mxu1  ;;  %7548 = vmatpush3.bf16.msra.mxu1 %v8213_v12  ;;  %v8220_v12 = vld [vmem:[%s8411_s9 + $0xd0] sm:$0xff]   ;;  %v8208_v48 = vld [vmem:[%s8411_s9 + $0x98] sm:$0xff]  }
 0x22b   : > { %v6437_v50 = vpop.f32.mrb[51].mxu1  ;;  %2828 = vmatmul.mubr.bf16.gmra.mrb[120].mxu0 %v2743_v54  ;;  %7549 = vmatprep.subr.bf16.mxu1 %v8214_v38 }
 0x22c   : > { %v9426_v11 = vadd.f32 %v6376_v9, %v9339_v57  ;;  %v6438_v22 = vadd.f32 %v6437_v50, %v6436_v47  ;;  %2835 = vmatprep.mubr.bf16.mxu0 %v2745_v34  ;;  %v9429_v46 = vadd.f32 %v9370_v14, %v6435_v2  ;;  %v8203_v57 = vld [vmem:[%s8411_s9 + $0x80] sm:$0xff]  }
 0x22d   : > { %7502 = vmatmul.mubr.bf16.gmra.mrb[92].mxu1 %v2746_v36 }
 0x22e   : > { %v6377_v49 = vpop.f32.mrb[48].mxu0  ;;  %7550 = vmatpush3.bf16.msra.mxu1 %v8214_v38  ;;  %7553 = vmatprep.mubr.bf16.mxu1 %v8218_v40  ;;  %v9432_v21 = vadd.f32 %v9379_v27, %v6438_v22  ;;  %v8222_v40 = vld [vmem:[%s8411_s9 + $0xe0] sm:$0xff]  }
 0x22f   : > { %v6378_v31 = vpop.f32.mrb[49].mxu0  ;;  %7551 = vmatprep.subr.bf16.mxu1 %v8217_v10 }
 0x230   : > { %v6379_v8 = vadd.f32 %v6378_v31, %v6377_v49  ;;  %v6439_v44 = vpop.f32.mrb[52].mxu1  ;;  %v6380_v55 = vpop.f32.mrb[50].mxu0 }
 0x231   : > { %v6440_v63 = vpop.f32.mrb[53].mxu1  ;;  %v6381_v54 = vpop.f32.mrb[51].mxu0 }
 0x232   : > { %v9437_v14 = vadd.f32 %v6379_v8, %v9351_v19  ;;  %v6441_v23 = vadd.f32 %v6440_v63, %v6439_v44  ;;  %v6382_v39 = vadd.f32 %v6381_v54, %v6380_v55  ;;  %v6442_v59 = vpop.f32.mrb[54].mxu1  ;;  %7552 = vmatpush3.bf16.msra.mxu1 %v8217_v10  ;;  %v8212_v44 = vld [vmem:[%s8411_s9 + $0xa8] sm:$0xff]   ;;  %v8215_v54 = vld [vmem:[%s8411_s9 + $0xb0] sm:$0xff]  }
 0x233   : > { %v6443_v27 = vpop.f32.mrb[55].mxu1  ;;  %2836 = vmatmul.mubr.bf16.gmra.mrb[124].mxu0 %v2744_v24 }
 0x234   : > { %v9440_v33 = vadd.f32 %v6382_v39, %v9355_v43  ;;  %v6444_v32 = vadd.f32 %v6443_v27, %v6442_v59  ;;  %7521 = vmatprep.mubr.bf16.mxu0 %v8203_v57  ;;  %v9443_v28 = vadd.f32 %v9387_v25, %v6441_v23  ;;  %v8224_v27 = vld [vmem:[%s8411_s9 + $0xf0] sm:$0xff]  }
 0x235   : > { %7554 = vmatmul.mubr.bf16.vlgmr.msra.gmra.mrb[128].mxu1 %v8219_v5 }
 0x236   : > { %v6383_v52 = vpop.f32.mrb[52].mxu0  ;;  %v9446_v19 = vadd.f32 %v9395_v60, %v6444_v32  ;;  %v8221_v60 = vld [vmem:[%s8411_s9 + $0xd8] sm:$0xff]   ;;  %7557 = vmatprep.mubr.bf16.mxu1 %v8220_v12 }
 0x237   : > { %v6384_v7 = vpop.f32.mrb[53].mxu0 }
 0x238   : > { %v6385_v51 = vadd.f32 %v6384_v7, %v6383_v52  ;;  %v6445_v41 = vpop.f32.mrb[56].mxu1  ;;  %v6386_v42 = vpop.f32.mrb[54].mxu0 }
 0x239   : > { %v6446_v43 = vpop.f32.mrb[57].mxu1  ;;  %v6387_v4 = vpop.f32.mrb[55].mxu0 }
 0x23a   : > { %v9451_v0 = vadd.f32 %v6385_v51, %v9372_v18  ;;  %v6447_v25 = vadd.f32 %v6446_v43, %v6445_v41  ;;  %v6388_v24 = vadd.f32 %v6387_v4, %v6386_v42  ;;  %v6448_v1 = vpop.f32.mrb[58].mxu1 }
 0x23b   : > { %v6449_v34 = vpop.f32.mrb[59].mxu1  ;;  %7522 = vmatmul.mubr.bf16.vlgmr.msra.gmra.mrb[128].mxu0 %v8204_v30 }
 0x23c   : > { %v9456_v16 = vadd.f32 %v6388_v24, %v9381_v37  ;;  %v6450_v17 = vadd.f32 %v6449_v34, %v6448_v1  ;;  %7525 = vmatprep.mubr.bf16.mxu0 %v8207_v29  ;;  %v9459_v20 = vadd.f32 %v9403_v15, %v6447_v25  ;;  %v8211_v37 = vld [vmem:[%s8411_s9 + $0xa0] sm:$0xff]  }
 0x23d   : > { %7558 = vmatmul.mubr.bf16.gmra.mrb[132].mxu1 %v8221_v60 }
 0x23e   : > { %v6389_v18 = vpop.f32.mrb[56].mxu0  ;;  %v9462_v58 = vadd.f32 %v9411_v26, %v6450_v17  ;;  %v8223_v26 = vld [vmem:[%s8411_s9 + $0xe8] sm:$0xff]   ;;  %7561 = vmatprep.mubr.bf16.mxu1 %v8222_v40 }
 0x23f   : > { %v6390_v38 = vpop.f32.mrb[57].mxu0 }
 0x240   : > { %v6391_v45 = vadd.f32 %v6390_v38, %v6389_v18  ;;  %v6451_v53 = vpop.f32.mrb[60].mxu1  ;;  %v6392_v61 = vpop.f32.mrb[58].mxu0 }
 0x241   : > { %v6452_v35 = vpop.f32.mrb[61].mxu1  ;;  %v6393_v36 = vpop.f32.mrb[59].mxu0 }
 0x242   : > { %v7800_v2 = vadd.f32 %v6391_v45, %v9389_v13  ;;  %v6453_v15 = vadd.f32 %v6452_v35, %v6451_v53  ;;  %v6394_v9 = vadd.f32 %v6393_v36, %v6392_v61  ;;  %v6454_v47 = vpop.f32.mrb[62].mxu1 }
 0x243   : > { %v6455_v50 = vpop.f32.mrb[63].mxu1  ;;  %7526 = vmatmul.mubr.bf16.gmra.mrb[132].mxu0 %v8208_v48 }
 0x244   : > { %v7806_v10 = vadd.f32 %v6394_v9, %v9397_v62  ;;  %v6456_v22 = vadd.f32 %v6455_v50, %v6454_v47  ;;  %7529 = vmatprep.mubr.bf16.mxu0 %v8211_v37  ;;  %v9471_v49 = vadd.f32 %v9419_v3, %v6453_v15 }
 0x245   : > { %7562 = vmatmul.mubr.bf16.gmra.mrb[136].mxu1 %v8223_v26 }
 0x246   : > { %v6395_v13 = vpop.f32.mrb[60].mxu0  ;;  %v9474_v31 = vadd.f32 %v9426_v11, %v6456_v22  ;;  %v8225_v11 = vld [vmem:[%s8411_s9 + $0xf8] sm:$0xff]   ;;  %7565 = vmatprep.mubr.bf16.mxu1 %v8224_v27 }
 0x247   : > { %v6396_v8 = vpop.f32.mrb[61].mxu0 }
 0x248   : > { %v6397_v55 = vadd.f32 %v6396_v8, %v6395_v13  ;;  %v6457_v57 = vpop.f32.mrb[64].mxu1  ;;  %v6398_v63 = vpop.f32.mrb[62].mxu0 }
 0x249   : > { %v6458_v62 = vpop.f32.mrb[65].mxu1  ;;  %v6399_v5 = vpop.f32.mrb[63].mxu0 }
 0x24a   : > { %v7797_v3 = vadd.f32 %v6397_v55, %v9405_v56  ;;  %v6459_v23 = vadd.f32 %v6458_v62, %v6457_v57  ;;  %v6400_v39 = vadd.f32 %v6399_v5, %v6398_v63  ;;  %v6460_v59 = vpop.f32.mrb[66].mxu1  ;;  %v8216_v56 = vld [vmem:[%s8411_s9 + $0xb8] sm:$0xff]  }
 0x24b   : > { %v6461_v32 = vpop.f32.mrb[67].mxu1  ;;  %7530 = vmatmul.mubr.bf16.gmra.mrb[136].mxu0 %v8212_v44 }
 0x24c   : > { %v7803_v52 = vadd.f32 %v6400_v39, %v9413_v6  ;;  %v6462_v7 = vadd.f32 %v6461_v32, %v6460_v59  ;;  %7533 = vmatprep.mubr.bf16.mxu0 %v8215_v54  ;;  %v9483_v30 = vadd.f32 %v9437_v14, %v6459_v23 }
 0x24d   : > { %7566 = vmatmul.mubr.bf16.gmra.mrb[140].mxu1 %v8225_v11 }
 0x24e   : > { %v9486_v51 = vadd.f32 %v9440_v33, %v6462_v7 }
 0x250   : > { %v6463_v41 = vpop.f32.mrb[68].mxu1 }
 0x251   : > { %v6464_v42 = vpop.f32.mrb[69].mxu1 }
 0x252   : > { %v6465_v29 = vadd.f32 %v6464_v42, %v6463_v41  ;;  %v6466_v43 = vpop.f32.mrb[70].mxu1 }
 0x253   : > { %v6467_v4 = vpop.f32.mrb[71].mxu1  ;;  %7534 = vmatmul.mubr.bf16.gmra.mrb[140].mxu0 %v8216_v56 }
 0x254   : > { %v6468_v25 = vadd.f32 %v6467_v4, %v6466_v43  ;;  %v7786_v6 = vadd.f32 %v9451_v0, %v6465_v29 }
 0x256   : > { %v7792_v24 = vadd.f32 %v9456_v16, %v6468_v25 }
 0x258   : > { %v6469_v1 = vpop.f32.mrb[72].mxu1 }
 0x259   : > { %v6470_v14 = vpop.f32.mrb[73].mxu1 }
 0x25a   : > { %v6471_v12 = vadd.f32 %v6470_v14, %v6469_v1  ;;  %v6472_v34 = vpop.f32.mrb[74].mxu1  ;;  %v8226_v1 = vld [vmem:[%s10613_s3 + $0x40] sm:$0xff]  }
 0x25b   : > { %v6473_v60 = vpop.f32.mrb[75].mxu1  ;;  %6785 = vmatprep.subr.bf16.mxu1 %v8226_v1 }
 0x25c   : > { %v6474_v17 = vadd.f32 %v6473_v60, %v6472_v34  ;;  %v9491_v33 = vadd.f32 %v7800_v2, %v6471_v12  ;;  %v9503_v2 = vld [vmem:[%s10615_s5] ss:$0 sm:$0xff] }
 0x25e   : > { %v9493_v18 = vadd.f32 %v7806_v10, %v6474_v17 }
 0x260   : > { %v6475_v38 = vpop.f32.mrb[76].mxu1 }
 0x261   : > { %v6476_v48 = vpop.f32.mrb[77].mxu1 }
 0x262   : > { %v6477_v45 = vadd.f32 %v6476_v48, %v6475_v38  ;;  %v6478_v53 = vpop.f32.mrb[78].mxu1 }
 0x263   : > { %v6479_v61 = vpop.f32.mrb[79].mxu1 }
 0x264   : > { %v6480_v37 = vadd.f32 %v6479_v61, %v6478_v53  ;;  %v9495_v35 = vadd.f32 %v7797_v3, %v6477_v45  ;;  %v8228_v45 = vld [vmem:[%s10613_s3 + $0x48] sm:$0xff]  }
 0x266   : > { %v9497_v0 = vadd.f32 %v7803_v52, %v6480_v37  ;;  %v8229_v37 = vld [vmem:[%s10613_s3 + $0x8] sm:$0xff]  }
 0x26e   : > { %v7395_v16 = vpop.f32.mrb[16].mxu0 }
 0x26f   : > { %v7763_v36 = vadd.f32 %v9443_v28, %v7395_v16  ;;  %v2096_v15 = vpop.f32.mrb[17].mxu0 }
 0x270   : > { %v7766_v9 = vadd.f32 %v9429_v46, %v2096_v15  ;;  %v7396_v47 = vpop.f32.mrb[18].mxu0 }
 0x271   : > { %v7769_v40 = vadd.f32 %v9446_v19, %v7396_v47  ;;  %v2099_v50 = vpop.f32.mrb[19].mxu0  ;;  %v2184_v22 = vadd.f32 %v7763_v36, %v9503_v2 }
 0x272   : > { %v2182_v26 = vadd.f32 %v7766_v9, %v9503_v2  ;;  %v7772_v10 = vadd.f32 %v9432_v21, %v2099_v50 }
 0x273   : > { %v2185_v8 = vadd.f32 %v7769_v40, %v9503_v2  ;;  %v2200_v63 = vmax.f32 %v2184_v22, 0.0 }
 0x274   : > { %v2183_v28 = vadd.f32 %v7772_v10, %v9503_v2  ;;  %v2198_v13 = vmax.f32 %v2182_v26, 0.0  ;;  %v8230_v26 = vld [vmem:[%s10614_s4] sm:$0xff]  }
 0x275   : > { %v2201_v3 = vmax.f32 %v2185_v8, 0.0  ;;  %7569 = vmatprep.subr.bf16.mxu0 %v8230_v26 }
 0x276   : > { %v2199_v44 = vmax.f32 %v2183_v28, 0.0  ;;  %v7399_v55 = vpop.f32.mrb[20].mxu0  ;;  %7570 = vmatpush3.bf16.msra.mxu0 %v8230_v26 }
 0x277   : > { %v7775_v57 = vadd.f32 %v9471_v49, %v7399_v55  ;;  %v2112_v46 = vpop.f32.mrb[21].mxu0 }
 0x278   : > { %v2214_v54 = vadd.f32 %v2199_v44, %v2198_v13  ;;  %v7778_v19 = vadd.f32 %v9459_v20, %v2112_v46  ;;  %v7400_v62 = vpop.f32.mrb[22].mxu0  ;;  %v8232_v46 = vld [vmem:[%s10613_s3 + $0x10] sm:$0xff]  }
 0x279   : > { %v7781_v5 = vadd.f32 %v9474_v31, %v7400_v62  ;;  %v2115_v21 = vpop.f32.mrb[23].mxu0  ;;  %v2188_v27 = vadd.f32 %v7775_v57, %v9503_v2 }
 0x27a   : > { %v2215_v23 = vadd.f32 %v2214_v54, %v2200_v63  ;;  %v2186_v39 = vadd.f32 %v7778_v19, %v9503_v2  ;;  %v7784_v59 = vadd.f32 %v9462_v58, %v2115_v21 }
 0x27b   : > { %v2189_v7 = vadd.f32 %v7781_v5, %v9503_v2  ;;  %v2204_v42 = vmax.f32 %v2188_v27, 0.0  ;;  %v8235_v27 = vld [vmem:[%s10613_s3 + $0x18] sm:$0xff]  }
 0x27c   : > { %v2202_v32 = vmax.f32 %v2186_v39, 0.0  ;;  %v2216_v11 = vadd.f32 %v2215_v23, %v2201_v3  ;;  %v2187_v49 = vadd.f32 %v7784_v59, %v9503_v2  ;;  %v8234_v3 = vld [vmem:[%s10613_s3 + $0x58] sm:$0xff]  }
 0x27d   : > { %v2205_v14 = vmax.f32 %v2189_v7, 0.0 }
 0x27e   : > { %v2217_v52 = vadd.f32 %v2216_v11, %v2202_v32  ;;  %v2203_v20 = vmax.f32 %v2187_v49, 0.0  ;;  %v7403_v56 = vpop.f32.mrb[24].mxu0 }
 0x27f   : > { %v7787_v41 = vadd.f32 %v7786_v6, %v7403_v56  ;;  %v2128_v31 = vpop.f32.mrb[25].mxu0  ;;  %v8227_v6 = vld [vmem:[%s10613_s3] sm:$0xff]   ;;  %v8236_v56 = vld [vmem:[%s10614_s4 + $0x10] sm:$0xff]  }
 0x280   : > { %v2218_v29 = vadd.f32 %v2217_v52, %v2203_v20  ;;  %v7790_v43 = vadd.f32 %v9483_v30, %v2128_v31  ;;  %v7404_v4 = vpop.f32.mrb[26].mxu0  ;;  %6786 = vmatpush3.bf16.msra.mxu1 %v8227_v6 }
 0x281   : > { %v7793_v25 = vadd.f32 %v7792_v24, %v7404_v4  ;;  %v2131_v58 = vpop.f32.mrb[27].mxu0  ;;  %v2192_v30 = vadd.f32 %v7787_v41, %v9503_v2  ;;  %6787 = vmatprep.subr.bf16.mxu1 %v8228_v45 }
 0x282   : > { %v2219_v12 = vadd.f32 %v2218_v29, %v2204_v42  ;;  %v2190_v34 = vadd.f32 %v7790_v43, %v9503_v2  ;;  %v7796_v60 = vadd.f32 %v9486_v51, %v2131_v58  ;;  %v8237_v29 = vld [vmem:[%s10613_s3 + $0x60] sm:$0xff]  }
 0x283   : > { %v2193_v48 = vadd.f32 %v7793_v25, %v9503_v2  ;;  %v2208_v15 = vmax.f32 %v2192_v30, 0.0  ;;  %v8239_v30 = vld [vmem:[%s10614_s4 + $0x18] sm:$0xff]  }
 0x284   : > { %v2206_v17 = vmax.f32 %v2190_v34, 0.0  ;;  %v2220_v24 = vadd.f32 %v2219_v12, %v2205_v14  ;;  %v2191_v38 = vadd.f32 %v7796_v60, %v9503_v2  ;;  %6788 = vmatpush3.bf16.msra.mxu1 %v8229_v37  ;;  %v8238_v14 = vld [vmem:[%s10613_s3 + $0x20] sm:$0xff]  }
 0x285   : > { %v2209_v10 = vmax.f32 %v2193_v48, 0.0 }
 0x286   : > { %v2221_v53 = vadd.f32 %v2220_v24, %v2206_v17  ;;  %v2207_v51 = vmax.f32 %v2191_v38, 0.0  ;;  %v7407_v61 = vpop.f32.mrb[28].mxu0  ;;  %v8240_v17 = vld [vmem:[%s10613_s3 + $0x68] sm:$0xff]  }
 0x287   : > { %v7799_v16 = vadd.f32 %v9495_v35, %v7407_v61  ;;  %v2144_v36 = vpop.f32.mrb[29].mxu0  ;;  %v8231_v35 = vld [vmem:[%s10613_s3 + $0x50] sm:$0xff]   ;;  %v8241_v38 = vld [vmem:[%s10613_s3 + $0x28] sm:$0xff]   ;;  %v8242_v61 = vld [vmem:[%s10614_s4 + $0x20] sm:$0xff]  }
 0x288   : > { %v2222_v9 = vadd.f32 %v2221_v53, %v2207_v51  ;;  %v7802_v47 = vadd.f32 %v9491_v33, %v2144_v36  ;;  %v6593_v40 = vpop.f32.mrb[96].mxu1  ;;  %v7408_v50 = vpop.f32.mrb[30].mxu0  ;;  %6789 = vmatprep.subr.bf16.mxu1 %v8231_v35  ;;  %v8243_v36 = vld [vmem:[%s10613_s3 + $0x70] sm:$0xff]  }
 0x289   : > { %v7805_v22 = vadd.f32 %v9497_v0, %v7408_v50  ;;  %v6594_v28 = vpop.f32.mrb[97].mxu1  ;;  %v2147_v13 = vpop.f32.mrb[31].mxu0  ;;  %v2196_v0 = vadd.f32 %v7799_v16, %v9503_v2  ;;  %6790 = vmatpush3.bf16.msra.mxu1 %v8232_v46  ;;  %v8244_v50 = vld [vmem:[%s10613_s3 + $0x30] sm:$0xff]  }
 0x28a   : > { %v2223_v8 = vadd.f32 %v2222_v9, %v2208_v15  ;;  %v2194_v44 = vadd.f32 %v7802_v47, %v9503_v2  ;;  %v6595_v33 = vadd.f32 %v6594_v28, %v6593_v40  ;;  %v7808_v55 = vadd.f32 %v9493_v18, %v2147_v13  ;;  %v6596_v57 = vpop.f32.mrb[98].mxu1  ;;  %v8233_v18 = vld [vmem:[%s10614_s4 + $0x8] sm:$0xff]   ;;  %6791 = vmatprep.subr.bf16.mxu1 %v8234_v3  ;;  %v8246_v13 = vld [vmem:[%s10613_s3 + $0x78] sm:$0xff]   ;;  %v8248_v46 = vld [vmem:[%s10614_s4 + $0x30] sm:$0xff]  }
 0x28b   : > { %v6597_v63 = vpop.f32.mrb[99].mxu1  ;;  %v2197_v21 = vadd.f32 %v7805_v22, %v9503_v2  ;;  %7571 = vmatprep.subr.bf16.mxu0 %v8233_v18  ;;  %v2212_v11 = vmax.f32 %v2196_v0, 0.0  ;;  %v8245_v28 = vld [vmem:[%s10614_s4 + $0x28] sm:$0xff]  }
 0x28c   : > { %v2210_v54 = vmax.f32 %v2194_v44, 0.0  ;;  %v2224_v19 = vadd.f32 %v2223_v8, %v2209_v10  ;;  %v2195_v62 = vadd.f32 %v7808_v55, %v9503_v2  ;;  %v6598_v5 = vadd.f32 %v6597_v63, %v6596_v57  ;;  %7572 = vmatpush3.bf16.msra.mxu0 %v8233_v18  ;;  %v8247_v8 = vld [vmem:[%s10613_s3 + $0x38] sm:$0xff]  }
 0x28d   : > { %6792 = vmatpush3.bf16.msra.mxu1 %v8235_v27  ;;  %v2213_v41 = vmax.f32 %v2197_v21, 0.0  ;;  %7573 = vmatprep.subr.bf16.mxu0 %v8236_v56 }
 0x28e   : > { %v2225_v23 = vadd.f32 %v2224_v19, %v2210_v54  ;;  %v2211_v39 = vmax.f32 %v2195_v62, 0.0  ;;  %v6529_v59 = vpop.f32.mrb[64].mxu0  ;;  %6793 = vmatprep.subr.bf16.mxu1 %v8237_v29 }
 0x28f   : > { %v6530_v32 = vpop.f32.mrb[65].mxu0 }
 0x290   : > { %v2226_v49 = vadd.f32 %v2225_v23, %v2211_v39  ;;  %v6531_v52 = vadd.f32 %v6530_v32, %v6529_v59  ;;  %v6599_v7 = vpop.f32.mrb[100].mxu1  ;;  %v6532_v20 = vpop.f32.mrb[66].mxu0  ;;  %7574 = vmatpush3.bf16.msra.mxu0 %v8236_v56  ;;  %v8249_v23 = vld [vmem:[%s10614_s4 + $0x38] sm:$0xff]  }
 0x291   : > { %v6600_v31 = vpop.f32.mrb[101].mxu1  ;;  %v6533_v42 = vpop.f32.mrb[67].mxu0  ;;  %6794 = vmatpush3.bf16.msra.mxu1 %v8238_v14  ;;  %7575 = vmatprep.subr.bf16.mxu0 %v8239_v30 }
 0x292   : > { %v2227_v43 = vadd.f32 %v2226_v49, %v2212_v11  ;;  %v9570_v4 = vadd.f32 %v6595_v33, %v6531_v52  ;;  %v6601_v25 = vadd.f32 %v6600_v31, %v6599_v7  ;;  %v6534_v58 = vadd.f32 %v6533_v42, %v6532_v20  ;;  %v6602_v1 = vpop.f32.mrb[102].mxu1  ;;  %6795 = vmatprep.subr.bf16.mxu1 %v8240_v17  ;;  %v8250_v49 = vld [vmem:[%s10613_s3 + $0xc0] sm:$0xff]  }
 0x293   : > { %v6603_v12 = vpop.f32.mrb[103].mxu1 }
 0x294   : > { %v9575_v34 = vadd.f32 %v2227_v43, %v2213_v41  ;;  %v9577_v60 = vadd.f32 %v6598_v5, %v6534_v58  ;;  %v6604_v6 = vadd.f32 %v6603_v12, %v6602_v1  ;;  %7576 = vmatpush3.bf16.msra.mxu0 %v8239_v30 }
 0x295   : > { %6796 = vmatpush3.bf16.msra.mxu1 %v8241_v38  ;;  %7577 = vmatprep.subr.bf16.mxu0 %v8242_v61 }
 0x296   : > { %v6535_v24 = vpop.f32.mrb[68].mxu0  ;;  %6797 = vmatprep.subr.bf16.mxu1 %v8243_v36 }
 0x297   : > { %v6536_v48 = vpop.f32.mrb[69].mxu0 }
 0x298   : > { %v6537_v45 = vadd.f32 %v6536_v48, %v6535_v24  ;;  %v6605_v53 = vpop.f32.mrb[104].mxu1  ;;  %v6538_v51 = vpop.f32.mrb[70].mxu0  ;;  %7578 = vmatpush3.bf16.msra.mxu0 %v8242_v61 }
 0x299   : > { %v6606_v37 = vpop.f32.mrb[105].mxu1  ;;  %v6539_v16 = vpop.f32.mrb[71].mxu0  ;;  %6798 = vmatpush3.bf16.msra.mxu1 %v8244_v50  ;;  %7579 = vmatprep.subr.bf16.mxu0 %v8245_v28 }
 0x29a   : > { %v9594_v15 = vadd.f32 %v6601_v25, %v6537_v45  ;;  %v6607_v9 = vadd.f32 %v6606_v37, %v6605_v53  ;;  %v6540_v47 = vadd.f32 %v6539_v16, %v6538_v51  ;;  %v6608_v40 = vpop.f32.mrb[106].mxu1  ;;  %6799 = vmatprep.subr.bf16.mxu1 %v8246_v13  ;;  %v8251_v25 = vld [vmem:[%s10613_s3 + $0x140] sm:$0xff]  }
 0x29b   : > { %v6609_v26 = vpop.f32.mrb[107].mxu1 }
 0x29c   : > { %v9599_v10 = vadd.f32 %v6604_v6, %v6540_v47  ;;  %v6610_v22 = vadd.f32 %v6609_v26, %v6608_v40  ;;  %7580 = vmatpush3.bf16.msra.mxu0 %v8245_v28 }
 0x29d   : > { %6800 = vmatpush3.bf16.msra.mxu1 %v8247_v8  ;;  %7581 = vmatprep.subr.bf16.mxu0 %v8248_v46 }
 0x29e   : > { %v6541_v35 = vpop.f32.mrb[72].mxu0  ;;  %6929 = vmatprep.subr.bf16.mxu1 %v8251_v25 }
 0x29f   : > { %v6542_v44 = vpop.f32.mrb[73].mxu0 }
 0x2a0   : > { %v6543_v33 = vadd.f32 %v6542_v44, %v6541_v35  ;;  %v6611_v55 = vpop.f32.mrb[108].mxu1  ;;  %v6544_v57 = vpop.f32.mrb[74].mxu0  ;;  %7582 = vmatpush3.bf16.msra.mxu0 %v8248_v46 }
 0x2a1   : > { %v6612_v0 = vpop.f32.mrb[109].mxu1  ;;  %v6545_v63 = vpop.f32.mrb[75].mxu0  ;;  %7583 = vmatprep.subr.bf16.mxu0 %v8249_v23 }
 0x2a2   : > { %v9613_v54 = vadd.f32 %v6607_v9, %v6543_v33  ;;  %v6613_v19 = vadd.f32 %v6612_v0, %v6611_v55  ;;  %v6546_v62 = vadd.f32 %v6545_v63, %v6544_v57  ;;  %v6614_v5 = vpop.f32.mrb[110].mxu1 }
 0x2a3   : > { %v6615_v18 = vpop.f32.mrb[111].mxu1 }
 0x2a4   : > { %v9615_v21 = vadd.f32 %v6610_v22, %v6546_v62  ;;  %v6616_v3 = vadd.f32 %v6615_v18, %v6614_v5  ;;  %7584 = vmatpush3.bf16.msra.mxu0 %v8249_v23 }
 0x2a5   : > { %6849 = vmatprep.subr.bf16.mxu0 %v8250_v49 }
 0x2a6   : > { %v6547_v39 = vpop.f32.mrb[76].mxu0 }
 0x2a7   : > { %v6548_v59 = vpop.f32.mrb[77].mxu0 }
 0x2a8   : > { %v6549_v27 = vadd.f32 %v6548_v59, %v6547_v39  ;;  %v6617_v32 = vpop.f32.mrb[112].mxu1  ;;  %v6550_v11 = vpop.f32.mrb[78].mxu0 }
 0x2a9   : > { %v6618_v52 = vpop.f32.mrb[113].mxu1  ;;  %v6551_v7 = vpop.f32.mrb[79].mxu0 }
 0x2aa   : > { %v9623_v20 = vadd.f32 %v6613_v19, %v6549_v27  ;;  %v6619_v56 = vadd.f32 %v6618_v52, %v6617_v32  ;;  %v6552_v41 = vadd.f32 %v6551_v7, %v6550_v11  ;;  %v6620_v31 = vpop.f32.mrb[114].mxu1 }
 0x2ab   : > { %v6621_v42 = vpop.f32.mrb[115].mxu1 }
 0x2ac   : > { %v9625_v29 = vadd.f32 %v6616_v3, %v6552_v41  ;;  %v6622_v43 = vadd.f32 %v6621_v42, %v6620_v31 }
 0x2ae   : > { %v6553_v58 = vpop.f32.mrb[80].mxu0 }
 0x2af   : > { %v6554_v1 = vpop.f32.mrb[81].mxu0 }
 0x2b0   : > { %v6555_v14 = vadd.f32 %v6554_v1, %v6553_v58  ;;  %v6623_v12 = vpop.f32.mrb[116].mxu1  ;;  %v6556_v6 = vpop.f32.mrb[82].mxu0 }
 0x2b1   : > { %v6624_v30 = vpop.f32.mrb[117].mxu1  ;;  %v6557_v17 = vpop.f32.mrb[83].mxu0 }
 0x2b2   : > { %v9630_v24 = vadd.f32 %v6619_v56, %v6555_v14  ;;  %v6625_v38 = vadd.f32 %v6624_v30, %v6623_v12  ;;  %v6558_v48 = vadd.f32 %v6557_v17, %v6556_v6  ;;  %v6626_v45 = vpop.f32.mrb[118].mxu1 }
 0x2b3   : > { %v6627_v53 = vpop.f32.mrb[119].mxu1 }
 0x2b4   : > { %v9632_v51 = vadd.f32 %v6622_v43, %v6558_v48  ;;  %v6628_v61 = vadd.f32 %v6627_v53, %v6626_v45 }
 0x2b6   : > { %v6559_v37 = vpop.f32.mrb[84].mxu0 }
 0x2b7   : > { %v6560_v16 = vpop.f32.mrb[85].mxu0 }
 0x2b8   : > { %v6561_v36 = vadd.f32 %v6560_v16, %v6559_v37  ;;  %v6629_v9 = vpop.f32.mrb[120].mxu1  ;;  %v6562_v47 = vpop.f32.mrb[86].mxu0 }
 0x2b9   : > { %v6630_v40 = vpop.f32.mrb[121].mxu1  ;;  %v6563_v50 = vpop.f32.mrb[87].mxu0 }
 0x2ba   : > { %v9634_v26 = vadd.f32 %v6625_v38, %v6561_v36  ;;  %v6631_v22 = vadd.f32 %v6630_v40, %v6629_v9  ;;  %v6564_v28 = vadd.f32 %v6563_v50, %v6562_v47  ;;  %v6632_v13 = vpop.f32.mrb[122].mxu1 }
 0x2bb   : > { %v6633_v35 = vpop.f32.mrb[123].mxu1 }
 0x2bc   : > { %v9636_v8 = vadd.f32 %v6628_v61, %v6564_v28  ;;  %v6634_v44 = vadd.f32 %v6633_v35, %v6632_v13 }
 0x2be   : > { %v6565_v33 = vpop.f32.mrb[88].mxu0 }
 0x2bf   : > { %v6566_v55 = vpop.f32.mrb[89].mxu0 }
 0x2c0   : > { %v6567_v57 = vadd.f32 %v6566_v55, %v6565_v33  ;;  %v6635_v46 = vpop.f32.mrb[124].mxu1  ;;  %v6568_v0 = vpop.f32.mrb[90].mxu0 }
 0x2c1   : > { %v6636_v63 = vpop.f32.mrb[125].mxu1  ;;  %v6569_v19 = vpop.f32.mrb[91].mxu0 }
 0x2c2   : > { %v9638_v62 = vadd.f32 %v6631_v22, %v6567_v57  ;;  %v6637_v5 = vadd.f32 %v6636_v63, %v6635_v46  ;;  %v6570_v18 = vadd.f32 %v6569_v19, %v6568_v0  ;;  %v6638_v3 = vpop.f32.mrb[126].mxu1 }
 0x2c3   : > { %v6639_v23 = vpop.f32.mrb[127].mxu1 }
 0x2c4   : > { %v9640_v39 = vadd.f32 %v6634_v44, %v6570_v18  ;;  %v6640_v59 = vadd.f32 %v6639_v23, %v6638_v3 }
 0x2c6   : > { %v6571_v27 = vpop.f32.mrb[92].mxu0 }
 0x2c7   : > { %v6572_v32 = vpop.f32.mrb[93].mxu0 }
 0x2c8   : > { %v6573_v11 = vadd.f32 %v6572_v32, %v6571_v27  ;;  %v6574_v49 = vpop.f32.mrb[94].mxu0 }
 0x2c9   : > { %v6575_v52 = vpop.f32.mrb[95].mxu0 }
 0x2ca   : > { %v9642_v7 = vadd.f32 %v6637_v5, %v6573_v11  ;;  %v6576_v56 = vadd.f32 %v6575_v52, %v6574_v49 }
 0x2cc   : > { %v9644_v41 = vadd.f32 %v6640_v59, %v6576_v56 }
 0x2ce   : > { %v6673_v31 = vpop.f32.mrb[96].mxu0 }
 0x2cf   : > { %v6674_v42 = vpop.f32.mrb[97].mxu0 }
 0x2d0   : > { %v6675_v43 = vadd.f32 %v6674_v42, %v6673_v31  ;;  %v6676_v25 = vpop.f32.mrb[98].mxu0 }
 0x2d1   : > { %v6677_v58 = vpop.f32.mrb[99].mxu0 }
 0x2d2   : > { %v6678_v1 = vadd.f32 %v6677_v58, %v6676_v25  ;;  %v7813_v14 = vadd.f32 %v9570_v4, %v6675_v43 }
 0x2d4   : > { %v7819_v12 = vadd.f32 %v9577_v60, %v6678_v1 }
 0x2d6   : > { %v6679_v6 = vpop.f32.mrb[100].mxu0 }
 0x2d7   : > { %v6680_v30 = vpop.f32.mrb[101].mxu0 }
 0x2d8   : > { %v6681_v17 = vadd.f32 %v6680_v30, %v6679_v6  ;;  %v6682_v38 = vpop.f32.mrb[102].mxu0 }
 0x2d9   : > { %v6683_v48 = vpop.f32.mrb[103].mxu0 }
 0x2da   : > { %v6684_v45 = vadd.f32 %v6683_v48, %v6682_v38  ;;  %v7810_v53 = vadd.f32 %v9594_v15, %v6681_v17 }
 0x2dc   : > { %v7816_v61 = vadd.f32 %v9599_v10, %v6684_v45 }
 0x2de   : > { %v6685_v37 = vpop.f32.mrb[104].mxu0 }
 0x2df   : > { %v6686_v16 = vpop.f32.mrb[105].mxu0 }
 0x2e0   : > { %v6687_v36 = vadd.f32 %v6686_v16, %v6685_v37  ;;  %v6688_v9 = vpop.f32.mrb[106].mxu0 }
 0x2e1   : > { %v6689_v47 = vpop.f32.mrb[107].mxu0 }
 0x2e2   : > { %v6690_v40 = vadd.f32 %v6689_v47, %v6688_v9  ;;  %v7825_v4 = vadd.f32 %v9613_v54, %v6687_v36 }
 0x2e4   : > { %v7831_v60 = vadd.f32 %v9615_v21, %v6690_v40 }
 0x2e6   : > { %v6691_v50 = vpop.f32.mrb[108].mxu0 }
 0x2e7   : > { %v6692_v22 = vpop.f32.mrb[109].mxu0 }
 0x2e8   : > { %v6693_v28 = vadd.f32 %v6692_v22, %v6691_v50  ;;  %v7491_v13 = vpop.f32.mrb[80].mxu1  ;;  %v6694_v35 = vpop.f32.mrb[110].mxu0 }
 0x2e9   : > { %v7811_v44 = vadd.f32 %v7810_v53, %v7491_v13  ;;  %v2894_v33 = vpop.f32.mrb[81].mxu1  ;;  %v6695_v15 = vpop.f32.mrb[111].mxu0 }
 0x2ea   : > { %v7814_v55 = vadd.f32 %v7813_v14, %v2894_v33  ;;  %v6696_v10 = vadd.f32 %v6695_v15, %v6694_v35  ;;  %v7492_v57 = vpop.f32.mrb[82].mxu1  ;;  %v7822_v46 = vadd.f32 %v9623_v20, %v6693_v28 }
 0x2eb   : > { %v7817_v0 = vadd.f32 %v7816_v61, %v7492_v57  ;;  %v2897_v63 = vpop.f32.mrb[83].mxu1  ;;  %v2975_v5 = vadd.f32 %v7811_v44, %v9503_v2 }
 0x2ec   : > { %v2973_v19 = vadd.f32 %v7814_v55, %v9503_v2  ;;  %v7820_v54 = vadd.f32 %v7819_v12, %v2897_v63  ;;  %v7828_v21 = vadd.f32 %v9625_v29, %v6696_v10 }
 0x2ed   : > { %v2976_v23 = vadd.f32 %v7817_v0, %v9503_v2  ;;  %v2991_v52 = vmax.f32 %v2975_v5, 0.0 }
 0x2ee   : > { %v2974_v18 = vadd.f32 %v7820_v54, %v9503_v2  ;;  %v6697_v3 = vpop.f32.mrb[112].mxu0  ;;  %v2989_v27 = vmax.f32 %v2973_v19, 0.0 }
 0x2ef   : > { %v6698_v59 = vpop.f32.mrb[113].mxu0  ;;  %v2992_v14 = vmax.f32 %v2976_v23, 0.0 }
 0x2f0   : > { %v2990_v32 = vmax.f32 %v2974_v18, 0.0  ;;  %v6699_v11 = vadd.f32 %v6698_v59, %v6697_v3  ;;  %v7495_v49 = vpop.f32.mrb[84].mxu1  ;;  %v6700_v20 = vpop.f32.mrb[114].mxu0 }
 0x2f1   : > { %v7823_v56 = vadd.f32 %v7822_v46, %v7495_v49  ;;  %v2910_v31 = vpop.f32.mrb[85].mxu1  ;;  %v6701_v42 = vpop.f32.mrb[115].mxu0 }
 0x2f2   : > { %v3005_v43 = vadd.f32 %v2990_v32, %v2989_v27  ;;  %v7826_v25 = vadd.f32 %v7825_v4, %v2910_v31  ;;  %v6702_v29 = vadd.f32 %v6701_v42, %v6700_v20  ;;  %v7496_v58 = vpop.f32.mrb[86].mxu1  ;;  %v7837_v1 = vadd.f32 %v9630_v24, %v6699_v11 }
 0x2f3   : > { %v7829_v12 = vadd.f32 %v7828_v21, %v7496_v58  ;;  %v2913_v6 = vpop.f32.mrb[87].mxu1  ;;  %v2979_v45 = vadd.f32 %v7823_v56, %v9503_v2 }
 0x2f4   : > { %v3006_v30 = vadd.f32 %v3005_v43, %v2991_v52  ;;  %v2977_v17 = vadd.f32 %v7826_v25, %v9503_v2  ;;  %v7832_v38 = vadd.f32 %v7831_v60, %v2913_v6  ;;  %v7843_v48 = vadd.f32 %v9632_v51, %v6702_v29 }
 0x2f5   : > { %v2980_v36 = vadd.f32 %v7829_v12, %v9503_v2  ;;  %v2995_v22 = vmax.f32 %v2979_v45, 0.0 }
 0x2f6   : > { %v2993_v53 = vmax.f32 %v2977_v17, 0.0  ;;  %v3007_v61 = vadd.f32 %v3006_v30, %v2992_v14  ;;  %v2978_v37 = vadd.f32 %v7832_v38, %v9503_v2  ;;  %v6703_v16 = vpop.f32.mrb[116].mxu0 }
 0x2f7   : > { %v6704_v9 = vpop.f32.mrb[117].mxu0  ;;  %v2996_v15 = vmax.f32 %v2980_v36, 0.0 }
 0x2f8   : > { %v3008_v24 = vadd.f32 %v3007_v61, %v2993_v53  ;;  %v2994_v47 = vmax.f32 %v2978_v37, 0.0  ;;  %v6705_v40 = vadd.f32 %v6704_v9, %v6703_v16  ;;  %v7499_v4 = vpop.f32.mrb[88].mxu1  ;;  %v6706_v50 = vpop.f32.mrb[118].mxu0  ;;  %v9677_v61 = vld [vmem:[%s10612_s2] ss:$0 sm:$0xff] }
 0x2f9   : > { %v2926_v28 = vpop.f32.mrb[89].mxu1  ;;  %v6707_v60 = vpop.f32.mrb[119].mxu0 }
 0x2fa   : > { %v3009_v13 = vadd.f32 %v3008_v24, %v2994_v47  ;;  %v7834_v51 = vadd.f32 %v9634_v26, %v6705_v40  ;;  %v7838_v35 = vadd.f32 %v7837_v1, %v2926_v28  ;;  %v6708_v44 = vadd.f32 %v6707_v60, %v6706_v50  ;;  %v7500_v33 = vpop.f32.mrb[90].mxu1 }
 0x2fb   : > { %v2929_v55 = vpop.f32.mrb[91].mxu1 }
 0x2fc   : > { %v3010_v10 = vadd.f32 %v3009_v13, %v2995_v22  ;;  %v7835_v57 = vadd.f32 %v7834_v51, %v7499_v4  ;;  %v2981_v46 = vadd.f32 %v7838_v35, %v9503_v2  ;;  %v7840_v0 = vadd.f32 %v9636_v8, %v6708_v44 }
 0x2fd   : > { %v7844_v63 = vadd.f32 %v7843_v48, %v2929_v55 }
 0x2fe   : > { %v2983_v19 = vadd.f32 %v7835_v57, %v9503_v2  ;;  %v2997_v54 = vmax.f32 %v2981_v46, 0.0  ;;  %v3011_v21 = vadd.f32 %v3010_v10, %v2996_v15  ;;  %v7841_v5 = vadd.f32 %v7840_v0, %v7500_v33  ;;  %v6709_v18 = vpop.f32.mrb[120].mxu0 }
 0x2ff   : > { %v2982_v26 = vadd.f32 %v7844_v63, %v9503_v2  ;;  %v6710_v3 = vpop.f32.mrb[121].mxu0 }
 0x300   : > { %v3012_v23 = vadd.f32 %v3011_v21, %v2997_v54  ;;  %v2984_v59 = vadd.f32 %v7841_v5, %v9503_v2  ;;  %v6711_v27 = vadd.f32 %v6710_v3, %v6709_v18  ;;  %v7503_v32 = vpop.f32.mrb[92].mxu1  ;;  %v6712_v11 = vpop.f32.mrb[122].mxu0  ;;  %v2999_v49 = vmax.f32 %v2983_v19, 0.0 }
 0x301   : > { %v2998_v20 = vmax.f32 %v2982_v26, 0.0  ;;  %v2942_v52 = vpop.f32.mrb[93].mxu1  ;;  %v6713_v8 = vpop.f32.mrb[123].mxu0 }
 0x302   : > { %v7849_v56 = vadd.f32 %v9638_v62, %v6711_v27  ;;  %v6714_v31 = vadd.f32 %v6713_v8, %v6712_v11  ;;  %v7504_v42 = vpop.f32.mrb[94].mxu1  ;;  %v3000_v43 = vmax.f32 %v2984_v59, 0.0 }
 0x303   : > { %v3013_v25 = vadd.f32 %v3012_v23, %v2998_v20  ;;  %v2945_v29 = vpop.f32.mrb[95].mxu1 }
 0x304   : > { %v7850_v58 = vadd.f32 %v7849_v56, %v2942_v52  ;;  %v7855_v1 = vadd.f32 %v9640_v39, %v6714_v31  ;;  %v2229_v39 = vrot.slane %v9575_v34, 4 }
 0x305   : > { %v3014_v14 = vadd.f32 %v3013_v25, %v2999_v49 }
 0x306   : > { %v2985_v12 = vadd.f32 %v7850_v58, %v9503_v2  ;;  %v7856_v6 = vadd.f32 %v7855_v1, %v2945_v29  ;;  %v6715_v30 = vpop.f32.mrb[124].mxu0  ;;  %v2230_v15 = vadd.f32 %v2229_v39, %v9575_v34 }
 0x307   : > { %v3015_v17 = vadd.f32 %v3014_v14, %v3000_v43  ;;  %v6716_v38 = vpop.f32.mrb[125].mxu0 }
 0x308   : > { %v3001_v48 = vmax.f32 %v2985_v12, 0.0  ;;  %v2986_v45 = vadd.f32 %v7856_v6, %v9503_v2  ;;  %v6717_v53 = vadd.f32 %v6716_v38, %v6715_v30  ;;  %v6718_v62 = vpop.f32.mrb[126].mxu0  ;;  %v7555_v37 = vpop.f32.mrb[128].mxu1  ;;  %v2231_v3 = vrot.slane %v2230_v15, 2 }
 0x309   : > { %v6719_v16 = vpop.f32.mrb[127].mxu0  ;;  %v3472_v36 = vadd.f32 %v7555_v37, %v9677_v61  ;;  %v3463_v9 = vpop.f32.mrb[129].mxu1 }
 0x30a   : > { %v3016_v24 = vadd.f32 %v3015_v17, %v3001_v48  ;;  %v3002_v47 = vmax.f32 %v2986_v45, 0.0  ;;  %v7846_v40 = vadd.f32 %v9642_v7, %v6717_v53  ;;  %v6720_v4 = vadd.f32 %v6719_v16, %v6718_v62  ;;  %v7556_v50 = vpop.f32.mrb[130].mxu1 }
 0x30b   : > { %v3528_v22 = vmax.f32 %v3472_v36, 0.0  ;;  %v3464_v28 = vadd.f32 %v9677_v61, %v3463_v9  ;;  %v3475_v60 = vadd.f32 %v7556_v50, %v9677_v61  ;;  %v3466_v13 = vpop.f32.mrb[131].mxu1  ;;  %v2232_v45 = vadd.f32 %v2231_v3, %v2230_v15 }
 0x30c   : > { %v3017_v51 = vadd.f32 %v3016_v24, %v3002_v47  ;;  %v7847_v35 = vadd.f32 %v7846_v40, %v7503_v32  ;;  %v7852_v44 = vadd.f32 %v9644_v41, %v6720_v4  ;;  %v3467_v33 = vadd.f32 %v9677_v61, %v3466_v13  ;;  %v3559_v13 = vld [vmem:[#allocation2 + $0xf] sm:$0xff] }
 0x30d   : > { %3544 = vst [vmem:[#allocation2 + $0x148] sm:$0xff] %v3528_v22  ;;  %v3526_v55 = vmax.f32 %v3464_v28, 0.0  ;;  %v3529_v10 = vmax.f32 %v3475_v60, 0.0  ;;  %v3558_v60 = vld [vmem:[#allocation2 + $0x7] sm:$0xff] }
 0x30e   : > { %v2987_v7 = vadd.f32 %v7847_v35, %v9503_v2  ;;  %v7853_v57 = vadd.f32 %v7852_v44, %v7504_v42  ;;  %v7523_v46 = vpop.f32.mrb[128].mxu0  ;;  %v3527_v0 = vmax.f32 %v3467_v33, 0.0  ;;  %v2233_v44 = vrot.slane %v2232_v45, 1 }
 0x30f   : > { %v3208_v63 = vadd.f32 %v7523_v46, %v9677_v61  ;;  %v3199_v19 = vpop.f32.mrb[129].mxu0  ;;  %3542 = vst [vmem:[#allocation2 + $0x128] sm:$0xff] %v3526_v55  ;;  %3545 = vst [vmem:[#allocation2 + $0x150] sm:$0xff] %v3529_v10  ;;  %v9689_v54 = vpack.c.bf16 %v3529_v10, %v3528_v22 }
 0x310   : > { %v3003_v41 = vmax.f32 %v2987_v7, 0.0  ;;  %v2988_v21 = vadd.f32 %v7853_v57, %v9503_v2  ;;  %v3200_v34 = vadd.f32 %v9677_v61, %v3199_v19  ;;  %v7524_v5 = vpop.f32.mrb[130].mxu0  ;;  %3543 = vst [vmem:[#allocation2 + $0x130] sm:$0xff] %v3527_v0  ;;  %v7559_v18 = vpop.f32.mrb[132].mxu1  ;;  %v9693_v26 = vpack.c.bf16 %v3527_v0, %v3526_v55 }
 0x311   : > { %v3264_v23 = vmax.f32 %v3208_v63, 0.0  ;;  %v3211_v59 = vadd.f32 %v7524_v5, %v9677_v61  ;;  %v3202_v27 = vpop.f32.mrb[131].mxu0  ;;  %v9697_v32 = vadd.f32 %v7559_v18, %v9677_v61  ;;  %v3479_v11 = vpop.f32.mrb[133].mxu1  ;;  %v3578_v5 = vpack.c.bf16 %v3559_v13, %v3558_v60 }
 0x312   : > { %v3018_v49 = vadd.f32 %v3017_v51, %v3003_v41  ;;  %v3004_v20 = vmax.f32 %v2988_v21, 0.0  ;;  %v3262_v52 = vmax.f32 %v3200_v34, 0.0  ;;  %v3203_v2 = vadd.f32 %v9677_v61, %v3202_v27  ;;  %v7560_v8 = vpop.f32.mrb[134].mxu1 }
 0x313   : > { %3280 = vst [vmem:[#allocation2 + $0x48] sm:$0xff] %v3264_v23  ;;  %v3265_v56 = vmax.f32 %v3211_v59, 0.0  ;;  %v3532_v31 = vmax.f32 %v9697_v32, 0.0  ;;  %v9702_v42 = vadd.f32 %v9677_v61, %v3479_v11  ;;  %v9705_v43 = vadd.f32 %v7560_v8, %v9677_v61  ;;  %v3482_v25 = vpop.f32.mrb[135].mxu1  ;;  %v9753_v11 = vld [vmem:[%s10613_s3 + $0x100] sm:$0xff]  }
 0x314   : > { %v3019_v29 = vadd.f32 %v3018_v49, %v3004_v20  ;;  %3278 = vst [vmem:[#allocation2 + $0x28] sm:$0xff] %v3262_v52  ;;  %v3263_v58 = vmax.f32 %v3203_v2, 0.0  ;;  %v9708_v1 = vadd.f32 %v9677_v61, %v3482_v25  ;;  %v9764_v2 = vld [vmem:[%s10613_s3 + $0x148] sm:$0xff]  }
 0x315   : > { %3281 = vst [vmem:[#allocation2 + $0x50] sm:$0xff] %v3265_v56  ;;  %v9710_v14 = vpack.c.bf16 %v3265_v56, %v3264_v23  ;;  %3548 = vst [vmem:[#allocation2 + $0x188] sm:$0xff] %v3532_v31  ;;  %v3530_v12 = vmax.f32 %v9702_v42, 0.0  ;;  %v3533_v6 = vmax.f32 %v9705_v43, 0.0 }
 0x316   : > { %v3020_v30 = vrot.slane %v3019_v29, 4  ;;  %3279 = vst [vmem:[#allocation2 + $0x30] sm:$0xff] %v3263_v58  ;;  %v7527_v17 = vpop.f32.mrb[132].mxu0  ;;  %v9716_v38 = vpack.c.bf16 %v3263_v58, %v3262_v52  ;;  %v3531_v48 = vmax.f32 %v9708_v1, 0.0 }
 0x317   : > { %v3224_v53 = vadd.f32 %v7527_v17, %v9677_v61  ;;  %v3215_v62 = vpop.f32.mrb[133].mxu0  ;;  %3546 = vst [vmem:[#allocation2 + $0x168] sm:$0xff] %v3530_v12  ;;  %3549 = vst [vmem:[#allocation2 + $0x190] sm:$0xff] %v3533_v6  ;;  %v9777_v25 = vpack.c.bf16 %v3533_v6, %v3532_v31 }
 0x318   : > { %v3021_v37 = vadd.f32 %v3020_v30, %v3019_v29  ;;  %v3216_v39 = vadd.f32 %v9677_v61, %v3215_v62  ;;  %v7528_v16 = vpop.f32.mrb[134].mxu0  ;;  %3547 = vst [vmem:[#allocation2 + $0x170] sm:$0xff] %v3531_v48  ;;  %v7563_v36 = vpop.f32.mrb[136].mxu1  ;;  %v9771_v56 = vpack.c.bf16 %v3531_v48, %v3530_v12  ;;  %v2234_v29 = vadd.f32 %v2233_v44, %v2232_v45  ;;  %v9791_v45 = vld [vmem:[%s10613_s3 + $0x108] sm:$0xff]  }
 0x319   : > { %v3268_v9 = vmax.f32 %v3224_v53, 0.0  ;;  %v3227_v24 = vadd.f32 %v7528_v16, %v9677_v61  ;;  %v3218_v47 = vpop.f32.mrb[135].mxu0  ;;  %v9727_v40 = vadd.f32 %v7563_v36, %v9677_v61  ;;  %v3495_v4 = vpop.f32.mrb[137].mxu1  ;;  %v9806_v16 = vld [vmem:[%s10613_s3 + $0x150] sm:$0xff]  }
 0x31a   : > { %v3022_v50 = vrot.slane %v3021_v37, 2  ;;  %v3266_v22 = vmax.f32 %v3216_v39, 0.0  ;;  %v3219_v28 = vadd.f32 %v9677_v61, %v3218_v47  ;;  %v9731_v51 = vadd.f32 %v9677_v61, %v3495_v4  ;;  %v7564_v35 = vpop.f32.mrb[138].mxu1  ;;  %v3562_v46 = vld [vmem:[#allocation2 + $0x47] sm:$0xff] }
 0x31b   : > { %3284 = vst [vmem:[#allocation2 + $0x88] sm:$0xff] %v3268_v9  ;;  %v3269_v33 = vmax.f32 %v3227_v24, 0.0  ;;  %v3536_v15 = vmax.f32 %v9727_v40, 0.0  ;;  %v9735_v55 = vadd.f32 %v7564_v35, %v9677_v61  ;;  %v3498_v10 = vpop.f32.mrb[139].mxu1  ;;  %v3560_v21 = vld [vmem:[#allocation2 + $0x27] sm:$0xff] }
 0x31c   : > { %v3023_v7 = vadd.f32 %v3022_v50, %v3021_v37  ;;  %3282 = vst [vmem:[#allocation2 + $0x68] sm:$0xff] %v3266_v22  ;;  %v3267_v57 = vmax.f32 %v3219_v28, 0.0  ;;  %v3563_v0 = vld [vmem:[#allocation2 + $0x4f] sm:$0xff]  ;;  %v3534_v63 = vmax.f32 %v9731_v51, 0.0  ;;  %v9739_v19 = vadd.f32 %v9677_v61, %v3498_v10  ;;  %v9817_v35 = vld [vmem:[%s10613_s3 + $0x80] sm:$0xff]  }
 0x31d   : > { %3285 = vst [vmem:[#allocation2 + $0x90] sm:$0xff] %v3269_v33  ;;  %v9741_v41 = vpack.c.bf16 %v3563_v0, %v3562_v46  ;;  %v3561_v34 = vld [vmem:[#allocation2 + $0x2f] sm:$0xff]  ;;  %v9743_v18 = vpack.c.bf16 %v3269_v33, %v3268_v9  ;;  %3552 = vst [vmem:[#allocation2 + $0x1c8] sm:$0xff] %v3536_v15  ;;  %v3537_v3 = vmax.f32 %v9735_v55, 0.0 }
 0x31e   : > { %v3024_v23 = vrot.slane %v3023_v7, 1  ;;  %3283 = vst [vmem:[#allocation2 + $0x70] sm:$0xff] %v3267_v57  ;;  %v7531_v59 = vpop.f32.mrb[136].mxu0  ;;  %v9748_v27 = vpack.c.bf16 %v3561_v34, %v3560_v21  ;;  %v9755_v49 = vpack.c.bf16 %v3267_v57, %v3266_v22  ;;  %3550 = vst [vmem:[#allocation2 + $0x1a8] sm:$0xff] %v3534_v63  ;;  %v3535_v8 = vmax.f32 %v9739_v19, 0.0  ;;  %v9830_v46 = vld [vmem:[%s10613_s3 + $0xc8] sm:$0xff]  }
 0x31f   : > { %v3240_v20 = vadd.f32 %v7531_v59, %v9677_v61  ;;  %v3231_v52 = vpop.f32.mrb[137].mxu0  ;;  %7585 = vmatprep.mubr.bf16.mxu0 %v9741_v41  ;;  %3553 = vst [vmem:[#allocation2 + $0x1d0] sm:$0xff] %v3537_v3 }
 0x320   : > { %v3025_v58 = vadd.f32 %v3024_v23, %v3023_v7  ;;  %v3232_v1 = vadd.f32 %v9677_v61, %v3231_v52  ;;  %v7532_v30 = vpop.f32.mrb[138].mxu0  ;;  %3909 = vmatprep.mubr.bf16.mxu1 %v9748_v27  ;;  %v7567_v17 = vpop.f32.mrb[140].mxu1  ;;  %3551 = vst [vmem:[#allocation2 + $0x1b0] sm:$0xff] %v3535_v8  ;;  %v9842_v23 = vld [vmem:[%s10613_s3 + $0x110] sm:$0xff]   ;;  %v9846_v59 = vpack.c.bf16 %v3535_v8, %v3534_v63 }
 0x321   : > { %v3272_v53 = vmax.f32 %v3240_v20, 0.0  ;;  %v3243_v42 = vadd.f32 %v7532_v30, %v9677_v61  ;;  %v3234_v12 = vpop.f32.mrb[139].mxu0  ;;  %3910 = vmatmul.mubr.bf16.vlgmr.msra.gmra.mrb[144].mxu1 %v3578_v5  ;;  %v9783_v32 = vadd.f32 %v7567_v17, %v9677_v61  ;;  %v3511_v31 = vpop.f32.mrb[141].mxu1  ;;  %v9852_v20 = vpack.c.bf16 %v3537_v3, %v3536_v15  ;;  %v9867_v15 = vld [vmem:[%s10613_s3 + $0x88] sm:$0xff]   ;;  %v9875_v8 = vld [vmem:[%s10613_s3 + $0xd0] sm:$0xff]   ;;  %v9890_v17 = vld [vmem:[%s10613_s3 + $0x160] sm:$0xff]  }
 0x322   : > { %v3026_v43 = vadd.f32 %v3025_v58, %v2234_v29  ;;  %v3270_v6 = vmax.f32 %v3232_v1, 0.0  ;;  %v3235_v48 = vadd.f32 %v9677_v61, %v3234_v12  ;;  %3917 = vmatprep.mubr.bf16.mxu1 %v9741_v41  ;;  %6930 = vmatpush3.bf16.msra.mxu1 %v9753_v11  ;;  %v9794_v62 = vadd.f32 %v9677_v61, %v3511_v31  ;;  %v7568_v37 = vpop.f32.mrb[142].mxu1  ;;  %v3566_v57 = vld [vmem:[#allocation2 + $0x87] sm:$0xff]  ;;  %v9859_v58 = vld [vmem:[%s10613_s3 + $0x158] sm:$0xff]   ;;  %v9897_v12 = vld [vmem:[%s10613_s3 + $0x90] sm:$0xff]  }
 0x323   : > { %3288 = vst [vmem:[#allocation2 + $0xc8] sm:$0xff] %v3272_v53  ;;  %v3273_v39 = vmax.f32 %v3243_v42, 0.0  ;;  %6931 = vmatprep.subr.bf16.mxu1 %v9764_v2  ;;  %v3540_v36 = vmax.f32 %v9783_v32, 0.0  ;;  %v9810_v9 = vadd.f32 %v7568_v37, %v9677_v61  ;;  %v3514_v24 = vpop.f32.mrb[143].mxu1  ;;  %v3564_v60 = vld [vmem:[#allocation2 + $0x67] sm:$0xff]  ;;  %10682 = vst [vmem:[#allocation3_spill] sm:$0xff] %v9852_v20 }
 0x324   : > { %v3027_v47 = vmul.f32 0.00390625, %v3026_v43  ;;  %3286 = vst [vmem:[#allocation2 + $0xa8] sm:$0xff] %v3270_v6  ;;  %v3271_v4 = vmax.f32 %v3235_v48, 0.0  ;;  %v3567_v50 = vld [vmem:[#allocation2 + $0x8f] sm:$0xff]  ;;  %v3538_v22 = vmax.f32 %v9794_v62, 0.0  ;;  %v3515_v28 = vadd.f32 %v9677_v61, %v3514_v24  ;;  %v9910_v62 = vld [vmem:[%s10613_s3 + $0xd8] sm:$0xff]  }
 0x325   : > { %3289 = vst [vmem:[#allocation2 + $0xd0] sm:$0xff] %v3273_v39  ;;  %v3565_v13 = vld [vmem:[#allocation2 + $0x6f] sm:$0xff]  ;;  %v9819_v44 = vpack.c.bf16 %v3273_v39, %v3272_v53  ;;  %3556 = vst [vmem:[#allocation2 + $0x208] sm:$0xff] %v3540_v36  ;;  %v3541_v33 = vmax.f32 %v9810_v9, 0.0  ;;  %v9836_v5 = vpack.c.bf16 %v3567_v50, %v3566_v57  ;;  %v9924_v24 = vld [vmem:[%s10613_s3 + $0x120] sm:$0xff]  }
 0x326   : > { %3028 = vst [vmem:[%s9800_s17] sm:$0x1] %v3027_v47  ;;  %3287 = vst [vmem:[#allocation2 + $0xb0] sm:$0xff] %v3271_v4  ;;  %v7535_v10 = vpop.f32.mrb[140].mxu0  ;;  %v9825_v7 = vpack.c.bf16 %v3565_v13, %v3564_v60  ;;  %6932 = vmatpush3.bf16.msra.mxu1 %v9791_v45  ;;  %v9833_v0 = vpack.c.bf16 %v3271_v4, %v3270_v6  ;;  %v3539_v19 = vmax.f32 %v3515_v28, 0.0  ;;  %v9931_v47 = vld [vmem:[%s10613_s3 + $0x168] sm:$0xff]   ;;  %v9938_v32 = vld [vmem:[%s10613_s3 + $0x98] sm:$0xff]  }
 0x327   : > { %3554 = vst [vmem:[#allocation2 + $0x1e8] sm:$0xff] %v3538_v22  ;;  %v3256_v21 = vadd.f32 %v7535_v10, %v9677_v61  ;;  %v3247_v34 = vpop.f32.mrb[141].mxu0  ;;  %6933 = vmatprep.subr.bf16.mxu1 %v9806_v16  ;;  %3557 = vst [vmem:[#allocation2 + $0x210] sm:$0xff] %v3541_v33  ;;  %v9916_v39 = vpack.c.bf16 %v3541_v33, %v3540_v36  ;;  %v9945_v36 = vld [vmem:[%s10613_s3 + $0xe0] sm:$0xff]   ;;  %v9952_v4 = vld [vmem:[%s10613_s3 + $0x128] sm:$0xff]  }
 0x328   : > { %v3248_v52 = vadd.f32 %v9677_v61, %v3247_v34  ;;  %v7536_v29 = vpop.f32.mrb[142].mxu0  ;;  %7586 = vmatmul.mubr.bf16.vlgmr.msra.gmra.mrb[144].mxu0 %v9825_v7  ;;  %3555 = vst [vmem:[#allocation2 + $0x1f0] sm:$0xff] %v3539_v19  ;;  %v9902_v43 = vpack.c.bf16 %v3539_v19, %v3538_v22  ;;  %v9964_v60 = vld [vmem:[%s10613_s3 + $0xa0] sm:$0xff]   ;;  %v9972_v10 = vld [vmem:[%s10613_s3 + $0xe8] sm:$0xff]   ;;  %v9980_v19 = vld [vmem:[%s10613_s3 + $0x130] sm:$0xff]  }
 0x329   : > { %v3276_v51 = vmax.f32 %v3256_v21, 0.0  ;;  %v3259_v63 = vadd.f32 %v7536_v29, %v9677_v61  ;;  %6850 = vmatpush3.bf16.msra.mxu0 %v9817_v35  ;;  %v3250_v40 = vpop.f32.mrb[143].mxu0  ;;  %7589 = vmatprep.mubr.bf16.mxu0 %v9836_v5  ;;  %10684 = vst [vmem:[#allocation5_spill] sm:$0xff] %v9916_v39  ;;  %v9987_v21 = vld [vmem:[%s10613_s3 + $0x178] sm:$0xff]   ;;  %v9994_v34 = vld [vmem:[%s10613_s3 + $0xa8] sm:$0xff]  }
 0x32a   : > { %v3274_v55 = vmax.f32 %v3248_v52, 0.0  ;;  %v3251_v3 = vadd.f32 %v9677_v61, %v3250_v40  ;;  %3918 = vmatmul.mubr.bf16.gmra.mrb[148].mxu1 %v9748_v27  ;;  %6851 = vmatprep.subr.bf16.mxu0 %v9830_v46  ;;  %v9884_v61 = vld [vmem:[%s10613_s3 + $0x118] sm:$0xff]   ;;  %10683 = vst [vmem:[#allocation4_spill] sm:$0xff] %v9902_v43  ;;  %v3570_v48 = vld [vmem:[#allocation2 + $0xc7] sm:$0xff]  ;;  %v10001_v52 = vld [vmem:[%s10613_s3 + $0xf0] sm:$0xff]  }
 0x32b   : > { %3292 = vst [vmem:[#allocation2 + $0x108] sm:$0xff] %v3276_v51  ;;  %v9877_v1 = vmax.f32 %v3259_v63, 0.0  ;;  %3925 = vmatprep.mubr.bf16.mxu1 %v9825_v7  ;;  %6934 = vmatpush3.bf16.msra.mxu1 %v9842_v23  ;;  %v3568_v53 = vld [vmem:[#allocation2 + $0xa7] sm:$0xff]  ;;  %v10008_v63 = vld [vmem:[%s10613_s3 + $0x138] sm:$0xff]  }
 0x32c   : > { %3290 = vst [vmem:[#allocation2 + $0xe8] sm:$0xff] %v3274_v55  ;;  %v3275_v27 = vmax.f32 %v3251_v3, 0.0  ;;  %v3571_v30 = vld [vmem:[#allocation2 + $0xcf] sm:$0xff]  ;;  %6935 = vmatprep.subr.bf16.mxu1 %v9859_v58  ;;  %v3576_v29 = vld [vmem:[#allocation2 + $0x127] sm:$0xff]  ;;  %10685 = vst [vmem:[#allocation6_spill] sm:$0xff] %v10008_v63 }
 0x32d   : > { %3293 = vst [vmem:[#allocation2 + $0x110] sm:$0xff] %v9877_v1  ;;  %6852 = vmatpush3.bf16.msra.mxu0 %v9867_v15  ;;  %v3569_v42 = vld [vmem:[#allocation2 + $0xaf] sm:$0xff]  ;;  %v9900_v31 = vpack.c.bf16 %v9877_v1, %v3276_v51  ;;  %v9918_v9 = vpack.c.bf16 %v3571_v30, %v3570_v48  ;;  %v8317_v3 = vld [vmem:[%s10614_s4] sm:$0xff]  }
 0x32e   : > { %3291 = vst [vmem:[#allocation2 + $0xf0] sm:$0xff] %v3275_v27  ;;  %6853 = vmatprep.subr.bf16.mxu0 %v9875_v8  ;;  %v9905_v6 = vpack.c.bf16 %v3569_v42, %v3568_v53  ;;  %v9912_v37 = vpack.c.bf16 %v3275_v27, %v3274_v55  ;;  %v3577_v51 = vld [vmem:[#allocation2 + $0x12f] sm:$0xff]  ;;  %v10023_v55 = vld [vmem:[%s10613_s3 + $0xf8] sm:$0xff]   ;;  %v10042_v30 = vld [vmem:[%s10614_s4 + $0x40] sm:$0xff]  }
 0x32f   : > { %6936 = vmatpush3.bf16.msra.mxu1 %v9884_v61  ;;  %v10018_v40 = vpack.c.bf16 %v3577_v51, %v3576_v29  ;;  %v10035_v27 = vld [vmem:[%s10613_s3 + $0xb8] sm:$0xff]   ;;  %v8318_v53 = vld [vmem:[#allocation2] sm:$0xff]  ;;  %v10062_v48 = vld [vmem:[%s10614_s4 + $0x50] sm:$0xff]  }
 0x330   : > { %7590 = vmatmul.mubr.bf16.gmra.mrb[148].mxu0 %v9905_v6  ;;  %6937 = vmatprep.subr.bf16.mxu1 %v9890_v17  ;;  %v10045_v42 = vpack.c.bf16 %v8318_v53, %v8318_v53  ;;  %v4422_v29 = vld [vmem:[#allocation2 + $0x9] sm:$0xff]  ;;  %v4423_v51 = vld [vmem:[#allocation2 + $0x11] sm:$0xff] }
 0x331   : > { %6854 = vmatpush3.bf16.msra.mxu0 %v9897_v12  ;;  %7593 = vmatprep.mubr.bf16.mxu0 %v9918_v9  ;;  %v4442_v53 = vpack.c.bf16 %v4423_v51, %v4422_v29  ;;  %v4427_v39 = vld [vmem:[#allocation2 + $0x51] sm:$0xff]  ;;  %v8319_v29 = vld [vmem:[%s10614_s4 + $0x8] sm:$0xff]  }
 0x332   : > { %3926 = vmatmul.mubr.bf16.gmra.mrb[152].mxu1 %v9741_v41  ;;  %6855 = vmatprep.subr.bf16.mxu0 %v9910_v62  ;;  %v9958_v41 = vld [vmem:[%s10613_s3 + $0x170] sm:$0xff]   ;;  %v3574_v33 = vld [vmem:[#allocation2 + $0x107] sm:$0xff]  ;;  %10686 = vst [vmem:[#allocation7_spill] sm:$0xff] %v10045_v42 }
 0x333   : > { %3933 = vmatprep.mubr.bf16.mxu1 %v9836_v5  ;;  %6938 = vmatpush3.bf16.msra.mxu1 %v9924_v24  ;;  %v3572_v22 = vld [vmem:[#allocation2 + $0xe7] sm:$0xff]  ;;  %v8320_v51 = vld [vmem:[%s10614_s4 + $0x10] sm:$0xff]  }
 0x334   : > { %v3575_v50 = vld [vmem:[#allocation2 + $0x10f] sm:$0xff]  ;;  %6939 = vmatprep.subr.bf16.mxu1 %v9931_v47 }
 0x335   : > { %6856 = vmatpush3.bf16.msra.mxu0 %v9938_v32  ;;  %v3573_v28 = vld [vmem:[#allocation2 + $0xef] sm:$0xff]  ;;  %v9974_v57 = vpack.c.bf16 %v3575_v50, %v3574_v33  ;;  %v10070_v50 = vld [vmem:[%s10614_s4 + $0x58] sm:$0xff]  }
 0x336   : > { %6857 = vmatprep.subr.bf16.mxu0 %v9945_v36  ;;  %v9967_v13 = vpack.c.bf16 %v3573_v28, %v3572_v22  ;;  %v4424_v22 = vld [vmem:[#allocation2 + $0x29] sm:$0xff]  ;;  %v4425_v28 = vld [vmem:[#allocation2 + $0x31] sm:$0xff] }
 0x337   : > { %6940 = vmatpush3.bf16.msra.mxu1 %v9952_v4  ;;  %v10098_v33 = vld [vmem:[%s10614_s4 + $0x70] sm:$0xff]  }
 0x338   : > { %7594 = vmatmul.mubr.bf16.gmra.mrb[152].mxu0 %v9967_v13  ;;  %6941 = vmatprep.subr.bf16.mxu1 %v9958_v41  ;;  %v4431_v43 = vld [vmem:[#allocation2 + $0x91] sm:$0xff] }
 0x339   : > { %6858 = vmatpush3.bf16.msra.mxu0 %v9964_v60  ;;  %7597 = vmatprep.mubr.bf16.mxu0 %v9974_v57  ;;  %v4437_v20 = vld [vmem:[#allocation2 + $0xf1] sm:$0xff] }
 0x33a   : > { %3934 = vmatmul.mubr.bf16.gmra.mrb[156].mxu1 %v9825_v7  ;;  %6859 = vmatprep.subr.bf16.mxu0 %v9972_v10  ;;  %v10015_v7 = vld [vmem:[%s10613_s3 + $0xb0] sm:$0xff]  }
 0x33b   : > { %3941 = vmatprep.mubr.bf16.mxu1 %v9905_v6  ;;  %6942 = vmatpush3.bf16.msra.mxu1 %v9980_v19 }
 0x33c   : > { %6943 = vmatprep.subr.bf16.mxu1 %v9987_v21 }
 0x33d   : > { %6860 = vmatpush3.bf16.msra.mxu0 %v9994_v34 }
 0x33e   : > { %6861 = vmatprep.subr.bf16.mxu0 %v10001_v52 }
 0x33f   : > { %6944 = vmatpush3.bf16.msra.mxu1 %v10008_v63  ;;  %v8322_v63 = vld [vmem:[%s10614_s4 + $0x20] sm:$0xff]  }
 0x340   : > { %7598 = vmatmul.mubr.bf16.gmra.mrb[156].mxu0 %v10018_v40  ;;  %7665 = vmatprep.subr.bf16.mxu1 %v8317_v3 }
 0x341   : > { %6862 = vmatpush3.bf16.msra.mxu0 %v10015_v7  ;;  %4164 = vmatprep.mubr.bf16.mxu0 %v9716_v38 }
 0x342   : > { %3942 = vmatmul.mubr.bf16.gmra.mrb[160].mxu1 %v9836_v5  ;;  %6863 = vmatprep.subr.bf16.mxu0 %v10023_v55  ;;  %v10052_v5 = vld [vmem:[%s10614_s4 + $0x48] sm:$0xff]  }
 0x343   : > { %3949 = vmatprep.mubr.bf16.mxu1 %v9918_v9 }
 0x345   : > { %6864 = vmatpush3.bf16.msra.mxu0 %v10035_v27 }
 0x346   : > { %7601 = vmatprep.subr.bf16.mxu0 %v10042_v30 }
 0x348   : > { %4165 = vmatmul.mubr.bf16.vlgmr.msra.gmra.mrb[160].mxu0 %v10045_v42  ;;  %v4426_v42 = vld [vmem:[#allocation2 + $0x49] sm:$0xff] }
 0x349   : > { %7602 = vmatpush3.bf16.msra.mxu0 %v10042_v30  ;;  %4172 = vmatprep.mubr.bf16.mxu0 %v9710_v14 }
 0x34a   : > { %3950 = vmatmul.mubr.bf16.gmra.mrb[164].mxu1 %v9905_v6  ;;  %7603 = vmatprep.subr.bf16.mxu0 %v10052_v5  ;;  %v10080_v6 = vld [vmem:[%s10614_s4 + $0x60] sm:$0xff]  }
 0x34b   : > { %3957 = vmatprep.mubr.bf16.mxu1 %v9967_v13 }
 0x34d   : > { %7604 = vmatpush3.bf16.msra.mxu0 %v10052_v5 }
 0x34e   : > { %7605 = vmatprep.subr.bf16.mxu0 %v10062_v48 }
 0x350   : > { %4173 = vmatmul.mubr.bf16.gmra.mrb[164].mxu0 %v9716_v38  ;;  %v10088_v38 = vld [vmem:[%s10614_s4 + $0x68] sm:$0xff]  }
 0x351   : > { %4180 = vmatprep.mubr.bf16.mxu0 %v9755_v49  ;;  %7606 = vmatpush3.bf16.msra.mxu0 %v10062_v48 }
 0x352   : > { %3958 = vmatmul.mubr.bf16.gmra.mrb[168].mxu1 %v9918_v9  ;;  %7607 = vmatprep.subr.bf16.mxu0 %v10070_v50  ;;  %v4443_v9 = vpack.c.bf16 %v4425_v28, %v4424_v22  ;;  %v10109_v22 = vpack.c.bf16 %v4427_v39, %v4426_v42  ;;  %v10116_v28 = vld [vmem:[%s10614_s4 + $0x80] sm:$0xff]   ;;  %v4428_v39 = vld [vmem:[#allocation2 + $0x69] sm:$0xff]  ;;  %v4429_v42 = vld [vmem:[#allocation2 + $0x71] sm:$0xff] }
 0x353   : > { %3965 = vmatprep.mubr.bf16.mxu1 %v9974_v57 }
 0x355   : > { %7608 = vmatpush3.bf16.msra.mxu0 %v10070_v50 }
 0x356   : > { %7609 = vmatprep.subr.bf16.mxu0 %v10080_v6 }
 0x358   : > { %4181 = vmatmul.mubr.bf16.gmra.mrb[168].mxu0 %v9710_v14 }
 0x359   : > { %4188 = vmatprep.mubr.bf16.mxu0 %v9743_v18  ;;  %7610 = vmatpush3.bf16.msra.mxu0 %v10080_v6 }
 0x35a   : > { %3966 = vmatmul.mubr.bf16.gmra.mrb[172].mxu1 %v9967_v13  ;;  %7611 = vmatprep.subr.bf16.mxu0 %v10088_v38  ;;  %v10105_v13 = vld [vmem:[%s10614_s4 + $0x78] sm:$0xff]  }
 0x35b   : > { %4612 = vmatprep.mubr.bf16.mxu1 %v4443_v9 }
 0x35d   : > { %7612 = vmatpush3.bf16.msra.mxu0 %v10088_v38 }
 0x35e   : > { %7613 = vmatprep.subr.bf16.mxu0 %v10098_v33 }
 0x360   : > { %4189 = vmatmul.mubr.bf16.gmra.mrb[172].mxu0 %v9755_v49 }
 0x361   : > { %4196 = vmatprep.mubr.bf16.mxu0 %v9833_v0  ;;  %7614 = vmatpush3.bf16.msra.mxu0 %v10098_v33 }
 0x362   : > { %4613 = vmatmul.mubr.bf16.vlgmr.msra.gmra.mrb[176].mxu1 %v4442_v53  ;;  %7615 = vmatprep.subr.bf16.mxu0 %v10105_v13  ;;  %v8321_v53 = vld [vmem:[%s10614_s4 + $0x18] sm:$0xff]  }
 0x363   : > { %4620 = vmatprep.mubr.bf16.mxu1 %v10109_v22  ;;  %7666 = vmatpush3.bf16.msra.mxu1 %v8317_v3  ;;  %v10129_v3 = vpack.c.bf16 %v4429_v42, %v4428_v39  ;;  %v8323_v39 = vld [vmem:[%s10614_s4 + $0x28] sm:$0xff]  }
 0x364   : > { %7667 = vmatprep.subr.bf16.mxu1 %v8319_v29  ;;  %v4432_v42 = vld [vmem:[#allocation2 + $0xa9] sm:$0xff] }
 0x365   : > { %7616 = vmatpush3.bf16.msra.mxu0 %v10105_v13 }
 0x366   : > { %7633 = vmatprep.subr.bf16.mxu0 %v10116_v28 }
 0x367   : > { %7668 = vmatpush3.bf16.msra.mxu1 %v8319_v29  ;;  %v4430_v29 = vld [vmem:[#allocation2 + $0x89] sm:$0xff] }
 0x368   : > { %4197 = vmatmul.mubr.bf16.gmra.mrb[176].mxu0 %v9743_v18  ;;  %7669 = vmatprep.subr.bf16.mxu1 %v8320_v51 }
 0x369   : > { %4204 = vmatprep.mubr.bf16.mxu0 %v9819_v44 }
 0x36a   : > { %4621 = vmatmul.mubr.bf16.gmra.mrb[180].mxu1 %v4443_v9  ;;  %v10140_v9 = vpack.c.bf16 %v4431_v43, %v4430_v29  ;;  %v8324_v43 = vld [vmem:[%s10614_s4 + $0x30] sm:$0xff]  }
 0x36b   : > { %4628 = vmatprep.mubr.bf16.mxu1 %v10129_v3  ;;  %7670 = vmatpush3.bf16.msra.mxu1 %v8320_v51  ;;  %v4433_v51 = vld [vmem:[#allocation2 + $0xb1] sm:$0xff]  ;;  %v4434_v29 = vld [vmem:[#allocation2 + $0xc9] sm:$0xff] }
 0x36c   : > { %7671 = vmatprep.subr.bf16.mxu1 %v8321_v53 }
 0x36f   : > { %7672 = vmatpush3.bf16.msra.mxu1 %v8321_v53  ;;  %v10152_v53 = vpack.c.bf16 %v4433_v51, %v4432_v42  ;;  %v8326_v42 = vld [vmem:[%s10613_s3 + $0xc0] sm:$0xff]  }
 0x370   : > { %4205 = vmatmul.mubr.bf16.gmra.mrb[180].mxu0 %v9833_v0  ;;  %7673 = vmatprep.subr.bf16.mxu1 %v8322_v63 }
 0x371   : > { %4212 = vmatprep.mubr.bf16.mxu0 %v9912_v37 }
 0x372   : > { %4629 = vmatmul.mubr.bf16.gmra.mrb[184].mxu1 %v10109_v22 }
 0x373   : > { %4636 = vmatprep.mubr.bf16.mxu1 %v10140_v9  ;;  %7674 = vmatpush3.bf16.msra.mxu1 %v8322_v63  ;;  %v8325_v63 = vld [vmem:[%s10614_s4 + $0x38] sm:$0xff]  }
 0x374   : > { %7675 = vmatprep.subr.bf16.mxu1 %v8323_v39 }
 0x377   : > { %7676 = vmatpush3.bf16.msra.mxu1 %v8323_v39  ;;  %v4435_v39 = vld [vmem:[#allocation2 + $0xd1] sm:$0xff] }
 0x378   : > { %4213 = vmatmul.mubr.bf16.gmra.mrb[184].mxu0 %v9819_v44  ;;  %7677 = vmatprep.subr.bf16.mxu1 %v8324_v43  ;;  %v10164_v51 = vpack.c.bf16 %v4435_v39, %v4434_v29  ;;  %v10183_v29 = vld [vmem:[%s10614_s4 + $0x90] sm:$0xff]  }
 0x379   : > { %4220 = vmatprep.mubr.bf16.mxu0 %v9900_v31  ;;  %10688 = vst [vmem:[#allocation9_spill] sm:$0xff] %v10183_v29  ;;  %v4439_v39 = vld [vmem:[#allocation2 + $0x111] sm:$0xff] }
 0x37a   : > { %4637 = vmatmul.mubr.bf16.gmra.mrb[188].mxu1 %v10129_v3 }
 0x37b   : > { %4644 = vmatprep.mubr.bf16.mxu1 %v10152_v53  ;;  %7678 = vmatpush3.bf16.msra.mxu1 %v8324_v43  ;;  %v4436_v43 = vld [vmem:[#allocation2 + $0xe9] sm:$0xff] }
 0x37c   : > { %7679 = vmatprep.subr.bf16.mxu1 %v8325_v63 }
 0x37f   : > { %7680 = vmatpush3.bf16.msra.mxu1 %v8325_v63  ;;  %v10171_v63 = vld [vmem:[%s10614_s4 + $0x88] sm:$0xff]  }
 0x380   : > { %4221 = vmatmul.mubr.bf16.gmra.mrb[188].mxu0 %v9912_v37  ;;  %7089 = vmatprep.subr.bf16.mxu1 %v8326_v42  ;;  %10687 = vst [vmem:[#allocation8_spill] sm:$0xff] %v10171_v63  ;;  %v10203_v42 = vld [vmem:[%s10614_s4 + $0xa0] sm:$0xff]  }
 0x381   : > { %7617 = vmatprep.mubr.bf16.mxu0 %v9710_v14  ;;  %v10176_v14 = vpack.c.bf16 %v4437_v20, %v4436_v43  ;;  %v4936_v43 = vld [vmem:[#allocation2 + $0x14f] sm:$0xff] }
 0x382   : > { %4645 = vmatmul.mubr.bf16.gmra.mrb[192].mxu1 %v10140_v9 }
 0x383   : > { %4652 = vmatprep.mubr.bf16.mxu1 %v10164_v51 }
 0x388   : > { %7618 = vmatmul.mubr.bf16.vlgmr.msra.gmra.mrb[144].mxu0 %v9755_v49  ;;  %v4438_v49 = vld [vmem:[#allocation2 + $0x109] sm:$0xff] }
 0x389   : > { %7634 = vmatpush3.bf16.msra.mxu0 %v10116_v28  ;;  %7621 = vmatprep.mubr.bf16.mxu0 %v9743_v18  ;;  %v10191_v18 = vld [vmem:[%s10614_s4 + $0x98] sm:$0xff]   ;;  %v10196_v20 = vpack.c.bf16 %v4439_v39, %v4438_v49  ;;  %v10223_v39 = vld [vmem:[%s10614_s4 + $0xb0] sm:$0xff]  }
 0x38a   : > { %4653 = vmatmul.mubr.bf16.gmra.mrb[196].mxu1 %v10152_v53  ;;  %7635 = vmatprep.subr.bf16.mxu0 %v10171_v63  ;;  %10689 = vst [vmem:[#allocation10_spill] sm:$0xff] %v10191_v18  ;;  %10690 = vst [vmem:[#allocation11_spill] sm:$0xff] %v10223_v39 }
 0x38b   : > { %4660 = vmatprep.mubr.bf16.mxu1 %v10176_v14 }
 0x38d   : > { %7636 = vmatpush3.bf16.msra.mxu0 %v10171_v63  ;;  %v4940_v63 = vld [vmem:[#allocation2 + $0x18f] sm:$0xff] }
 0x38e   : > { %7637 = vmatprep.subr.bf16.mxu0 %v10183_v29 }
 0x390   : > { %7622 = vmatmul.mubr.bf16.gmra.mrb[148].mxu0 %v9833_v0  ;;  %v4935_v0 = vld [vmem:[#allocation2 + $0x147] sm:$0xff] }
 0x391   : > { %7638 = vmatpush3.bf16.msra.mxu0 %v10183_v29  ;;  %7625 = vmatprep.mubr.bf16.mxu0 %v9819_v44  ;;  %v10211_v44 = vld [vmem:[%s10614_s4 + $0xa8] sm:$0xff]   ;;  %v10216_v49 = vpack.c.bf16 %v4936_v43, %v4935_v0  ;;  %v10233_v0 = vld [vmem:[%s10614_s4 + $0xb8] sm:$0xff]  }
 0x392   : > { %4661 = vmatmul.mubr.bf16.gmra.mrb[200].mxu1 %v10164_v51  ;;  %7639 = vmatprep.subr.bf16.mxu0 %v10191_v18  ;;  %v4938_v29 = vld [vmem:[#allocation2 + $0x16f] sm:$0xff] }
 0x393   : > { %4668 = vmatprep.mubr.bf16.mxu1 %v10196_v20 }
 0x395   : > { %7640 = vmatpush3.bf16.msra.mxu0 %v10191_v18  ;;  %v4937_v18 = vld [vmem:[#allocation2 + $0x167] sm:$0xff] }
 0x396   : > { %7641 = vmatprep.subr.bf16.mxu0 %v10203_v42 }
 0x398   : > { %7626 = vmatmul.mubr.bf16.gmra.mrb[152].mxu0 %v9912_v37  ;;  %v4939_v37 = vld [vmem:[#allocation2 + $0x187] sm:$0xff] }
 0x399   : > { %7642 = vmatpush3.bf16.msra.mxu0 %v10203_v42  ;;  %7629 = vmatprep.mubr.bf16.mxu0 %v9900_v31  ;;  %v10228_v31 = vpack.c.bf16 %v4938_v29, %v4937_v18  ;;  %v10235_v43 = vpack.c.bf16 %v4940_v63, %v4939_v37  ;;  %v4941_v29 = vld [vmem:[#allocation2 + $0x1a7] sm:$0xff]  ;;  %v4942_v18 = vld [vmem:[#allocation2 + $0x1af] sm:$0xff] }
 0x39a   : > { %4669 = vmatmul.mubr.bf16.gmra.mrb[204].mxu1 %v10176_v14  ;;  %7643 = vmatprep.subr.bf16.mxu0 %v10211_v44  ;;  %v4943_v63 = vld [vmem:[#allocation2 + $0x1c7] sm:$0xff]  ;;  %v4944_v37 = vld [vmem:[#allocation2 + $0x1cf] sm:$0xff] }
 0x39b   : > { %7681 = vmatprep.mubr.bf16.mxu1 %v10216_v49 }
 0x39d   : > { %7644 = vmatpush3.bf16.msra.mxu0 %v10211_v44 }
 0x39e   : > { %7645 = vmatprep.subr.bf16.mxu0 %v10223_v39 }
 0x3a0   : > { %7630 = vmatmul.mubr.bf16.gmra.mrb[156].mxu0 %v9693_v26 }
 0x3a1   : > { %7646 = vmatpush3.bf16.msra.mxu0 %v10223_v39  ;;  %7649 = vmatprep.mubr.bf16.mxu0 %v10109_v22  ;;  %v8327_v22 = vld [vmem:[%s10613_s3 + $0x40] sm:$0xff]   ;;  %v10249_v39 = vpack.c.bf16 %v4942_v18, %v4941_v29  ;;  %v8329_v29 = vld [vmem:[%s10613_s3 + $0x48] sm:$0xff]  }
 0x3a2   : > { %7682 = vmatmul.mubr.bf16.vlgmr.msra.gmra.mrb[208].mxu1 %v10228_v31  ;;  %7647 = vmatprep.subr.bf16.mxu0 %v10233_v0  ;;  %v4948_v18 = vld [vmem:[#allocation2 + $0x20f] sm:$0xff] }
 0x3a3   : > { %7090 = vmatpush3.bf16.msra.mxu1 %v9817_v35  ;;  %7685 = vmatprep.mubr.bf16.mxu1 %v10235_v43  ;;  %v10252_v35 = vpack.c.bf16 %v4944_v37, %v4943_v63  ;;  %v8331_v63 = vld [vmem:[%s10613_s3 + $0x50] sm:$0xff]  }
 0x3a4   : > { %7091 = vmatprep.subr.bf16.mxu1 %v9830_v46  ;;  %v8328_v46 = vld [vmem:[%s10613_s3] sm:$0xff]  }
 0x3a5   : > { %7648 = vmatpush3.bf16.msra.mxu0 %v10233_v0 }
 0x3a6   : > { %7025 = vmatprep.subr.bf16.mxu0 %v8327_v22  ;;  %v8333_v22 = vld [vmem:[%s10613_s3 + $0x58] sm:$0xff]  }
 0x3a7   : > { %7092 = vmatpush3.bf16.msra.mxu1 %v9867_v15  ;;  %v4945_v15 = vld [vmem:[#allocation2 + $0x1e7] sm:$0xff] }
 0x3a8   : > { %7650 = vmatmul.mubr.bf16.vlgmr.msra.gmra.mrb[144].mxu0 %v10129_v3  ;;  %7093 = vmatprep.subr.bf16.mxu1 %v9875_v8  ;;  %v4946_v8 = vld [vmem:[#allocation2 + $0x1ef] sm:$0xff]  ;;  %v4947_v3 = vld [vmem:[#allocation2 + $0x207] sm:$0xff] }
 0x3a9   : > { %7026 = vmatpush3.bf16.msra.mxu0 %v8328_v46  ;;  %7653 = vmatprep.mubr.bf16.mxu0 %v10140_v9  ;;  %v8330_v9 = vld [vmem:[%s10613_s3 + $0x8] sm:$0xff]   ;;  %v10273_v37 = vpack.c.bf16 %v4946_v8, %v4945_v15  ;;  %v8339_v15 = vld [vmem:[%s10613_s3 + $0x70] sm:$0xff]  }
 0x3aa   : > { %7686 = vmatmul.mubr.bf16.gmra.mrb[212].mxu1 %v10249_v39  ;;  %7027 = vmatprep.subr.bf16.mxu0 %v8329_v29  ;;  %v5155_v29 = vld [vmem:[#allocation2 + $0x108] sm:$0xff] }
 0x3ab   : > { %7094 = vmatpush3.bf16.msra.mxu1 %v9897_v12  ;;  %7689 = vmatprep.mubr.bf16.mxu1 %v10252_v35  ;;  %v10276_v12 = vpack.c.bf16 %v4948_v18, %v4947_v3  ;;  %v8341_v3 = vld [vmem:[%s10613_s3 + $0x78] sm:$0xff]  }
 0x3ac   : > { %7095 = vmatprep.subr.bf16.mxu1 %v9910_v62  ;;  %v8332_v62 = vld [vmem:[%s10613_s3 + $0x10] sm:$0xff]  }
 0x3ad   : > { %7028 = vmatpush3.bf16.msra.mxu0 %v8330_v9  ;;  %v5419_v9 = vld [vmem:[#allocation2 + $0x189] sm:$0xff] }
 0x3ae   : > { %7029 = vmatprep.subr.bf16.mxu0 %v8331_v63  ;;  %v5420_v63 = vld [vmem:[#allocation2 + $0x191] sm:$0xff] }
 0x3af   : > { %7096 = vmatpush3.bf16.msra.mxu1 %v9938_v32  ;;  %v4949_v32 = vld [vmem:[#allocation2 + $0x227] sm:$0xff] }
 0x3b0   : > { %7654 = vmatmul.mubr.bf16.gmra.mrb[148].mxu0 %v10152_v53  ;;  %7097 = vmatprep.subr.bf16.mxu1 %v9945_v36  ;;  %v4950_v36 = vld [vmem:[#allocation2 + $0x22f] sm:$0xff]  ;;  %v8334_v53 = vld [vmem:[%s10613_s3 + $0x18] sm:$0xff]  }
 0x3b1   : > { %7030 = vmatpush3.bf16.msra.mxu0 %v8332_v62  ;;  %7657 = vmatprep.mubr.bf16.mxu0 %v10164_v51  ;;  %v8335_v51 = vld [vmem:[%s10613_s3 + $0x60] sm:$0xff]   ;;  %v4960_v46 = vpack.c.bf16 %v4950_v36, %v4949_v32  ;;  %v5435_v32 = vpack.c.bf16 %v5420_v63, %v5419_v9 }
 0x3b2   : > { %7690 = vmatmul.mubr.bf16.gmra.mrb[216].mxu1 %v10273_v37  ;;  %7031 = vmatprep.subr.bf16.mxu0 %v8333_v22 }
 0x3b3   : > { %7098 = vmatpush3.bf16.msra.mxu1 %v9964_v60  ;;  %7693 = vmatprep.mubr.bf16.mxu1 %v10276_v12  ;;  %v8336_v60 = vld [vmem:[%s10613_s3 + $0x20] sm:$0xff]  }
 0x3b4   : > { %7099 = vmatprep.subr.bf16.mxu1 %v9972_v10  ;;  %v8337_v10 = vld [vmem:[%s10613_s3 + $0x68] sm:$0xff]  }
 0x3b5   : > { %7032 = vmatpush3.bf16.msra.mxu0 %v8334_v53  ;;  %v10698_v53 = vld [vmem:[#allocation11_spill] sm:$0xff] }
 0x3b6   : > { %7033 = vmatprep.subr.bf16.mxu0 %v8335_v51 }
 0x3b7   : > { %7100 = vmatpush3.bf16.msra.mxu1 %v9994_v34  ;;  %v4440_v34 = vld [vmem:[#allocation2 + $0x129] sm:$0xff] }
 0x3b8   : > { %7658 = vmatmul.mubr.bf16.gmra.mrb[152].mxu0 %v10176_v14  ;;  %7101 = vmatprep.subr.bf16.mxu1 %v10001_v52  ;;  %v4441_v14 = vld [vmem:[#allocation2 + $0x131] sm:$0xff]  ;;  %v8338_v52 = vld [vmem:[%s10613_s3 + $0x28] sm:$0xff]  }
 0x3b9   : > { %7034 = vmatpush3.bf16.msra.mxu0 %v8336_v60  ;;  %7661 = vmatprep.mubr.bf16.mxu0 %v10196_v20  ;;  %v10316_v8 = vpack.c.bf16 %v4441_v14, %v4440_v34  ;;  %v5422_v34 = vld [vmem:[#allocation2 + $0x1b1] sm:$0xff] }
 0x3ba   : > { %7694 = vmatmul.mubr.bf16.gmra.mrb[220].mxu1 %v4960_v46  ;;  %7035 = vmatprep.subr.bf16.mxu0 %v8337_v10  ;;  %v5421_v10 = vld [vmem:[#allocation2 + $0x1a9] sm:$0xff] }
 0x3bb   : > { %7102 = vmatpush3.bf16.msra.mxu1 %v10015_v7  ;;  %5217 = vmatprep.mubr.bf16.mxu1 %v9693_v26  ;;  %v5175_v7 = vpack.c.bf16 %v9877_v1, %v5155_v29  ;;  %v8342_v1 = vld [vmem:[%s10613_s3 + $0x38] sm:$0xff]  }
 0x3bc   : > { %7103 = vmatprep.subr.bf16.mxu1 %v10023_v55  ;;  %v8340_v55 = vld [vmem:[%s10613_s3 + $0x30] sm:$0xff]  }
 0x3bd   : > { %7036 = vmatpush3.bf16.msra.mxu0 %v8338_v52 }
 0x3be   : > { %7037 = vmatprep.subr.bf16.mxu0 %v8339_v15 }
 0x3bf   : > { %7104 = vmatpush3.bf16.msra.mxu1 %v10035_v27  ;;  %v8343_v27 = vld [vmem:[%s10613_s3 + $0x140] sm:$0xff]  }
 0x3c0   : > { %7662 = vmatmul.mubr.bf16.gmra.mrb[156].mxu0 %v10316_v8  ;;  %7697 = vmatprep.subr.bf16.mxu1 %v10042_v30 }
 0x3c1   : > { %7038 = vmatpush3.bf16.msra.mxu0 %v8340_v55  ;;  %5090 = vmatprep.mubr.bf16.mxu0 %v10018_v40 }
 0x3c2   : > { %5218 = vmatmul.mubr.bf16.vlgmr.msra.gmra.mrb[224].mxu1 %v5175_v7  ;;  %7039 = vmatprep.subr.bf16.mxu0 %v8341_v3 }
 0x3c3   : > { %5225 = vmatprep.mubr.bf16.mxu1 %v9689_v54  ;;  %7698 = vmatpush3.bf16.msra.mxu1 %v10042_v30  ;;  %v5416_v30 = vld [vmem:[#allocation2 + $0x151] sm:$0xff] }
 0x3c4   : > { %7699 = vmatprep.subr.bf16.mxu1 %v10052_v5 }
 0x3c5   : > { %7040 = vmatpush3.bf16.msra.mxu0 %v8342_v1  ;;  %v5436_v1 = vpack.c.bf16 %v5422_v34, %v5421_v10 }
 0x3c6   : > { %7169 = vmatprep.subr.bf16.mxu0 %v8343_v27 }
 0x3c7   : > { %7700 = vmatpush3.bf16.msra.mxu1 %v10052_v5 }
 0x3c8   : > { %5091 = vmatmul.mubr.bf16.vlgmr.msra.gmra.mrb[192].mxu0 %v9974_v57  ;;  %7701 = vmatprep.subr.bf16.mxu1 %v10062_v48 }
 0x3c9   : > { %7170 = vmatpush3.bf16.msra.mxu0 %v9753_v11  ;;  %5098 = vmatprep.mubr.bf16.mxu0 %v10216_v49  ;;  %v10692_v11 = vld [vmem:[#allocation6_spill] sm:$0xff] }
 0x3ca   : > { %5226 = vmatmul.mubr.bf16.gmra.mrb[228].mxu1 %v9693_v26  ;;  %7171 = vmatprep.subr.bf16.mxu0 %v9764_v2  ;;  %v10691_v26 = vld [vmem:[#allocation3_spill] sm:$0xff]  ;;  %v10693_v2 = vld [vmem:[#allocation4_spill] sm:$0xff] }
 0x3cb   : > { %5233 = vmatprep.mubr.bf16.mxu1 %v9771_v56  ;;  %7702 = vmatpush3.bf16.msra.mxu1 %v10062_v48 }
 0x3cc   : > { %7703 = vmatprep.subr.bf16.mxu1 %v10070_v50 }
 0x3cd   : > { %7172 = vmatpush3.bf16.msra.mxu0 %v9791_v45  ;;  %v10694_v45 = vld [vmem:[#allocation5_spill] sm:$0xff] }
 0x3ce   : > { %7173 = vmatprep.subr.bf16.mxu0 %v9806_v16 }
 0x3cf   : > { %7704 = vmatpush3.bf16.msra.mxu1 %v10070_v50 }
 0x3d0   : > { %5099 = vmatmul.mubr.bf16.gmra.mrb[196].mxu0 %v10018_v40  ;;  %7705 = vmatprep.subr.bf16.mxu1 %v10080_v6  ;;  %v10695_v40 = vld [vmem:[#allocation8_spill] sm:$0xff] }
 0x3d1   : > { %5106 = vmatprep.mubr.bf16.mxu0 %v10228_v31  ;;  %7174 = vmatpush3.bf16.msra.mxu0 %v9842_v23 }
 0x3d2   : > { %5234 = vmatmul.mubr.bf16.gmra.mrb[232].mxu1 %v9689_v54  ;;  %7175 = vmatprep.subr.bf16.mxu0 %v9859_v58 }
 0x3d3   : > { %5241 = vmatprep.mubr.bf16.mxu1 %v9777_v25  ;;  %7706 = vmatpush3.bf16.msra.mxu1 %v10080_v6 }
 0x3d4   : > { %7707 = vmatprep.subr.bf16.mxu1 %v10088_v38 }
 0x3d5   : > { %7176 = vmatpush3.bf16.msra.mxu0 %v9884_v61 }
 0x3d6   : > { %7177 = vmatprep.subr.bf16.mxu0 %v9890_v17 }
 0x3d7   : > { %7708 = vmatpush3.bf16.msra.mxu1 %v10088_v38 }
 0x3d8   : > { %5107 = vmatmul.mubr.bf16.gmra.mrb[200].mxu0 %v10216_v49  ;;  %7709 = vmatprep.subr.bf16.mxu1 %v10098_v33  ;;  %v5418_v49 = vld [vmem:[#allocation2 + $0x171] sm:$0xff] }
 0x3d9   : > { %5114 = vmatprep.mubr.bf16.mxu0 %v10235_v43  ;;  %7178 = vmatpush3.bf16.msra.mxu0 %v9924_v24 }
 0x3da   : > { %5242 = vmatmul.mubr.bf16.gmra.mrb[236].mxu1 %v9771_v56  ;;  %7179 = vmatprep.subr.bf16.mxu0 %v9931_v47 }
 0x3db   : > { %5249 = vmatprep.mubr.bf16.mxu1 %v9846_v59  ;;  %7710 = vmatpush3.bf16.msra.mxu1 %v10098_v33 }
 0x3dc   : > { %7711 = vmatprep.subr.bf16.mxu1 %v10105_v13 }
 0x3dd   : > { %7180 = vmatpush3.bf16.msra.mxu0 %v9952_v4 }
 0x3de   : > { %7181 = vmatprep.subr.bf16.mxu0 %v9958_v41 }
 0x3df   : > { %7712 = vmatpush3.bf16.msra.mxu1 %v10105_v13  ;;  %v10697_v13 = vld [vmem:[#allocation10_spill] sm:$0xff] }
 0x3e0   : > { %5115 = vmatmul.mubr.bf16.gmra.mrb[204].mxu0 %v10228_v31  ;;  %7729 = vmatprep.subr.bf16.mxu1 %v10116_v28 }
 0x3e1   : > { %5122 = vmatprep.mubr.bf16.mxu0 %v10249_v39  ;;  %7182 = vmatpush3.bf16.msra.mxu0 %v9980_v19 }
 0x3e2   : > { %5250 = vmatmul.mubr.bf16.gmra.mrb[240].mxu1 %v9777_v25  ;;  %7183 = vmatprep.subr.bf16.mxu0 %v9987_v21 }
 0x3e3   : > { %5257 = vmatprep.mubr.bf16.mxu1 %v10691_v26 }
 0x3e5   : > { %7184 = vmatpush3.bf16.msra.mxu0 %v10692_v11 }
 0x3e8   : > { %5123 = vmatmul.mubr.bf16.gmra.mrb[208].mxu0 %v10235_v43 }
 0x3e9   : > { %5130 = vmatprep.mubr.bf16.mxu0 %v10252_v35 }
 0x3ea   : > { %5258 = vmatmul.mubr.bf16.gmra.mrb[244].mxu1 %v9846_v59 }
 0x3eb   : > { %5265 = vmatprep.mubr.bf16.mxu1 %v10693_v2 }
 0x3f0   : > { %5131 = vmatmul.mubr.bf16.gmra.mrb[212].mxu0 %v10249_v39 }
 0x3f1   : > { %5138 = vmatprep.mubr.bf16.mxu0 %v10273_v37 }
 0x3f2   : > { %5266 = vmatmul.mubr.bf16.gmra.mrb[248].mxu1 %v10691_v26 }
 0x3f3   : > { %5273 = vmatprep.mubr.bf16.mxu1 %v10694_v45 }
 0x3f4   : > { %v6801_v16 = vpop.f32.mrb[144].mxu1 }
 0x3f5   : > { %v6802_v23 = vpop.f32.mrb[145].mxu1 }
 0x3f6   : > { %v10391_v58 = vadd.f32 %v6802_v23, %v6801_v16  ;;  %v6804_v61 = vpop.f32.mrb[146].mxu1  ;;  %v5423_v16 = vld [vmem:[#allocation2 + $0x1c9] sm:$0xff]  ;;  %v5424_v23 = vld [vmem:[#allocation2 + $0x1d1] sm:$0xff] }
 0x3f7   : > { %v6805_v17 = vpop.f32.mrb[147].mxu1 }
 0x3f8   : > { %5139 = vmatmul.mubr.bf16.gmra.mrb[216].mxu0 %v10252_v35  ;;  %v10394_v24 = vadd.f32 %v6805_v17, %v6804_v61 }
 0x3f9   : > { %5146 = vmatprep.mubr.bf16.mxu0 %v10276_v12 }
 0x3fa   : > { %5274 = vmatmul.mubr.bf16.gmra.mrb[252].mxu1 %v10693_v2 }
 0x3fb   : > { %7713 = vmatprep.mubr.bf16.mxu1 %v9689_v54  ;;  %v5415_v54 = vld [vmem:[#allocation2 + $0x149] sm:$0xff] }
 0x3fc   : > { %v5433_v38 = vpack.c.bf16 %v5416_v30, %v5415_v54 }
 0x3fd   : > { %v6807_v47 = vpop.f32.mrb[148].mxu1 }
 0x3fe   : > { %v6808_v4 = vpop.f32.mrb[149].mxu1 }
 0x3ff   : > { %v10399_v41 = vadd.f32 %v6808_v4, %v6807_v47  ;;  %v6810_v57 = vpop.f32.mrb[150].mxu1 }
 0x400   : > { %v6811_v19 = vpop.f32.mrb[151].mxu1  ;;  %5147 = vmatmul.mubr.bf16.gmra.mrb[220].mxu0 %v10273_v37 }
 0x401   : > { %v10402_v21 = vadd.f32 %v6811_v19, %v6810_v57  ;;  %5473 = vmatprep.mubr.bf16.mxu0 %v10316_v8 }
 0x402   : > { %7714 = vmatmul.mubr.bf16.vlgmr.msra.gmra.mrb[208].mxu1 %v9771_v56  ;;  %v10696_v56 = vld [vmem:[#allocation9_spill] sm:$0xff] }
 0x403   : > { %7717 = vmatprep.mubr.bf16.mxu1 %v9777_v25  ;;  %7730 = vmatpush3.bf16.msra.mxu1 %v10116_v28  ;;  %v5417_v28 = vld [vmem:[#allocation2 + $0x169] sm:$0xff] }
 0x404   : > { %7731 = vmatprep.subr.bf16.mxu1 %v10695_v40  ;;  %v5434_v35 = vpack.c.bf16 %v5418_v49, %v5417_v28 }
 0x405   : > { %v6813_v5 = vpop.f32.mrb[152].mxu1 }
 0x406   : > { %v6814_v48 = vpop.f32.mrb[153].mxu1 }
 0x407   : > { %v10409_v50 = vadd.f32 %v6814_v48, %v6813_v5  ;;  %v6816_v6 = vpop.f32.mrb[154].mxu1  ;;  %7732 = vmatpush3.bf16.msra.mxu1 %v10695_v40  ;;  %v5437_v40 = vpack.c.bf16 %v5424_v23, %v5423_v16 }
 0x408   : > { %v6817_v33 = vpop.f32.mrb[155].mxu1  ;;  %5474 = vmatmul.mubr.bf16.vlgmr.msra.gmra.mrb[224].mxu0 %v10196_v20  ;;  %7733 = vmatprep.subr.bf16.mxu1 %v10696_v56 }
 0x409   : > { %v10414_v25 = vadd.f32 %v6817_v33, %v6816_v6  ;;  %5481 = vmatprep.mubr.bf16.mxu0 %v5433_v38 }
 0x40a   : > { %7718 = vmatmul.mubr.bf16.gmra.mrb[212].mxu1 %v9846_v59 }
 0x40b   : > { %7721 = vmatprep.mubr.bf16.mxu1 %v10691_v26  ;;  %7734 = vmatpush3.bf16.msra.mxu1 %v10696_v56 }
 0x40c   : > { %7735 = vmatprep.subr.bf16.mxu1 %v10697_v13 }
 0x40d   : > { %v6819_v39 = vpop.f32.mrb[156].mxu1 }
 0x40e   : > { %v6820_v31 = vpop.f32.mrb[157].mxu1 }
 0x40f   : > { %v10420_v43 = vadd.f32 %v6820_v31, %v6819_v39  ;;  %v6822_v20 = vpop.f32.mrb[158].mxu1  ;;  %7736 = vmatpush3.bf16.msra.mxu1 %v10697_v13  ;;  %v5427_v39 = vld [vmem:[#allocation2 + $0x209] sm:$0xff]  ;;  %v5428_v31 = vld [vmem:[#allocation2 + $0x211] sm:$0xff] }
 0x410   : > { %v6823_v18 = vpop.f32.mrb[159].mxu1  ;;  %5482 = vmatmul.mubr.bf16.gmra.mrb[228].mxu0 %v10316_v8  ;;  %7737 = vmatprep.subr.bf16.mxu1 %v10203_v42 }
 0x411   : > { %v10425_v59 = vadd.f32 %v6823_v18, %v6822_v20  ;;  %5489 = vmatprep.mubr.bf16.mxu0 %v5434_v35 }
 0x412   : > { %7722 = vmatmul.mubr.bf16.gmra.mrb[216].mxu1 %v10693_v2 }
 0x413   : > { %7725 = vmatprep.mubr.bf16.mxu1 %v10694_v45  ;;  %7738 = vmatpush3.bf16.msra.mxu1 %v10203_v42  ;;  %v10699_v42 = vld [vmem:[#allocation7_spill] sm:$0xff] }
 0x414   : > { %7739 = vmatprep.subr.bf16.mxu1 %v10211_v44 }
 0x415   : > { %v6825_v37 = vpop.f32.mrb[160].mxu1 }
 0x416   : > { %v6826_v12 = vpop.f32.mrb[161].mxu1 }
 0x417   : > { %v10431_v62 = vadd.f32 %v6826_v12, %v6825_v37  ;;  %v6828_v22 = vpop.f32.mrb[162].mxu1  ;;  %7740 = vmatpush3.bf16.msra.mxu1 %v10211_v44 }
 0x418   : > { %v6829_v36 = vpop.f32.mrb[163].mxu1  ;;  %5490 = vmatmul.mubr.bf16.gmra.mrb[232].mxu0 %v5433_v38  ;;  %7741 = vmatprep.subr.bf16.mxu1 %v10698_v53 }
 0x419   : > { %v10435_v51 = vadd.f32 %v6829_v36, %v6828_v22  ;;  %5497 = vmatprep.mubr.bf16.mxu0 %v5435_v32  ;;  %v5439_v22 = vpack.c.bf16 %v5428_v31, %v5427_v39  ;;  %v5429_v36 = vld [vmem:[#allocation2 + $0x229] sm:$0xff] }
 0x41a   : > { %7726 = vmatmul.mubr.bf16.gmra.mrb[220].mxu1 %v10699_v42 }
 0x41b   : > { %7742 = vmatpush3.bf16.msra.mxu1 %v10698_v53  ;;  %7745 = vmatprep.mubr.bf16.mxu1 %v5433_v38  ;;  %v6865_v46 = vpop.f32.mrb[160].mxu0  ;;  %v5425_v38 = vld [vmem:[#allocation2 + $0x1e9] sm:$0xff]  ;;  %v5430_v53 = vld [vmem:[#allocation2 + $0x231] sm:$0xff] }
 0x41c   : > { %v6866_v60 = vpop.f32.mrb[161].mxu0  ;;  %7743 = vmatprep.subr.bf16.mxu1 %v10233_v0 }
 0x41d   : > { %v6831_v44 = vpop.f32.mrb[164].mxu1  ;;  %v6867_v14 = vadd.f32 %v6866_v60, %v6865_v46  ;;  %v6868_v52 = vpop.f32.mrb[162].mxu0 }
 0x41e   : > { %v6832_v29 = vpop.f32.mrb[165].mxu1  ;;  %v6869_v15 = vpop.f32.mrb[163].mxu0 }
 0x41f   : > { %v10441_v8 = vadd.f32 %v6867_v14, %v10391_v58  ;;  %v10443_v7 = vadd.f32 %v6832_v29, %v6831_v44  ;;  %v6834_v55 = vpop.f32.mrb[166].mxu1  ;;  %v6870_v3 = vadd.f32 %v6869_v15, %v6868_v52  ;;  %7744 = vmatpush3.bf16.msra.mxu1 %v10233_v0  ;;  %v5440_v44 = vpack.c.bf16 %v5430_v53, %v5429_v36 }
 0x420   : > { %v6835_v27 = vpop.f32.mrb[167].mxu1  ;;  %5498 = vmatmul.mubr.bf16.gmra.mrb[236].mxu0 %v5434_v35 }
 0x421   : > { %v10447_v26 = vadd.f32 %v6870_v3, %v10394_v24  ;;  %v10449_v11 = vadd.f32 %v6835_v27, %v6834_v55  ;;  %5505 = vmatprep.mubr.bf16.mxu0 %v5436_v1 }
 0x422   : > { %7746 = vmatmul.mubr.bf16.vlgmr.msra.gmra.mrb[208].mxu1 %v5434_v35 }
 0x423   : > { %7749 = vmatprep.mubr.bf16.mxu1 %v5435_v32  ;;  %v6871_v2 = vpop.f32.mrb[164].mxu0 }
 0x424   : > { %v6872_v45 = vpop.f32.mrb[165].mxu0 }
 0x425   : > { %v6837_v58 = vpop.f32.mrb[168].mxu1  ;;  %v6873_v61 = vadd.f32 %v6872_v45, %v6871_v2  ;;  %v6874_v17 = vpop.f32.mrb[166].mxu0 }
 0x426   : > { %v6838_v47 = vpop.f32.mrb[169].mxu1  ;;  %v6875_v0 = vpop.f32.mrb[167].mxu0 }
 0x427   : > { %v10452_v4 = vadd.f32 %v6873_v61, %v10399_v41  ;;  %v10454_v57 = vadd.f32 %v6838_v47, %v6837_v58  ;;  %v6840_v24 = vpop.f32.mrb[170].mxu1  ;;  %v6876_v19 = vadd.f32 %v6875_v0, %v6874_v17  ;;  %v5426_v41 = vld [vmem:[#allocation2 + $0x1f1] sm:$0xff] }
 0x428   : > { %v6841_v54 = vpop.f32.mrb[171].mxu1  ;;  %5506 = vmatmul.mubr.bf16.gmra.mrb[240].mxu0 %v5435_v32  ;;  %v5438_v9 = vpack.c.bf16 %v5426_v41, %v5425_v38 }
 0x429   : > { %v10457_v30 = vadd.f32 %v6876_v19, %v10402_v21  ;;  %v10459_v5 = vadd.f32 %v6841_v54, %v6840_v24  ;;  %5513 = vmatprep.mubr.bf16.mxu0 %v5437_v40 }
 0x42a   : > { %7750 = vmatmul.mubr.bf16.gmra.mrb[212].mxu1 %v5436_v1 }
 0x42b   : > { %7753 = vmatprep.mubr.bf16.mxu1 %v5437_v40  ;;  %v6877_v48 = vpop.f32.mrb[168].mxu0 }
 0x42c   : > { %v6878_v6 = vpop.f32.mrb[169].mxu0 }
 0x42d   : > { %v6843_v33 = vpop.f32.mrb[172].mxu1  ;;  %v6879_v56 = vadd.f32 %v6878_v6, %v6877_v48  ;;  %v6880_v13 = vpop.f32.mrb[170].mxu0 }
 0x42e   : > { %v6844_v28 = vpop.f32.mrb[173].mxu1  ;;  %v6881_v49 = vpop.f32.mrb[171].mxu0 }
 0x42f   : > { %v10462_v20 = vadd.f32 %v6879_v56, %v10409_v50  ;;  %v10464_v21 = vadd.f32 %v6844_v28, %v6843_v33  ;;  %v6846_v35 = vpop.f32.mrb[174].mxu1  ;;  %v6882_v18 = vadd.f32 %v6881_v49, %v6880_v13 }
 0x430   : > { %v6847_v63 = vpop.f32.mrb[175].mxu1  ;;  %5514 = vmatmul.mubr.bf16.gmra.mrb[244].mxu0 %v5436_v1 }
 0x431   : > { %v7878_v37 = vadd.f32 %v6882_v18, %v10414_v25  ;;  %v10467_v12 = vadd.f32 %v6847_v63, %v6846_v35  ;;  %5521 = vmatprep.mubr.bf16.mxu0 %v5438_v9 }
 0x432   : > { %7754 = vmatmul.mubr.bf16.gmra.mrb[216].mxu1 %v5438_v9 }
 0x433   : > { %7757 = vmatprep.mubr.bf16.mxu1 %v5439_v22  ;;  %v6883_v32 = vpop.f32.mrb[172].mxu0 }
 0x434   : > { %v6884_v50 = vpop.f32.mrb[173].mxu0 }
 0x435   : > { %v6885_v42 = vadd.f32 %v6884_v50, %v6883_v32  ;;  %v6945_v46 = vpop.f32.mrb[176].mxu1  ;;  %v6886_v60 = vpop.f32.mrb[174].mxu0 }
 0x436   : > { %v6946_v10 = vpop.f32.mrb[177].mxu1  ;;  %v6887_v34 = vpop.f32.mrb[175].mxu0 }
 0x437   : > { %v7869_v14 = vadd.f32 %v6885_v42, %v10420_v43  ;;  %v6947_v52 = vadd.f32 %v6946_v10, %v6945_v46  ;;  %v6888_v25 = vadd.f32 %v6887_v34, %v6886_v60  ;;  %v6948_v29 = vpop.f32.mrb[178].mxu1 }
 0x438   : > { %v6949_v15 = vpop.f32.mrb[179].mxu1  ;;  %5522 = vmatmul.mubr.bf16.gmra.mrb[248].mxu0 %v5437_v40 }
 0x439   : > { %v7875_v55 = vadd.f32 %v6888_v25, %v10425_v59  ;;  %v6950_v3 = vadd.f32 %v6949_v15, %v6948_v29  ;;  %5529 = vmatprep.mubr.bf16.mxu0 %v5439_v22  ;;  %v10472_v1 = vadd.f32 %v10441_v8, %v6947_v52 }
 0x43a   : > { %7758 = vmatmul.mubr.bf16.gmra.mrb[220].mxu1 %v5440_v44 }
 0x43b   : > { %v6889_v27 = vpop.f32.mrb[176].mxu0  ;;  %v10475_v2 = vadd.f32 %v10447_v26, %v6950_v3 }
 0x43c   : > { %v6890_v45 = vpop.f32.mrb[177].mxu0 }
 0x43d   : > { %v6891_v16 = vadd.f32 %v6890_v45, %v6889_v27  ;;  %v6951_v43 = vpop.f32.mrb[180].mxu1  ;;  %v6892_v23 = vpop.f32.mrb[178].mxu0 }
 0x43e   : > { %v6952_v58 = vpop.f32.mrb[181].mxu1  ;;  %v6893_v61 = vpop.f32.mrb[179].mxu0 }
 0x43f   : > { %v7884_v17 = vadd.f32 %v6891_v16, %v10431_v62  ;;  %v6953_v47 = vadd.f32 %v6952_v58, %v6951_v43  ;;  %v6894_v59 = vadd.f32 %v6893_v61, %v6892_v23  ;;  %v6954_v0 = vpop.f32.mrb[182].mxu1 }
 0x440   : > { %v6955_v24 = vpop.f32.mrb[183].mxu1  ;;  %5530 = vmatmul.mubr.bf16.gmra.mrb[252].mxu0 %v5438_v9 }
 0x441   : > { %v7890_v8 = vadd.f32 %v6894_v59, %v10435_v51  ;;  %v6956_v19 = vadd.f32 %v6955_v24, %v6954_v0  ;;  %v10480_v40 = vadd.f32 %v10452_v4, %v6953_v47 }
 0x443   : > { %v6895_v26 = vpop.f32.mrb[180].mxu0  ;;  %v10483_v54 = vadd.f32 %v10457_v30, %v6956_v19 }
 0x444   : > { %v6896_v48 = vpop.f32.mrb[181].mxu0 }
 0x445   : > { %v6897_v6 = vadd.f32 %v6896_v48, %v6895_v26  ;;  %v6957_v38 = vpop.f32.mrb[184].mxu1  ;;  %v6898_v41 = vpop.f32.mrb[182].mxu0 }
 0x446   : > { %v6958_v62 = vpop.f32.mrb[185].mxu1  ;;  %v6899_v33 = vpop.f32.mrb[183].mxu0 }
 0x447   : > { %v7881_v56 = vadd.f32 %v6897_v6, %v10443_v7  ;;  %v6959_v13 = vadd.f32 %v6958_v62, %v6957_v38  ;;  %v6900_v28 = vadd.f32 %v6899_v33, %v6898_v41  ;;  %v6960_v49 = vpop.f32.mrb[186].mxu1 }
 0x448   : > { %v6961_v51 = vpop.f32.mrb[187].mxu1 }
 0x449   : > { %v7887_v39 = vadd.f32 %v6900_v28, %v10449_v11  ;;  %v6962_v4 = vadd.f32 %v6961_v51, %v6960_v49  ;;  %v10488_v31 = vadd.f32 %v10462_v20, %v6959_v13 }
 0x44b   : > { %v6901_v30 = vpop.f32.mrb[184].mxu0  ;;  %v10490_v35 = vadd.f32 %v7878_v37, %v6962_v4 }
 0x44c   : > { %v6902_v18 = vpop.f32.mrb[185].mxu0 }
 0x44d   : > { %v6903_v9 = vadd.f32 %v6902_v18, %v6901_v30  ;;  %v6963_v63 = vpop.f32.mrb[188].mxu1  ;;  %v6904_v22 = vpop.f32.mrb[186].mxu0  ;;  %v10510_v30 = vld [vmem:[%s10615_s5] ss:$0 sm:$0xff] }
 0x44e   : > { %v6964_v32 = vpop.f32.mrb[189].mxu1  ;;  %v6905_v36 = vpop.f32.mrb[187].mxu0 }
 0x44f   : > { %v7896_v7 = vadd.f32 %v6903_v9, %v10454_v57  ;;  %v6965_v53 = vadd.f32 %v6964_v32, %v6963_v63  ;;  %v6906_v50 = vadd.f32 %v6905_v36, %v6904_v22  ;;  %v6966_v42 = vpop.f32.mrb[190].mxu1 }
 0x450   : > { %v6967_v46 = vpop.f32.mrb[191].mxu1 }
 0x451   : > { %v7902_v11 = vadd.f32 %v6906_v50, %v10459_v5  ;;  %v6968_v60 = vadd.f32 %v6967_v46, %v6966_v42  ;;  %v7870_v20 = vadd.f32 %v7869_v14, %v6965_v53 }
 0x453   : > { %v6907_v10 = vpop.f32.mrb[188].mxu0  ;;  %v7876_v34 = vadd.f32 %v7875_v55, %v6968_v60 }
 0x454   : > { %v6908_v37 = vpop.f32.mrb[189].mxu0 }
 0x455   : > { %v6909_v44 = vadd.f32 %v6908_v37, %v6907_v10  ;;  %v6969_v52 = vpop.f32.mrb[192].mxu1  ;;  %v6910_v25 = vpop.f32.mrb[190].mxu0 }
 0x456   : > { %v6970_v29 = vpop.f32.mrb[193].mxu1  ;;  %v6911_v15 = vpop.f32.mrb[191].mxu0 }
 0x457   : > { %v7893_v3 = vadd.f32 %v6909_v44, %v10464_v21  ;;  %v6971_v27 = vadd.f32 %v6970_v29, %v6969_v52  ;;  %v6912_v57 = vadd.f32 %v6911_v15, %v6910_v25  ;;  %v6972_v45 = vpop.f32.mrb[194].mxu1 }
 0x458   : > { %v6973_v16 = vpop.f32.mrb[195].mxu1 }
 0x459   : > { %v7899_v43 = vadd.f32 %v6912_v57, %v10467_v12  ;;  %v6974_v23 = vadd.f32 %v6973_v16, %v6972_v45  ;;  %v10496_v5 = vadd.f32 %v7884_v17, %v6971_v27 }
 0x45b   : > { %v10498_v14 = vadd.f32 %v7890_v8, %v6974_v23 }
 0x45d   : > { %v6975_v55 = vpop.f32.mrb[196].mxu1 }
 0x45e   : > { %v6976_v58 = vpop.f32.mrb[197].mxu1 }
 0x45f   : > { %v6977_v61 = vadd.f32 %v6976_v58, %v6975_v55  ;;  %v6978_v47 = vpop.f32.mrb[198].mxu1 }
 0x460   : > { %v6979_v59 = vpop.f32.mrb[199].mxu1 }
 0x461   : > { %v6980_v0 = vadd.f32 %v6979_v59, %v6978_v47  ;;  %v7882_v24 = vadd.f32 %v7881_v56, %v6977_v61 }
 0x463   : > { %v7888_v19 = vadd.f32 %v7887_v39, %v6980_v0 }
 0x465   : > { %v6981_v21 = vpop.f32.mrb[200].mxu1 }
 0x466   : > { %v6982_v26 = vpop.f32.mrb[201].mxu1 }
 0x467   : > { %v6983_v48 = vadd.f32 %v6982_v26, %v6981_v21  ;;  %v6984_v6 = vpop.f32.mrb[202].mxu1 }
 0x468   : > { %v6985_v38 = vpop.f32.mrb[203].mxu1 }
 0x469   : > { %v6986_v41 = vadd.f32 %v6985_v38, %v6984_v6  ;;  %v10500_v12 = vadd.f32 %v7896_v7, %v6983_v48 }
 0x46b   : > { %v10502_v17 = vadd.f32 %v7902_v11, %v6986_v41 }
 0x46d   : > { %v6987_v8 = vpop.f32.mrb[204].mxu1 }
 0x46e   : > { %v6988_v62 = vpop.f32.mrb[205].mxu1 }
 0x46f   : > { %v6989_v33 = vadd.f32 %v6988_v62, %v6987_v8  ;;  %v6990_v13 = vpop.f32.mrb[206].mxu1 }
 0x470   : > { %v6991_v28 = vpop.f32.mrb[207].mxu1 }
 0x471   : > { %v6992_v49 = vadd.f32 %v6991_v28, %v6990_v13  ;;  %v7894_v51 = vadd.f32 %v7893_v3, %v6989_v33 }
 0x473   : > { %v10504_v4 = vadd.f32 %v7899_v43, %v6992_v49 }
 0x47b   : > { %v7651_v56 = vpop.f32.mrb[144].mxu0 }
 0x47c   : > { %v7859_v39 = vadd.f32 %v10480_v40, %v7651_v56  ;;  %v4791_v18 = vpop.f32.mrb[145].mxu0 }
 0x47d   : > { %v7862_v9 = vadd.f32 %v10472_v1, %v4791_v18  ;;  %v7652_v63 = vpop.f32.mrb[146].mxu0 }
 0x47e   : > { %v7865_v22 = vadd.f32 %v10483_v54, %v7652_v63  ;;  %v4794_v32 = vpop.f32.mrb[147].mxu0  ;;  %v4879_v53 = vadd.f32 %v7859_v39, %v10510_v30 }
 0x47f   : > { %v4877_v36 = vadd.f32 %v7862_v9, %v10510_v30  ;;  %v7868_v7 = vadd.f32 %v10475_v2, %v4794_v32 }
 0x480   : > { %v4880_v42 = vadd.f32 %v7865_v22, %v10510_v30  ;;  %v4895_v1 = vmax.f32 %v4879_v53, 0.0 }
 0x481   : > { %v4878_v40 = vadd.f32 %v7868_v7, %v10510_v30  ;;  %v4893_v50 = vmax.f32 %v4877_v36, 0.0 }
 0x482   : > { %v4896_v29 = vmax.f32 %v4880_v42, 0.0 }
 0x483   : > { %v4894_v46 = vmax.f32 %v4878_v40, 0.0  ;;  %v7655_v11 = vpop.f32.mrb[148].mxu0 }
 0x484   : > { %v7871_v60 = vadd.f32 %v7870_v20, %v7655_v11  ;;  %v4807_v10 = vpop.f32.mrb[149].mxu0 }
 0x485   : > { %v4909_v37 = vadd.f32 %v4894_v46, %v4893_v50  ;;  %v7874_v54 = vadd.f32 %v10488_v31, %v4807_v10  ;;  %v7656_v44 = vpop.f32.mrb[150].mxu0 }
 0x486   : > { %v7877_v52 = vadd.f32 %v7876_v34, %v7656_v44  ;;  %v4810_v25 = vpop.f32.mrb[151].mxu0  ;;  %v4883_v27 = vadd.f32 %v7871_v60, %v10510_v30 }
 0x487   : > { %v4910_v2 = vadd.f32 %v4909_v37, %v4895_v1  ;;  %v4881_v15 = vadd.f32 %v7874_v54, %v10510_v30  ;;  %v7880_v3 = vadd.f32 %v10490_v35, %v4810_v25 }
 0x488   : > { %v4884_v43 = vadd.f32 %v7877_v52, %v10510_v30  ;;  %v4899_v58 = vmax.f32 %v4883_v27, 0.0 }
 0x489   : > { %v4897_v57 = vmax.f32 %v4881_v15, 0.0  ;;  %v4911_v45 = vadd.f32 %v4910_v2, %v4896_v29  ;;  %v4882_v20 = vadd.f32 %v7880_v3, %v10510_v30 }
 0x48a   : > { %v4900_v21 = vmax.f32 %v4884_v43, 0.0 }
 0x48b   : > { %v4912_v16 = vadd.f32 %v4911_v45, %v4897_v57  ;;  %v4898_v23 = vmax.f32 %v4882_v20, 0.0  ;;  %v7659_v31 = vpop.f32.mrb[152].mxu0 }
 0x48c   : > { %v7883_v55 = vadd.f32 %v7882_v24, %v7659_v31  ;;  %v4823_v34 = vpop.f32.mrb[153].mxu0 }
 0x48d   : > { %v4913_v61 = vadd.f32 %v4912_v16, %v4898_v23  ;;  %v7886_v47 = vadd.f32 %v10496_v5, %v4823_v34  ;;  %v7660_v59 = vpop.f32.mrb[154].mxu0 }
 0x48e   : > { %v7889_v0 = vadd.f32 %v7888_v19, %v7660_v59  ;;  %v4826_v35 = vpop.f32.mrb[155].mxu0  ;;  %v4887_v38 = vadd.f32 %v7883_v55, %v10510_v30 }
 0x48f   : > { %v4914_v26 = vadd.f32 %v4913_v61, %v4899_v58  ;;  %v4885_v48 = vadd.f32 %v7886_v47, %v10510_v30  ;;  %v7892_v6 = vadd.f32 %v10498_v14, %v4826_v35 }
 0x490   : > { %v4888_v62 = vadd.f32 %v7889_v0, %v10510_v30  ;;  %v4903_v49 = vmax.f32 %v4887_v38, 0.0 }
 0x491   : > { %v4901_v41 = vmax.f32 %v4885_v48, 0.0  ;;  %v4915_v8 = vadd.f32 %v4914_v26, %v4900_v21  ;;  %v4886_v24 = vadd.f32 %v7892_v6, %v10510_v30 }
 0x492   : > { %v4904_v14 = vmax.f32 %v4888_v62, 0.0 }
 0x493   : > { %v4916_v33 = vadd.f32 %v4915_v8, %v4901_v41  ;;  %v4902_v13 = vmax.f32 %v4886_v24, 0.0  ;;  %v7663_v5 = vpop.f32.mrb[156].mxu0 }
 0x494   : > { %v7895_v28 = vadd.f32 %v7894_v51, %v7663_v5  ;;  %v4839_v19 = vpop.f32.mrb[157].mxu0 }
 0x495   : > { %v4917_v56 = vadd.f32 %v4916_v33, %v4902_v13  ;;  %v7898_v39 = vadd.f32 %v10500_v12, %v4839_v19  ;;  %v7105_v18 = vpop.f32.mrb[224].mxu1  ;;  %v7664_v9 = vpop.f32.mrb[158].mxu0 }
 0x496   : > { %v7901_v63 = vadd.f32 %v10504_v4, %v7664_v9  ;;  %v7106_v22 = vpop.f32.mrb[225].mxu1  ;;  %v4842_v32 = vpop.f32.mrb[159].mxu0  ;;  %v4891_v51 = vadd.f32 %v7895_v28, %v10510_v30 }
 0x497   : > { %v4918_v36 = vadd.f32 %v4917_v56, %v4903_v49  ;;  %v4889_v7 = vadd.f32 %v7898_v39, %v10510_v30  ;;  %v7107_v53 = vadd.f32 %v7106_v22, %v7105_v18  ;;  %v7904_v40 = vadd.f32 %v10502_v17, %v4842_v32  ;;  %v7108_v50 = vpop.f32.mrb[226].mxu1 }
 0x498   : > { %v7109_v42 = vpop.f32.mrb[227].mxu1  ;;  %v4892_v10 = vadd.f32 %v7901_v63, %v10510_v30  ;;  %v4907_v44 = vmax.f32 %v4891_v51, 0.0 }
 0x499   : > { %v4905_v46 = vmax.f32 %v4889_v7, 0.0  ;;  %v4919_v11 = vadd.f32 %v4918_v36, %v4904_v14  ;;  %v4890_v12 = vadd.f32 %v7904_v40, %v10510_v30  ;;  %v7110_v60 = vadd.f32 %v7109_v42, %v7108_v50 }
 0x49a   : > { %v4908_v2 = vmax.f32 %v4892_v10, 0.0 }
 0x49b   : > { %v4920_v4 = vadd.f32 %v4919_v11, %v4905_v46  ;;  %v4906_v1 = vmax.f32 %v4890_v12, 0.0  ;;  %v7041_v37 = vpop.f32.mrb[192].mxu0 }
 0x49c   : > { %v7042_v54 = vpop.f32.mrb[193].mxu0 }
 0x49d   : > { %v4921_v52 = vadd.f32 %v4920_v4, %v4906_v1  ;;  %v7043_v25 = vadd.f32 %v7042_v54, %v7041_v37  ;;  %v7111_v29 = vpop.f32.mrb[228].mxu1  ;;  %v7044_v17 = vpop.f32.mrb[194].mxu0 }
 0x49e   : > { %v7112_v15 = vpop.f32.mrb[229].mxu1  ;;  %v7045_v3 = vpop.f32.mrb[195].mxu0 }
 0x49f   : > { %v4922_v27 = vadd.f32 %v4921_v52, %v4907_v44  ;;  %v10538_v57 = vadd.f32 %v7107_v53, %v7043_v25  ;;  %v7113_v45 = vadd.f32 %v7112_v15, %v7111_v29  ;;  %v7046_v20 = vadd.f32 %v7045_v3, %v7044_v17  ;;  %v7114_v16 = vpop.f32.mrb[230].mxu1 }
 0x4a0   : > { %v7115_v43 = vpop.f32.mrb[231].mxu1 }
 0x4a1   : > { %v10540_v23 = vadd.f32 %v4922_v27, %v4908_v2  ;;  %v10542_v31 = vadd.f32 %v7110_v60, %v7046_v20  ;;  %v7116_v55 = vadd.f32 %v7115_v43, %v7114_v16 }
 0x4a3   : > { %v7047_v34 = vpop.f32.mrb[196].mxu0 }
 0x4a4   : > { %v7048_v58 = vpop.f32.mrb[197].mxu0 }
 0x4a5   : > { %v7049_v61 = vadd.f32 %v7048_v58, %v7047_v34  ;;  %v7117_v47 = vpop.f32.mrb[232].mxu1  ;;  %v7050_v59 = vpop.f32.mrb[198].mxu0 }
 0x4a6   : > { %v7118_v0 = vpop.f32.mrb[233].mxu1  ;;  %v7051_v35 = vpop.f32.mrb[199].mxu0 }
 0x4a7   : > { %v10544_v21 = vadd.f32 %v7113_v45, %v7049_v61  ;;  %v7119_v26 = vadd.f32 %v7118_v0, %v7117_v47  ;;  %v7052_v48 = vadd.f32 %v7051_v35, %v7050_v59  ;;  %v7120_v6 = vpop.f32.mrb[234].mxu1 }
 0x4a8   : > { %v7121_v38 = vpop.f32.mrb[235].mxu1 }
 0x4a9   : > { %v10546_v41 = vadd.f32 %v7116_v55, %v7052_v48  ;;  %v7122_v8 = vadd.f32 %v7121_v38, %v7120_v6 }
 0x4ab   : > { %v7053_v24 = vpop.f32.mrb[200].mxu0 }
 0x4ac   : > { %v7054_v62 = vpop.f32.mrb[201].mxu0 }
 0x4ad   : > { %v7055_v33 = vadd.f32 %v7054_v62, %v7053_v24  ;;  %v7123_v13 = vpop.f32.mrb[236].mxu1  ;;  %v7056_v5 = vpop.f32.mrb[202].mxu0 }
 0x4ae   : > { %v7124_v28 = vpop.f32.mrb[237].mxu1  ;;  %v7057_v19 = vpop.f32.mrb[203].mxu0 }
 0x4af   : > { %v10548_v49 = vadd.f32 %v7119_v26, %v7055_v33  ;;  %v7125_v56 = vadd.f32 %v7124_v28, %v7123_v13  ;;  %v7058_v39 = vadd.f32 %v7057_v19, %v7056_v5  ;;  %v7126_v18 = vpop.f32.mrb[238].mxu1 }
 0x4b0   : > { %v7127_v9 = vpop.f32.mrb[239].mxu1 }
 0x4b1   : > { %v10550_v14 = vadd.f32 %v7122_v8, %v7058_v39  ;;  %v7128_v63 = vadd.f32 %v7127_v9, %v7126_v18 }
 0x4b3   : > { %v7059_v22 = vpop.f32.mrb[204].mxu0 }
 0x4b4   : > { %v7060_v32 = vpop.f32.mrb[205].mxu0 }
 0x4b5   : > { %v7061_v36 = vadd.f32 %v7060_v32, %v7059_v22  ;;  %v7129_v7 = vpop.f32.mrb[240].mxu1  ;;  %v7062_v53 = vpop.f32.mrb[206].mxu0 }
 0x4b6   : > { %v7130_v40 = vpop.f32.mrb[241].mxu1  ;;  %v7063_v50 = vpop.f32.mrb[207].mxu0 }
 0x4b7   : > { %v10552_v51 = vadd.f32 %v7125_v56, %v7061_v36  ;;  %v7131_v42 = vadd.f32 %v7130_v40, %v7129_v7  ;;  %v7064_v46 = vadd.f32 %v7063_v50, %v7062_v53  ;;  %v7132_v11 = vpop.f32.mrb[242].mxu1 }
 0x4b8   : > { %v7133_v12 = vpop.f32.mrb[243].mxu1 }
 0x4b9   : > { %v10554_v60 = vadd.f32 %v7128_v63, %v7064_v46  ;;  %v7134_v10 = vadd.f32 %v7133_v12, %v7132_v11 }
 0x4bb   : > { %v7065_v4 = vpop.f32.mrb[208].mxu0 }
 0x4bc   : > { %v7066_v1 = vpop.f32.mrb[209].mxu0 }
 0x4bd   : > { %v7067_v37 = vadd.f32 %v7066_v1, %v7065_v4  ;;  %v7135_v54 = vpop.f32.mrb[244].mxu1  ;;  %v7068_v44 = vpop.f32.mrb[210].mxu0 }
 0x4be   : > { %v7136_v52 = vpop.f32.mrb[245].mxu1  ;;  %v7069_v25 = vpop.f32.mrb[211].mxu0 }
 0x4bf   : > { %v10556_v29 = vadd.f32 %v7131_v42, %v7067_v37  ;;  %v7137_v17 = vadd.f32 %v7136_v52, %v7135_v54  ;;  %v7070_v2 = vadd.f32 %v7069_v25, %v7068_v44  ;;  %v7138_v15 = vpop.f32.mrb[246].mxu1 }
 0x4c0   : > { %v7139_v3 = vpop.f32.mrb[247].mxu1 }
 0x4c1   : > { %v10558_v27 = vadd.f32 %v7134_v10, %v7070_v2  ;;  %v7140_v45 = vadd.f32 %v7139_v3, %v7138_v15 }
 0x4c3   : > { %v7071_v20 = vpop.f32.mrb[212].mxu0 }
 0x4c4   : > { %v7072_v16 = vpop.f32.mrb[213].mxu0 }
 0x4c5   : > { %v7073_v43 = vadd.f32 %v7072_v16, %v7071_v20  ;;  %v7141_v55 = vpop.f32.mrb[248].mxu1  ;;  %v7074_v34 = vpop.f32.mrb[214].mxu0 }
 0x4c6   : > { %v7142_v58 = vpop.f32.mrb[249].mxu1  ;;  %v7075_v61 = vpop.f32.mrb[215].mxu0 }
 0x4c7   : > { %v10560_v47 = vadd.f32 %v7137_v17, %v7073_v43  ;;  %v7143_v59 = vadd.f32 %v7142_v58, %v7141_v55  ;;  %v7076_v0 = vadd.f32 %v7075_v61, %v7074_v34  ;;  %v7144_v35 = vpop.f32.mrb[250].mxu1 }
 0x4c8   : > { %v7145_v26 = vpop.f32.mrb[251].mxu1 }
 0x4c9   : > { %v10562_v48 = vadd.f32 %v7140_v45, %v7076_v0  ;;  %v7146_v6 = vadd.f32 %v7145_v26, %v7144_v35 }
 0x4cb   : > { %v7077_v38 = vpop.f32.mrb[216].mxu0 }
 0x4cc   : > { %v7078_v8 = vpop.f32.mrb[217].mxu0 }
 0x4cd   : > { %v7079_v24 = vadd.f32 %v7078_v8, %v7077_v38  ;;  %v7147_v62 = vpop.f32.mrb[252].mxu1  ;;  %v7080_v33 = vpop.f32.mrb[218].mxu0 }
 0x4ce   : > { %v7148_v13 = vpop.f32.mrb[253].mxu1  ;;  %v7081_v5 = vpop.f32.mrb[219].mxu0 }
 0x4cf   : > { %v10564_v28 = vadd.f32 %v7143_v59, %v7079_v24  ;;  %v7149_v19 = vadd.f32 %v7148_v13, %v7147_v62  ;;  %v7082_v56 = vadd.f32 %v7081_v5, %v7080_v33  ;;  %v7150_v39 = vpop.f32.mrb[254].mxu1 }
 0x4d0   : > { %v7151_v18 = vpop.f32.mrb[255].mxu1 }
 0x4d1   : > { %v10566_v9 = vadd.f32 %v7146_v6, %v7082_v56  ;;  %v7152_v63 = vadd.f32 %v7151_v18, %v7150_v39 }
 0x4d3   : > { %v7083_v22 = vpop.f32.mrb[220].mxu0 }
 0x4d4   : > { %v7084_v32 = vpop.f32.mrb[221].mxu0 }
 0x4d5   : > { %v7085_v36 = vadd.f32 %v7084_v32, %v7083_v22  ;;  %v7086_v7 = vpop.f32.mrb[222].mxu0 }
 0x4d6   : > { %v7087_v53 = vpop.f32.mrb[223].mxu0 }
 0x4d7   : > { %v10568_v40 = vadd.f32 %v7149_v19, %v7085_v36  ;;  %v7088_v50 = vadd.f32 %v7087_v53, %v7086_v7 }
 0x4d9   : > { %v10570_v42 = vadd.f32 %v7152_v63, %v7088_v50 }
 0x4db   : > { %v7185_v46 = vpop.f32.mrb[224].mxu0 }
 0x4dc   : > { %v7186_v11 = vpop.f32.mrb[225].mxu0 }
 0x4dd   : > { %v7187_v12 = vadd.f32 %v7186_v11, %v7185_v46  ;;  %v7188_v10 = vpop.f32.mrb[226].mxu0 }
 0x4de   : > { %v7189_v4 = vpop.f32.mrb[227].mxu0 }
 0x4df   : > { %v7190_v1 = vadd.f32 %v7189_v4, %v7188_v10  ;;  %v7909_v37 = vadd.f32 %v10538_v57, %v7187_v12 }
 0x4e1   : > { %v7915_v54 = vadd.f32 %v10542_v31, %v7190_v1 }
 0x4e3   : > { %v7191_v44 = vpop.f32.mrb[228].mxu0 }
 0x4e4   : > { %v7192_v52 = vpop.f32.mrb[229].mxu0 }
 0x4e5   : > { %v7193_v25 = vadd.f32 %v7192_v52, %v7191_v44  ;;  %v7194_v17 = vpop.f32.mrb[230].mxu0 }
 0x4e6   : > { %v7195_v2 = vpop.f32.mrb[231].mxu0 }
 0x4e7   : > { %v7196_v15 = vadd.f32 %v7195_v2, %v7194_v17  ;;  %v7906_v3 = vadd.f32 %v10544_v21, %v7193_v25 }
 0x4e9   : > { %v7912_v45 = vadd.f32 %v10546_v41, %v7196_v15 }
 0x4eb   : > { %v7197_v20 = vpop.f32.mrb[232].mxu0 }
 0x4ec   : > { %v7198_v16 = vpop.f32.mrb[233].mxu0 }
 0x4ed   : > { %v7199_v43 = vadd.f32 %v7198_v16, %v7197_v20  ;;  %v7200_v55 = vpop.f32.mrb[234].mxu0 }
 0x4ee   : > { %v7201_v34 = vpop.f32.mrb[235].mxu0 }
 0x4ef   : > { %v7202_v58 = vadd.f32 %v7201_v34, %v7200_v55  ;;  %v7921_v57 = vadd.f32 %v10548_v49, %v7199_v43 }
 0x4f1   : > { %v7927_v31 = vadd.f32 %v10550_v14, %v7202_v58 }
 0x4f3   : > { %v7203_v61 = vpop.f32.mrb[236].mxu0 }
 0x4f4   : > { %v7204_v59 = vpop.f32.mrb[237].mxu0 }
 0x4f5   : > { %v7205_v0 = vadd.f32 %v7204_v59, %v7203_v61  ;;  %v7747_v35 = vpop.f32.mrb[208].mxu1  ;;  %v7206_v26 = vpop.f32.mrb[238].mxu0 }
 0x4f6   : > { %v7907_v6 = vadd.f32 %v7906_v3, %v7747_v35  ;;  %v5588_v38 = vpop.f32.mrb[209].mxu1  ;;  %v7207_v21 = vpop.f32.mrb[239].mxu0 }
 0x4f7   : > { %v7910_v8 = vadd.f32 %v7909_v37, %v5588_v38  ;;  %v7208_v41 = vadd.f32 %v7207_v21, %v7206_v26  ;;  %v7748_v24 = vpop.f32.mrb[210].mxu1  ;;  %v7918_v62 = vadd.f32 %v10552_v51, %v7205_v0 }
 0x4f8   : > { %v7913_v33 = vadd.f32 %v7912_v45, %v7748_v24  ;;  %v5591_v13 = vpop.f32.mrb[211].mxu1  ;;  %v5669_v19 = vadd.f32 %v7907_v6, %v10510_v30 }
 0x4f9   : > { %v5667_v5 = vadd.f32 %v7910_v8, %v10510_v30  ;;  %v7916_v49 = vadd.f32 %v7915_v54, %v5591_v13  ;;  %v7924_v14 = vadd.f32 %v10554_v60, %v7208_v41 }
 0x4fa   : > { %v5670_v18 = vadd.f32 %v7913_v33, %v10510_v30  ;;  %v5685_v53 = vmax.f32 %v5669_v19, 0.0 }
 0x4fb   : > { %v5668_v56 = vadd.f32 %v7916_v49, %v10510_v30  ;;  %v7209_v39 = vpop.f32.mrb[240].mxu0  ;;  %v5683_v22 = vmax.f32 %v5667_v5, 0.0 }
 0x4fc   : > { %v7210_v63 = vpop.f32.mrb[241].mxu0  ;;  %v5686_v37 = vmax.f32 %v5670_v18, 0.0 }
 0x4fd   : > { %v5684_v32 = vmax.f32 %v5668_v56, 0.0  ;;  %v7211_v36 = vadd.f32 %v7210_v63, %v7209_v39  ;;  %v7751_v7 = vpop.f32.mrb[212].mxu1  ;;  %v7212_v51 = vpop.f32.mrb[242].mxu0 }
 0x4fe   : > { %v7919_v50 = vadd.f32 %v7918_v62, %v7751_v7  ;;  %v5604_v46 = vpop.f32.mrb[213].mxu1  ;;  %v7213_v11 = vpop.f32.mrb[243].mxu0 }
 0x4ff   : > { %v5699_v12 = vadd.f32 %v5684_v32, %v5683_v22  ;;  %v7922_v10 = vadd.f32 %v7921_v57, %v5604_v46  ;;  %v7214_v60 = vadd.f32 %v7213_v11, %v7212_v51  ;;  %v7752_v4 = vpop.f32.mrb[214].mxu1  ;;  %v7933_v1 = vadd.f32 %v10556_v29, %v7211_v36 }
 0x500   : > { %v7925_v54 = vadd.f32 %v7924_v14, %v7752_v4  ;;  %v5607_v44 = vpop.f32.mrb[215].mxu1  ;;  %v5673_v15 = vadd.f32 %v7919_v50, %v10510_v30 }
 0x501   : > { %v5700_v52 = vadd.f32 %v5699_v12, %v5685_v53  ;;  %v5671_v25 = vadd.f32 %v7922_v10, %v10510_v30  ;;  %v7928_v17 = vadd.f32 %v7927_v31, %v5607_v44  ;;  %v7939_v2 = vadd.f32 %v10558_v27, %v7214_v60 }
 0x502   : > { %v5674_v43 = vadd.f32 %v7925_v54, %v10510_v30  ;;  %v5689_v59 = vmax.f32 %v5673_v15, 0.0 }
 0x503   : > { %v5687_v3 = vmax.f32 %v5671_v25, 0.0  ;;  %v5701_v45 = vadd.f32 %v5700_v52, %v5686_v37  ;;  %v5672_v20 = vadd.f32 %v7928_v17, %v10510_v30  ;;  %v7215_v16 = vpop.f32.mrb[244].mxu0 }
 0x504   : > { %v7216_v55 = vpop.f32.mrb[245].mxu0  ;;  %v5690_v21 = vmax.f32 %v5674_v43, 0.0 }
 0x505   : > { %v5702_v29 = vadd.f32 %v5701_v45, %v5687_v3  ;;  %v5688_v34 = vmax.f32 %v5672_v20, 0.0  ;;  %v7217_v58 = vadd.f32 %v7216_v55, %v7215_v16  ;;  %v7755_v57 = vpop.f32.mrb[216].mxu1  ;;  %v7218_v61 = vpop.f32.mrb[246].mxu0 }
 0x506   : > { %v5620_v0 = vpop.f32.mrb[217].mxu1  ;;  %v7219_v31 = vpop.f32.mrb[247].mxu0 }
 0x507   : > { %v5703_v35 = vadd.f32 %v5702_v29, %v5688_v34  ;;  %v7930_v27 = vadd.f32 %v10560_v47, %v7217_v58  ;;  %v7934_v26 = vadd.f32 %v7933_v1, %v5620_v0  ;;  %v7220_v6 = vadd.f32 %v7219_v31, %v7218_v61  ;;  %v7756_v38 = vpop.f32.mrb[218].mxu1 }
 0x508   : > { %v5623_v8 = vpop.f32.mrb[219].mxu1 }
 0x509   : > { %v5704_v41 = vadd.f32 %v5703_v35, %v5689_v59  ;;  %v7931_v24 = vadd.f32 %v7930_v27, %v7755_v57  ;;  %v5675_v62 = vadd.f32 %v7934_v26, %v10510_v30  ;;  %v7936_v33 = vadd.f32 %v10562_v48, %v7220_v6 }
 0x50a   : > { %v7940_v13 = vadd.f32 %v7939_v2, %v5623_v8 }
 0x50b   : > { %v5677_v5 = vadd.f32 %v7931_v24, %v10510_v30  ;;  %v5691_v49 = vmax.f32 %v5675_v62, 0.0  ;;  %v5705_v14 = vadd.f32 %v5704_v41, %v5690_v21  ;;  %v7937_v19 = vadd.f32 %v7936_v33, %v7756_v38  ;;  %v7221_v56 = vpop.f32.mrb[248].mxu0 }
 0x50c   : > { %v5676_v47 = vadd.f32 %v7940_v13, %v10510_v30  ;;  %v7222_v39 = vpop.f32.mrb[249].mxu0 }
 0x50d   : > { %v5706_v18 = vadd.f32 %v5705_v14, %v5691_v49  ;;  %v5678_v63 = vadd.f32 %v7937_v19, %v10510_v30  ;;  %v7223_v22 = vadd.f32 %v7222_v39, %v7221_v56  ;;  %v7759_v32 = vpop.f32.mrb[220].mxu1  ;;  %v7224_v36 = vpop.f32.mrb[250].mxu0  ;;  %v5693_v7 = vmax.f32 %v5677_v5, 0.0 }
 0x50e   : > { %v5692_v51 = vmax.f32 %v5676_v47, 0.0  ;;  %v5636_v53 = vpop.f32.mrb[221].mxu1  ;;  %v7225_v48 = vpop.f32.mrb[251].mxu0 }
 0x50f   : > { %v7945_v50 = vadd.f32 %v10564_v28, %v7223_v22  ;;  %v7226_v46 = vadd.f32 %v7225_v48, %v7224_v36  ;;  %v7760_v11 = vpop.f32.mrb[222].mxu1  ;;  %v5694_v12 = vmax.f32 %v5678_v63, 0.0 }
 0x510   : > { %v5707_v10 = vadd.f32 %v5706_v18, %v5692_v51  ;;  %v5639_v60 = vpop.f32.mrb[223].mxu1 }
 0x511   : > { %v7946_v4 = vadd.f32 %v7945_v50, %v5636_v53  ;;  %v7951_v1 = vadd.f32 %v10566_v9, %v7226_v46  ;;  %v4924_v9 = vrot.slane %v10540_v23, 4 }
 0x512   : > { %v5708_v37 = vadd.f32 %v5707_v10, %v5693_v7 }
 0x513   : > { %v5679_v54 = vadd.f32 %v7946_v4, %v10510_v30  ;;  %v7952_v44 = vadd.f32 %v7951_v1, %v5639_v60  ;;  %v7227_v52 = vpop.f32.mrb[252].mxu0  ;;  %v4925_v59 = vadd.f32 %v4924_v9, %v10540_v23 }
 0x514   : > { %v5709_v25 = vadd.f32 %v5708_v37, %v5694_v12  ;;  %v7228_v17 = vpop.f32.mrb[253].mxu0 }
 0x515   : > { %v5695_v2 = vmax.f32 %v5679_v54, 0.0  ;;  %v5680_v15 = vadd.f32 %v7952_v44, %v10510_v30  ;;  %v7229_v3 = vadd.f32 %v7228_v17, %v7227_v52  ;;  %v7230_v28 = vpop.f32.mrb[254].mxu0  ;;  %v4926_v26 = vrot.slane %v4925_v59, 2 }
 0x516   : > { %v7231_v45 = vpop.f32.mrb[255].mxu0 }
 0x517   : > { %v5710_v20 = vadd.f32 %v5709_v25, %v5695_v2  ;;  %v5696_v16 = vmax.f32 %v5680_v15, 0.0  ;;  %v7942_v43 = vadd.f32 %v10568_v40, %v7229_v3  ;;  %v7232_v55 = vadd.f32 %v7231_v45, %v7230_v28 }
 0x518   : > { %v4927_v38 = vadd.f32 %v4926_v26, %v4925_v59 }
 0x519   : > { %v5711_v29 = vadd.f32 %v5710_v20, %v5696_v16  ;;  %v7943_v34 = vadd.f32 %v7942_v43, %v7759_v32  ;;  %v7948_v58 = vadd.f32 %v10570_v42, %v7232_v55 }
 0x51a   : > { %v4928_v41 = vrot.slane %v4927_v38, 1 }
 0x51b   : > { %v5681_v57 = vadd.f32 %v7943_v34, %v10510_v30  ;;  %v7949_v61 = vadd.f32 %v7948_v58, %v7760_v11 }
 0x51c   : > { %v4929_v62 = vadd.f32 %v4928_v41, %v4927_v38 }
 0x51d   : > { %v5697_v0 = vmax.f32 %v5681_v57, 0.0  ;;  %v5682_v31 = vadd.f32 %v7949_v61, %v10510_v30 }
 0x51f   : > { %v5712_v35 = vadd.f32 %v5711_v29, %v5697_v0  ;;  %v5698_v27 = vmax.f32 %v5682_v31, 0.0 }
 0x521   : > { %v5713_v40 = vadd.f32 %v5712_v35, %v5698_v27 }
 0x523   : > { %v5714_v6 = vrot.slane %v5713_v40, 4 }
 0x525   : > { %v5715_v21 = vadd.f32 %v5714_v6, %v5713_v40 }
 0x527   : > { %v5716_v8 = vrot.slane %v5715_v21, 2 }
 0x529   : > { %v5717_v24 = vadd.f32 %v5716_v8, %v5715_v21 }
 0x52b   : > { %v5718_v42 = vrot.slane %v5717_v24, 1 }
 0x52d   : > { %v5719_v33 = vadd.f32 %v5718_v42, %v5717_v24 }
 0x52f   : > { %v5720_v13 = vadd.f32 %v5719_v33, %v4929_v62 }
 0x531   : > { %v5721_v5 = vmul.f32 0.00390625, %v5720_v13 }
 0x533   : > { %6221 = vst [vmem:[%s9800_s17 + $0x1] sm:$0x1] %v5721_v5 }
 0x534 PF: > { %s16_s21 = sadd.s32 1, %s8350_s21  }
 0x535   : > { %p13_p4 = scmp.ge.s32.totalorder %s16_s21, 4  }
 0x537   :  { %15 = sbr.rel (!%p13_p4) target bundleno = 1 (0x1), region = 83 }

</bundles_post_ra>
